<compile_context>
chip_gen: v7x
topology: tpu7x:2x2x1
jax: 0.10.0
libtpu: 0.0.40
codegen_flags: <defaults>
</compile_context>

<pallas_src>
import functools

import jax
import jax.numpy as jnp
import numpy as np
from jax.experimental import pallas as pl
from jax.experimental.pallas import tpu as pltpu

LANE = 128
SUBLANE = 8


def _round_up(x, m):
    return ((x + m - 1) // m) * m


# ----------------------------------------------------------------------------
# Fused kernel: hoisted block projection + sequential 2-layer LSTM recurrence
# ----------------------------------------------------------------------------
def _encoder_lstm_kernel(x_ref, wih1_ref, b1_ref, whh1_ref, wih2_ref,
                         whh2_ref, b2_ref, hid_ref, cell_ref, gx_ref,
                         *, seq_len, t_blk):
    """One grid step = one (batch-block, time-block).

    Grid = (n_batch_blocks [parallel], n_time_blocks [arbitrary/sequential]).

    x_ref:    (t_blk*b_blk, Ep)   bf16  embedded tokens for this block
    wih1_ref: (Ep, 4*Hp)          bf16  layer-1 input weights
    b1_ref:   (1, 4*Hp)           f32   layer-1 combined bias
    whh1_ref: (Hp, 4*Hp)          bf16  layer-1 hidden weights
    wih2_ref: (Hp, 4*Hp)          bf16  layer-2 input weights
    whh2_ref: (Hp, 4*Hp)          bf16  layer-2 hidden weights
    b2_ref:   (1, 4*Hp)           f32   layer-2 combined bias
    hid_ref:  (2, b_blk, Hp)      f32   running hidden state (resident output)
    cell_ref: (2, b_blk, Hp)      f32   running cell state   (resident output)
    gx_ref:   (t_blk*b_blk, 4*Hp) f32   VMEM scratch for the block projection
    """
    t = pl.program_id(1)

    @pl.when(t == 0)
    def _():
        hid_ref[...] = jnp.zeros_like(hid_ref)
        cell_ref[...] = jnp.zeros_like(cell_ref)

    b_blk = hid_ref.shape[1]
    Hp = hid_ref.shape[2]

    # (a) Hoisted layer-1 input projection for the whole block: one parallel,
    # lane-dense MXU matmul off the serial h-chain.  Bias add stays in f32.
    gx_ref[...] = (
        jnp.dot(x_ref[...], wih1_ref[...], preferred_element_type=jnp.float32)
        + b1_ref[...])

    def gate_act(gates, c_prev):
        # PyTorch gate order: input, forget, cell(g), output.
        # Each gate is a lane-aligned Hp-wide span -> free vreg views.
        i_g = jax.nn.sigmoid(gates[:, 0 * Hp:1 * Hp])
        f_g = jax.nn.sigmoid(gates[:, 1 * Hp:2 * Hp])
        g_g = jnp.tanh(gates[:, 2 * Hp:3 * Hp])
        o_g = jax.nn.sigmoid(gates[:, 3 * Hp:4 * Hp])
        c_new = f_g * c_prev + i_g * g_g
        h_new = o_g * jnp.tanh(c_new)
        return h_new, c_new

    predicate_tail = (seq_len % t_blk) != 0

    # (b) Sequential recurrence over the t_blk timesteps of this block.
    def step_fn(s, carry):
        h1, c1, h2, c2 = carry
        # Layer-2 h-path: no dependence on h1_t, so its MXU push can overlap
        # the layer-1 matmul + EUP chain (this replaces the old concat matmul).
        g2_h = jnp.dot(h2.astype(jnp.bfloat16), whh2_ref[...],
                       preferred_element_type=jnp.float32)
        # Layer 1: only the h-path matmul sits on the serial critical path.
        gates1 = gx_ref[pl.ds(s * b_blk, b_blk), :] + jnp.dot(
            h1.astype(jnp.bfloat16), whh1_ref[...],
            preferred_element_type=jnp.float32)
        h1n, c1n = gate_act(gates1, c1)
        # Layer 2: add the h1_t-dependent half once h1_t is ready.
        gates2 = (b2_ref[...] + g2_h
                  + jnp.dot(h1n.astype(jnp.bfloat16), wih2_ref[...],
                            preferred_element_type=jnp.float32))
        h2n, c2n = gate_act(gates2, c2)
        if predicate_tail:
            # Padded tail timesteps must not advance the state.
            keep = (t * t_blk + s) < seq_len
            h1n = jnp.where(keep, h1n, h1)
            c1n = jnp.where(keep, c1n, c1)
            h2n = jnp.where(keep, h2n, h2)
            c2n = jnp.where(keep, c2n, c2)
        return h1n, c1n, h2n, c2n

    carry0 = (hid_ref[0], cell_ref[0], hid_ref[1], cell_ref[1])
    h1, c1, h2, c2 = jax.lax.fori_loop(0, t_blk, step_fn, carry0, unroll=True)

    hid_ref[0] = h1
    cell_ref[0] = c1
    hid_ref[1] = h2
    cell_ref[1] = c2


def _fused_encoder_lstm(x_blocks, w_ih1, b1, w_hh1, w_ih2, w_hh2, b2, *,
                        seq_len, t_blk, b_blk):
    n_b, rows, Ep = x_blocks.shape
    Hp = w_hh1.shape[0]
    G = 4 * Hp
    Bp = n_b * b_blk
    n_t = rows // (t_blk * b_blk)

    kernel = functools.partial(_encoder_lstm_kernel,
                               seq_len=seq_len, t_blk=t_blk)

    hidden, cell = pl.pallas_call(
        kernel,
        out_shape=(
            jax.ShapeDtypeStruct((2, Bp, Hp), jnp.float32),
            jax.ShapeDtypeStruct((2, Bp, Hp), jnp.float32),
        ),
        grid=(n_b, n_t),
        in_specs=[
            pl.BlockSpec((None, t_blk * b_blk, Ep), lambda b, t: (b, t, 0)),
            pl.BlockSpec((Ep, G), lambda b, t: (0, 0)),
            pl.BlockSpec((1, G), lambda b, t: (0, 0)),
            pl.BlockSpec((Hp, G), lambda b, t: (0, 0)),
            pl.BlockSpec((Hp, G), lambda b, t: (0, 0)),
            pl.BlockSpec((Hp, G), lambda b, t: (0, 0)),
            pl.BlockSpec((1, G), lambda b, t: (0, 0)),
        ],
        out_specs=(
            pl.BlockSpec((2, b_blk, Hp), lambda b, t: (0, b, 0)),
            pl.BlockSpec((2, b_blk, Hp), lambda b, t: (0, b, 0)),
        ),
        scratch_shapes=[pltpu.VMEM((t_blk * b_blk, G), jnp.float32)],
        compiler_params=pltpu.CompilerParams(
            # Batch blocks are independent recurrences (-> both TCs on v7x);
            # the time axis is the serial recurrence.
            dimension_semantics=("parallel", "arbitrary"),
            # Tiny at demo size; re-derive (<= ~48 MiB) for large H on v7x.
            vmem_limit_bytes=48 * 1024 * 1024,
        ),
    )(x_blocks, w_ih1, b1, w_hh1, w_ih2, w_hh2, b2)
    return hidden, cell


# ----------------------------------------------------------------------------
# Parameters
# ----------------------------------------------------------------------------
def init_encoder_params(key, input_dim, embedding_dim, hidden_dim, n_layers):
    """Init mirroring nn.Embedding + nn.LSTM shapes (weights stored transposed)."""
    params = {}
    keys = jax.random.split(key, 1 + 4 * n_layers)
    params["embedding"] = (
        jax.random.normal(keys[0], (input_dim, embedding_dim), jnp.float32) * 0.1
    )
    layers = []
    for l in range(n_layers):
        in_size = embedding_dim if l == 0 else hidden_dim
        k_wih, k_whh, k_bih, k_bhh = keys[1 + 4 * l:1 + 4 * (l + 1)]
        scale = 1.0 / float(np.sqrt(hidden_dim))
        w_ih = jax.random.uniform(
            k_wih, (in_size, 4 * hidden_dim), jnp.float32, -scale, scale)
        w_hh = jax.random.uniform(
            k_whh, (hidden_dim, 4 * hidden_dim), jnp.float32, -scale, scale)
        b_ih = jax.random.uniform(
            k_bih, (4 * hidden_dim,), jnp.float32, -scale, scale)
        b_hh = jax.random.uniform(
            k_bhh, (4 * hidden_dim,), jnp.float32, -scale, scale)
        layers.append(
            {"w_ih": w_ih, "w_hh": w_hh, "b": (b_ih + b_hh).reshape(1, -1)})
    params["layers"] = layers
    return params


def prepare_kernel_params(params, hidden_dim):
    """Pad / cast params into the kernel-friendly layout (done once)."""
    H = hidden_dim
    Hp = _round_up(H, LANE)
    emb = params["embedding"]
    E = emb.shape[1]
    Ep = _round_up(E, LANE)
    l0, l1 = params["layers"]

    def gate_pad_cols(w):
        # (..., 4H) -> (..., 4*Hp) with each gate padded to a 128-lane span.
        lead = w.shape[:-1]
        w4 = w.reshape(lead + (4, H))
        w4 = jnp.pad(w4, [(0, 0)] * len(lead) + [(0, 0), (0, Hp - H)])
        return w4.reshape(lead + (4 * Hp,))

    # Embedding table pre-padded to Ep and stored bf16 (gather straight to bf16).
    emb_p = jnp.pad(emb, ((0, 0), (0, Ep - E))).astype(jnp.bfloat16)

    w_ih1 = gate_pad_cols(l0["w_ih"])                               # (E, 4Hp)
    w_ih1 = jnp.pad(w_ih1, ((0, Ep - E), (0, 0))).astype(jnp.bfloat16)
    b1 = gate_pad_cols(l0["b"]).astype(jnp.float32)                 # (1, 4Hp)
    w_hh1 = gate_pad_cols(l0["w_hh"])
    w_hh1 = jnp.pad(w_hh1, ((0, Hp - H), (0, 0))).astype(jnp.bfloat16)

    # Layer-2 weights kept SEPARATE (no concat): the h2@W_hh2 matmul can issue
    # before h1_t is ready and the per-step concat copy disappears.
    w_ih2 = jnp.pad(gate_pad_cols(l1["w_ih"]),
                    ((0, Hp - H), (0, 0))).astype(jnp.bfloat16)
    w_hh2 = jnp.pad(gate_pad_cols(l1["w_hh"]),
                    ((0, Hp - H), (0, 0))).astype(jnp.bfloat16)
    b2 = gate_pad_cols(l1["b"]).astype(jnp.float32)

    return {
        "embedding": emb_p,
        "w_ih1": w_ih1, "b1": b1, "w_hh1": w_hh1,
        "w_ih2": w_ih2, "w_hh2": w_hh2, "b2": b2,
    }


# ----------------------------------------------------------------------------
# Forward
# ----------------------------------------------------------------------------
@functools.partial(jax.jit, static_argnames=("hidden_dim",))
def encoder_forward(kp, src, hidden_dim):
    """src: (T, B) int32 -> (hidden, cell), each (2, B, hidden_dim)."""
    T, B = src.shape
    H = hidden_dim
    Ep = kp["embedding"].shape[1]
    Hp = kp["w_hh1"].shape[0]

    Bp = max(_round_up(B, SUBLANE), SUBLANE)
    # Two batch blocks when possible so the 'parallel' axis can use both
    # TensorCores on v7x; a single block otherwise (demo: Bp=8 -> 1 block).
    b_blk = Bp // 2 if (Bp >= 16 and Bp % 16 == 0) else Bp
    n_b = Bp // b_blk
    # Fixed-ish time block; padded tail steps are predicated inside the kernel.
    t_blk = min(32, _round_up(max(T, 1), SUBLANE))
    T_pad = _round_up(T, t_blk)

    # Embedding gather straight from the padded bf16 table (glue).
    # Dropout is identity (eval mode).
    # TODO(synk): training-mode dropout (embedding + LSTM inter-layer) not implemented.
    x = jnp.take(kp["embedding"], src, axis=0)               # (T, B, Ep) bf16
    x = jnp.pad(x, ((0, T_pad - T), (0, Bp - B), (0, 0)))    # (T_pad, Bp, Ep)
    # Group batch into blocks and flatten (time, batch-in-block) rows so the
    # kernel sees 2-D lane-dense blocks with no in-kernel reshapes.
    x = x.reshape(T_pad, n_b, b_blk, Ep).transpose(1, 0, 2, 3)
    x = x.reshape(n_b, T_pad * b_blk, Ep)

    hidden_p, cell_p = _fused_encoder_lstm(
        x, kp["w_ih1"], kp["b1"], kp["w_hh1"], kp["w_ih2"], kp["w_hh2"],
        kp["b2"], seq_len=T, t_blk=t_blk, b_blk=b_blk)

    return hidden_p[:, :B, :H], cell_p[:, :B, :H]


# ----------------------------------------------------------------------------
# Pure-JAX reference (f32, unpadded) for correctness checking
# ----------------------------------------------------------------------------
def encoder_reference(params, src):
    x = jnp.take(params["embedding"], src, axis=0)            # (T, B, E)
    B = x.shape[1]
    hiddens, cells = [], []
    inp = x
    for lp in params["layers"]:
        H = lp["w_hh"].shape[0]
        w_ih, w_hh, b = lp["w_ih"], lp["w_hh"], lp["b"]

        def step(carry, x_t, w_ih=w_ih, w_hh=w_hh, b=b, H=H):
            h, c = carry
            gates = x_t @ w_ih + h @ w_hh + b
            i_g = jax.nn.sigmoid(gates[:, 0 * H:1 * H])
            f_g = jax.nn.sigmoid(gates[:, 1 * H:2 * H])
            g_g = jnp.tanh(gates[:, 2 * H:3 * H])
            o_g = jax.nn.sigmoid(gates[:, 3 * H:4 * H])
            c = f_g * c + i_g * g_g
            h = o_g * jnp.tanh(c)
            return (h, c), h

        init = (jnp.zeros((B, H), jnp.float32), jnp.zeros((B, H), jnp.float32))
        (h, c), ys = jax.lax.scan(step, init, inp)
        hiddens.append(h)
        cells.append(c)
        inp = ys
    return jnp.stack(hiddens, axis=0), jnp.stack(cells, axis=0)


if __name__ == "__main__":
    # Small synthetic config consistent with the module (2-layer LSTM encoder).
    input_dim = 50        # vocab size
    embedding_dim = 32
    hidden_dim = 32
    n_layers = 2
    seq_len = 8
    batch = 2

    key = jax.random.PRNGKey(0)
    k_params, k_src = jax.random.split(key)
    params = init_encoder_params(
        k_params, input_dim, embedding_dim, hidden_dim, n_layers)
    kernel_params = prepare_kernel_params(params, hidden_dim)
    src = jax.random.randint(k_src, (seq_len, batch), 0, input_dim, jnp.int32)

    hidden, cell = encoder_forward(kernel_params, src, hidden_dim)
    jax.block_until_ready((hidden, cell))

    assert hidden.shape == (n_layers, batch, hidden_dim)
    assert cell.shape == (n_layers, batch, hidden_dim)

    # Numerics check vs. f32 reference (kernel uses bf16 matmul inputs).
    h_ref, c_ref = encoder_reference(params, src)
    np.testing.assert_allclose(np.asarray(hidden), np.asarray(h_ref),
                               atol=2e-2, rtol=2e-2)
    np.testing.assert_allclose(np.asarray(cell), np.asarray(c_ref),
                               atol=2e-2, rtol=2e-2)

    print("KERNEL_OK")
</pallas_src>

<mosaic_0001>
module attributes {stable_mosaic.version = 11 : i64} {
  func.func @_encoder_lstm_kernel(%arg0: i32, %arg1: i32, %arg2: memref<1x64x128xbf16, #tpu.memory_space<vmem>>, %arg3: memref<128x512xbf16, #tpu.memory_space<vmem>>, %arg4: memref<1x512xf32, #tpu.memory_space<vmem>>, %arg5: memref<128x512xbf16, #tpu.memory_space<vmem>>, %arg6: memref<128x512xbf16, #tpu.memory_space<vmem>>, %arg7: memref<128x512xbf16, #tpu.memory_space<vmem>>, %arg8: memref<1x512xf32, #tpu.memory_space<vmem>>, %arg9: memref<2x8x128xf32, #tpu.memory_space<vmem>>, %arg10: memref<2x8x128xf32, #tpu.memory_space<vmem>>, %arg11: memref<64x512xf32, #tpu.memory_space<vmem>>) attributes {dimension_semantics = [#tpu.dimension_semantics<parallel>, #tpu.dimension_semantics<arbitrary>], iteration_bounds = array<i64: 1, 1>, scalar_prefetch = 0 : i64, scratch_operands = 1 : i64, tpu.core_type = #tpu.core_type<tc>, window_params = [{transform_indices = @transform_0, window_bounds = array<i64: 1, 64, 128>}, {pipeline_mode = #tpu.pipeline_mode<synchronous>, transform_indices = @transform_1, window_bounds = array<i64: 128, 512>}, {pipeline_mode = #tpu.pipeline_mode<synchronous>, transform_indices = @transform_2, window_bounds = array<i64: 1, 512>}, {pipeline_mode = #tpu.pipeline_mode<synchronous>, transform_indices = @transform_3, window_bounds = array<i64: 128, 512>}, {pipeline_mode = #tpu.pipeline_mode<synchronous>, transform_indices = @transform_4, window_bounds = array<i64: 128, 512>}, {pipeline_mode = #tpu.pipeline_mode<synchronous>, transform_indices = @transform_5, window_bounds = array<i64: 128, 512>}, {pipeline_mode = #tpu.pipeline_mode<synchronous>, transform_indices = @transform_6, window_bounds = array<i64: 1, 512>}, {transform_indices = @transform_7, window_bounds = array<i64: 2, 8, 128>}, {transform_indices = @transform_8, window_bounds = array<i64: 2, 8, 128>}]} {
    %c0_i32 = arith.constant 0 : i32
    %0 = arith.cmpi eq, %arg1, %c0_i32 : i32
    %1 = arith.extui %0 : i1 to i32
    %c0_i32_0 = arith.constant 0 : i32
    %2 = arith.cmpi ne, %1, %c0_i32_0 : i32
    scf.if %2 {
      %cst_185 = arith.constant 0.000000e+00 : f32
      %567 = vector.broadcast %cst_185 : f32 to vector<2x8x128xf32>
      %c0_186 = arith.constant 0 : index
      %c0_187 = arith.constant 0 : index
      %c0_188 = arith.constant 0 : index
      %568 = vector.load %arg9[%c0_186, %c0_187, %c0_188] : memref<2x8x128xf32, #tpu.memory_space<vmem>>, vector<2x8x128xf32>
      tpu.vector_store %arg9[%c0_186, %c0_187, %c0_188], %567 {strides = array<i32>} : memref<2x8x128xf32, #tpu.memory_space<vmem>>, vector<2x8x128xf32>,
      %cst_189 = arith.constant 0.000000e+00 : f32
      %569 = vector.broadcast %cst_189 : f32 to vector<2x8x128xf32>
      %c0_190 = arith.constant 0 : index
      %c0_191 = arith.constant 0 : index
      %c0_192 = arith.constant 0 : index
      %570 = vector.load %arg10[%c0_190, %c0_191, %c0_192] : memref<2x8x128xf32, #tpu.memory_space<vmem>>, vector<2x8x128xf32>
      tpu.vector_store %arg10[%c0_190, %c0_191, %c0_192], %569 {strides = array<i32>} : memref<2x8x128xf32, #tpu.memory_space<vmem>>, vector<2x8x128xf32>,
    } else {
    }
    %c0 = arith.constant 0 : index
    %c0_1 = arith.constant 0 : index
    %c0_2 = arith.constant 0 : index
    %3 = vector.load %arg2[%c0, %c0_1, %c0_2] : memref<1x64x128xbf16, #tpu.memory_space<vmem>>, vector<1x64x128xbf16>
    %4 = vector.shape_cast %3 : vector<1x64x128xbf16> to vector<64x128xbf16>
    %c0_3 = arith.constant 0 : index
    %c0_4 = arith.constant 0 : index
    %5 = vector.load %arg3[%c0_3, %c0_4] : memref<128x512xbf16, #tpu.memory_space<vmem>>, vector<128x512xbf16>
    %cst = arith.constant dense<0.000000e+00> : vector<64x512xf32>
    %6 = tpu.matmul %4, %5, %cst {dimension_numbers = #tpu.dot_dimension_numbers<[1], [0], [0], [1], [0, 0, 1, 1], [], []>} : vector<64x128xbf16>, vector<128x512xbf16>, vector<64x512xf32> -> vector<64x512xf32>
    %c0_5 = arith.constant 0 : index
    %c0_6 = arith.constant 0 : index
    %7 = vector.load %arg4[%c0_5, %c0_6] : memref<1x512xf32, #tpu.memory_space<vmem>>, vector<1x512xf32>
    %8 = vector.broadcast %7 : vector<1x512xf32> to vector<64x512xf32>
    %9 = arith.addf %6, %8 : vector<64x512xf32>
    %c0_7 = arith.constant 0 : index
    %c0_8 = arith.constant 0 : index
    %10 = vector.load %arg11[%c0_7, %c0_8] : memref<64x512xf32, #tpu.memory_space<vmem>>, vector<64x512xf32>
    tpu.vector_store %arg11[%c0_7, %c0_8], %9 {strides = array<i32>} : memref<64x512xf32, #tpu.memory_space<vmem>>, vector<64x512xf32>,
    %c0_9 = arith.constant 0 : index
    %c0_10 = arith.constant 0 : index
    %c0_11 = arith.constant 0 : index
    %11 = vector.load %arg9[%c0_9, %c0_10, %c0_11] : memref<2x8x128xf32, #tpu.memory_space<vmem>>, vector<1x8x128xf32>
    %12 = vector.shape_cast %11 : vector<1x8x128xf32> to vector<8x128xf32>
    %c0_12 = arith.constant 0 : index
    %c0_13 = arith.constant 0 : index
    %c0_14 = arith.constant 0 : index
    %13 = vector.load %arg10[%c0_12, %c0_13, %c0_14] : memref<2x8x128xf32, #tpu.memory_space<vmem>>, vector<1x8x128xf32>
    %14 = vector.shape_cast %13 : vector<1x8x128xf32> to vector<8x128xf32>
    %c1 = arith.constant 1 : index
    %c0_15 = arith.constant 0 : index
    %c0_16 = arith.constant 0 : index
    %15 = vector.load %arg9[%c1, %c0_15, %c0_16] : memref<2x8x128xf32, #tpu.memory_space<vmem>>, vector<1x8x128xf32>
    %16 = vector.shape_cast %15 : vector<1x8x128xf32> to vector<8x128xf32>
    %c1_17 = arith.constant 1 : index
    %c0_18 = arith.constant 0 : index
    %c0_19 = arith.constant 0 : index
    %17 = vector.load %arg10[%c1_17, %c0_18, %c0_19] : memref<2x8x128xf32, #tpu.memory_space<vmem>>, vector<1x8x128xf32>
    %18 = vector.shape_cast %17 : vector<1x8x128xf32> to vector<8x128xf32>
    %c0_i32_20 = arith.constant 0 : i32
    %19 = arith.truncf %16 : vector<8x128xf32> to vector<8x128xbf16>
    %c0_21 = arith.constant 0 : index
    %c0_22 = arith.constant 0 : index
    %20 = vector.load %arg7[%c0_21, %c0_22] : memref<128x512xbf16, #tpu.memory_space<vmem>>, vector<128x512xbf16>
    %cst_23 = arith.constant dense<0.000000e+00> : vector<8x512xf32>
    %21 = tpu.matmul %19, %20, %cst_23 {dimension_numbers = #tpu.dot_dimension_numbers<[1], [0], [0], [1], [0, 0, 1, 1], [], []>} : vector<8x128xbf16>, vector<128x512xbf16>, vector<8x512xf32> -> vector<8x512xf32>
    %c8_i32 = arith.constant 8 : i32
    %22 = arith.muli %c0_i32_20, %c8_i32 : i32
    %23 = arith.index_cast %22 : i32 to index
    %c0_24 = arith.constant 0 : index
    %24 = vector.load %arg11[%23, %c0_24] : memref<64x512xf32, #tpu.memory_space<vmem>>, vector<8x512xf32>
    %25 = arith.truncf %12 : vector<8x128xf32> to vector<8x128xbf16>
    %c0_25 = arith.constant 0 : index
    %c0_26 = arith.constant 0 : index
    %26 = vector.load %arg5[%c0_25, %c0_26] : memref<128x512xbf16, #tpu.memory_space<vmem>>, vector<128x512xbf16>
    %cst_27 = arith.constant dense<0.000000e+00> : vector<8x512xf32>
    %27 = tpu.matmul %25, %26, %cst_27 {dimension_numbers = #tpu.dot_dimension_numbers<[1], [0], [0], [1], [0, 0, 1, 1], [], []>} : vector<8x128xbf16>, vector<128x512xbf16>, vector<8x512xf32> -> vector<8x512xf32>
    %28 = arith.addf %24, %27 : vector<8x512xf32>
    %29 = vector.extract_strided_slice %28 {offsets = [0, 0], sizes = [8, 128], strides = [1, 1]} : vector<8x512xf32> to vector<8x128xf32>
    %30 = arith.negf %29 : vector<8x128xf32>
    %31 = math.exp %30 : vector<8x128xf32>
    %cst_28 = arith.constant 1.000000e+00 : f32
    %32 = vector.broadcast %cst_28 : f32 to vector<8x128xf32>
    %33 = arith.addf %32, %31 : vector<8x128xf32>
    %34 = arith.divf %32, %33 : vector<8x128xf32>
    %35 = vector.extract_strided_slice %28 {offsets = [0, 128], sizes = [8, 128], strides = [1, 1]} : vector<8x512xf32> to vector<8x128xf32>
    %36 = arith.negf %35 : vector<8x128xf32>
    %37 = math.exp %36 : vector<8x128xf32>
    %cst_29 = arith.constant 1.000000e+00 : f32
    %38 = vector.broadcast %cst_29 : f32 to vector<8x128xf32>
    %39 = arith.addf %38, %37 : vector<8x128xf32>
    %40 = arith.divf %38, %39 : vector<8x128xf32>
    %41 = vector.extract_strided_slice %28 {offsets = [0, 256], sizes = [8, 128], strides = [1, 1]} : vector<8x512xf32> to vector<8x128xf32>
    %42 = math.tanh %41 : vector<8x128xf32>
    %43 = vector.extract_strided_slice %28 {offsets = [0, 384], sizes = [8, 128], strides = [1, 1]} : vector<8x512xf32> to vector<8x128xf32>
    %44 = arith.negf %43 : vector<8x128xf32>
    %45 = math.exp %44 : vector<8x128xf32>
    %cst_30 = arith.constant 1.000000e+00 : f32
    %46 = vector.broadcast %cst_30 : f32 to vector<8x128xf32>
    %47 = arith.addf %46, %45 : vector<8x128xf32>
    %48 = arith.divf %46, %47 : vector<8x128xf32>
    %49 = arith.mulf %40, %14 : vector<8x128xf32>
    %50 = arith.mulf %34, %42 : vector<8x128xf32>
    %51 = arith.addf %49, %50 : vector<8x128xf32>
    %52 = math.tanh %51 : vector<8x128xf32>
    %53 = arith.mulf %48, %52 : vector<8x128xf32>
    %c0_31 = arith.constant 0 : index
    %c0_32 = arith.constant 0 : index
    %54 = vector.load %arg8[%c0_31, %c0_32] : memref<1x512xf32, #tpu.memory_space<vmem>>, vector<1x512xf32>
    %55 = vector.broadcast %54 : vector<1x512xf32> to vector<8x512xf32>
    %56 = arith.addf %55, %21 : vector<8x512xf32>
    %57 = arith.truncf %53 : vector<8x128xf32> to vector<8x128xbf16>
    %c0_33 = arith.constant 0 : index
    %c0_34 = arith.constant 0 : index
    %58 = vector.load %arg6[%c0_33, %c0_34] : memref<128x512xbf16, #tpu.memory_space<vmem>>, vector<128x512xbf16>
    %cst_35 = arith.constant dense<0.000000e+00> : vector<8x512xf32>
    %59 = tpu.matmul %57, %58, %cst_35 {dimension_numbers = #tpu.dot_dimension_numbers<[1], [0], [0], [1], [0, 0, 1, 1], [], []>} : vector<8x128xbf16>, vector<128x512xbf16>, vector<8x512xf32> -> vector<8x512xf32>
    %60 = arith.addf %56, %59 : vector<8x512xf32>
    %61 = vector.extract_strided_slice %60 {offsets = [0, 0], sizes = [8, 128], strides = [1, 1]} : vector<8x512xf32> to vector<8x128xf32>
    %62 = arith.negf %61 : vector<8x128xf32>
    %63 = math.exp %62 : vector<8x128xf32>
    %cst_36 = arith.constant 1.000000e+00 : f32
    %64 = vector.broadcast %cst_36 : f32 to vector<8x128xf32>
    %65 = arith.addf %64, %63 : vector<8x128xf32>
    %66 = arith.divf %64, %65 : vector<8x128xf32>
    %67 = vector.extract_strided_slice %60 {offsets = [0, 128], sizes = [8, 128], strides = [1, 1]} : vector<8x512xf32> to vector<8x128xf32>
    %68 = arith.negf %67 : vector<8x128xf32>
    %69 = math.exp %68 : vector<8x128xf32>
    %cst_37 = arith.constant 1.000000e+00 : f32
    %70 = vector.broadcast %cst_37 : f32 to vector<8x128xf32>
    %71 = arith.addf %70, %69 : vector<8x128xf32>
    %72 = arith.divf %70, %71 : vector<8x128xf32>
    %73 = vector.extract_strided_slice %60 {offsets = [0, 256], sizes = [8, 128], strides = [1, 1]} : vector<8x512xf32> to vector<8x128xf32>
    %74 = math.tanh %73 : vector<8x128xf32>
    %75 = vector.extract_strided_slice %60 {offsets = [0, 384], sizes = [8, 128], strides = [1, 1]} : vector<8x512xf32> to vector<8x128xf32>
    %76 = arith.negf %75 : vector<8x128xf32>
    %77 = math.exp %76 : vector<8x128xf32>
    %cst_38 = arith.constant 1.000000e+00 : f32
    %78 = vector.broadcast %cst_38 : f32 to vector<8x128xf32>
    %79 = arith.addf %78, %77 : vector<8x128xf32>
    %80 = arith.divf %78, %79 : vector<8x128xf32>
    %81 = arith.mulf %72, %18 : vector<8x128xf32>
    %82 = arith.mulf %66, %74 : vector<8x128xf32>
    %83 = arith.addf %81, %82 : vector<8x128xf32>
    %84 = math.tanh %83 : vector<8x128xf32>
    %85 = arith.mulf %80, %84 : vector<8x128xf32>
    %c1_i32 = arith.constant 1 : i32
    %86 = arith.truncf %85 : vector<8x128xf32> to vector<8x128xbf16>
    %c0_39 = arith.constant 0 : index
    %c0_40 = arith.constant 0 : index
    %87 = vector.load %arg7[%c0_39, %c0_40] : memref<128x512xbf16, #tpu.memory_space<vmem>>, vector<128x512xbf16>
    %cst_41 = arith.constant dense<0.000000e+00> : vector<8x512xf32>
    %88 = tpu.matmul %86, %87, %cst_41 {dimension_numbers = #tpu.dot_dimension_numbers<[1], [0], [0], [1], [0, 0, 1, 1], [], []>} : vector<8x128xbf16>, vector<128x512xbf16>, vector<8x512xf32> -> vector<8x512xf32>
    %c8_i32_42 = arith.constant 8 : i32
    %89 = arith.muli %c1_i32, %c8_i32_42 : i32
    %90 = arith.index_cast %89 : i32 to index
    %c0_43 = arith.constant 0 : index
    %91 = vector.load %arg11[%90, %c0_43] : memref<64x512xf32, #tpu.memory_space<vmem>>, vector<8x512xf32>
    %92 = arith.truncf %53 : vector<8x128xf32> to vector<8x128xbf16>
    %c0_44 = arith.constant 0 : index
    %c0_45 = arith.constant 0 : index
    %93 = vector.load %arg5[%c0_44, %c0_45] : memref<128x512xbf16, #tpu.memory_space<vmem>>, vector<128x512xbf16>
    %cst_46 = arith.constant dense<0.000000e+00> : vector<8x512xf32>
    %94 = tpu.matmul %92, %93, %cst_46 {dimension_numbers = #tpu.dot_dimension_numbers<[1], [0], [0], [1], [0, 0, 1, 1], [], []>} : vector<8x128xbf16>, vector<128x512xbf16>, vector<8x512xf32> -> vector<8x512xf32>
    %95 = arith.addf %91, %94 : vector<8x512xf32>
    %96 = vector.extract_strided_slice %95 {offsets = [0, 0], sizes = [8, 128], strides = [1, 1]} : vector<8x512xf32> to vector<8x128xf32>
    %97 = arith.negf %96 : vector<8x128xf32>
    %98 = math.exp %97 : vector<8x128xf32>
    %cst_47 = arith.constant 1.000000e+00 : f32
    %99 = vector.broadcast %cst_47 : f32 to vector<8x128xf32>
    %100 = arith.addf %99, %98 : vector<8x128xf32>
    %101 = arith.divf %99, %100 : vector<8x128xf32>
    %102 = vector.extract_strided_slice %95 {offsets = [0, 128], sizes = [8, 128], strides = [1, 1]} : vector<8x512xf32> to vector<8x128xf32>
    %103 = arith.negf %102 : vector<8x128xf32>
    %104 = math.exp %103 : vector<8x128xf32>
    %cst_48 = arith.constant 1.000000e+00 : f32
    %105 = vector.broadcast %cst_48 : f32 to vector<8x128xf32>
    %106 = arith.addf %105, %104 : vector<8x128xf32>
    %107 = arith.divf %105, %106 : vector<8x128xf32>
    %108 = vector.extract_strided_slice %95 {offsets = [0, 256], sizes = [8, 128], strides = [1, 1]} : vector<8x512xf32> to vector<8x128xf32>
    %109 = math.tanh %108 : vector<8x128xf32>
    %110 = vector.extract_strided_slice %95 {offsets = [0, 384], sizes = [8, 128], strides = [1, 1]} : vector<8x512xf32> to vector<8x128xf32>
    %111 = arith.negf %110 : vector<8x128xf32>
    %112 = math.exp %111 : vector<8x128xf32>
    %cst_49 = arith.constant 1.000000e+00 : f32
    %113 = vector.broadcast %cst_49 : f32 to vector<8x128xf32>
    %114 = arith.addf %113, %112 : vector<8x128xf32>
    %115 = arith.divf %113, %114 : vector<8x128xf32>
    %116 = arith.mulf %107, %51 : vector<8x128xf32>
    %117 = arith.mulf %101, %109 : vector<8x128xf32>
    %118 = arith.addf %116, %117 : vector<8x128xf32>
    %119 = math.tanh %118 : vector<8x128xf32>
    %120 = arith.mulf %115, %119 : vector<8x128xf32>
    %c0_50 = arith.constant 0 : index
    %c0_51 = arith.constant 0 : index
    %121 = vector.load %arg8[%c0_50, %c0_51] : memref<1x512xf32, #tpu.memory_space<vmem>>, vector<1x512xf32>
    %122 = vector.broadcast %121 : vector<1x512xf32> to vector<8x512xf32>
    %123 = arith.addf %122, %88 : vector<8x512xf32>
    %124 = arith.truncf %120 : vector<8x128xf32> to vector<8x128xbf16>
    %c0_52 = arith.constant 0 : index
    %c0_53 = arith.constant 0 : index
    %125 = vector.load %arg6[%c0_52, %c0_53] : memref<128x512xbf16, #tpu.memory_space<vmem>>, vector<128x512xbf16>
    %cst_54 = arith.constant dense<0.000000e+00> : vector<8x512xf32>
    %126 = tpu.matmul %124, %125, %cst_54 {dimension_numbers = #tpu.dot_dimension_numbers<[1], [0], [0], [1], [0, 0, 1, 1], [], []>} : vector<8x128xbf16>, vector<128x512xbf16>, vector<8x512xf32> -> vector<8x512xf32>
    %127 = arith.addf %123, %126 : vector<8x512xf32>
    %128 = vector.extract_strided_slice %127 {offsets = [0, 0], sizes = [8, 128], strides = [1, 1]} : vector<8x512xf32> to vector<8x128xf32>
    %129 = arith.negf %128 : vector<8x128xf32>
    %130 = math.exp %129 : vector<8x128xf32>
    %cst_55 = arith.constant 1.000000e+00 : f32
    %131 = vector.broadcast %cst_55 : f32 to vector<8x128xf32>
    %132 = arith.addf %131, %130 : vector<8x128xf32>
    %133 = arith.divf %131, %132 : vector<8x128xf32>
    %134 = vector.extract_strided_slice %127 {offsets = [0, 128], sizes = [8, 128], strides = [1, 1]} : vector<8x512xf32> to vector<8x128xf32>
    %135 = arith.negf %134 : vector<8x128xf32>
    %136 = math.exp %135 : vector<8x128xf32>
    %cst_56 = arith.constant 1.000000e+00 : f32
    %137 = vector.broadcast %cst_56 : f32 to vector<8x128xf32>
    %138 = arith.addf %137, %136 : vector<8x128xf32>
    %139 = arith.divf %137, %138 : vector<8x128xf32>
    %140 = vector.extract_strided_slice %127 {offsets = [0, 256], sizes = [8, 128], strides = [1, 1]} : vector<8x512xf32> to vector<8x128xf32>
    %141 = math.tanh %140 : vector<8x128xf32>
    %142 = vector.extract_strided_slice %127 {offsets = [0, 384], sizes = [8, 128], strides = [1, 1]} : vector<8x512xf32> to vector<8x128xf32>
    %143 = arith.negf %142 : vector<8x128xf32>
    %144 = math.exp %143 : vector<8x128xf32>
    %cst_57 = arith.constant 1.000000e+00 : f32
    %145 = vector.broadcast %cst_57 : f32 to vector<8x128xf32>
    %146 = arith.addf %145, %144 : vector<8x128xf32>
    %147 = arith.divf %145, %146 : vector<8x128xf32>
    %148 = arith.mulf %139, %83 : vector<8x128xf32>
    %149 = arith.mulf %133, %141 : vector<8x128xf32>
    %150 = arith.addf %148, %149 : vector<8x128xf32>
    %151 = math.tanh %150 : vector<8x128xf32>
    %152 = arith.mulf %147, %151 : vector<8x128xf32>
    %c2_i32 = arith.constant 2 : i32
    %153 = arith.truncf %152 : vector<8x128xf32> to vector<8x128xbf16>
    %c0_58 = arith.constant 0 : index
    %c0_59 = arith.constant 0 : index
    %154 = vector.load %arg7[%c0_58, %c0_59] : memref<128x512xbf16, #tpu.memory_space<vmem>>, vector<128x512xbf16>
    %cst_60 = arith.constant dense<0.000000e+00> : vector<8x512xf32>
    %155 = tpu.matmul %153, %154, %cst_60 {dimension_numbers = #tpu.dot_dimension_numbers<[1], [0], [0], [1], [0, 0, 1, 1], [], []>} : vector<8x128xbf16>, vector<128x512xbf16>, vector<8x512xf32> -> vector<8x512xf32>
    %c8_i32_61 = arith.constant 8 : i32
    %156 = arith.muli %c2_i32, %c8_i32_61 : i32
    %157 = arith.index_cast %156 : i32 to index
    %c0_62 = arith.constant 0 : index
    %158 = vector.load %arg11[%157, %c0_62] : memref<64x512xf32, #tpu.memory_space<vmem>>, vector<8x512xf32>
    %159 = arith.truncf %120 : vector<8x128xf32> to vector<8x128xbf16>
    %c0_63 = arith.constant 0 : index
    %c0_64 = arith.constant 0 : index
    %160 = vector.load %arg5[%c0_63, %c0_64] : memref<128x512xbf16, #tpu.memory_space<vmem>>, vector<128x512xbf16>
    %cst_65 = arith.constant dense<0.000000e+00> : vector<8x512xf32>
    %161 = tpu.matmul %159, %160, %cst_65 {dimension_numbers = #tpu.dot_dimension_numbers<[1], [0], [0], [1], [0, 0, 1, 1], [], []>} : vector<8x128xbf16>, vector<128x512xbf16>, vector<8x512xf32> -> vector<8x512xf32>
    %162 = arith.addf %158, %161 : vector<8x512xf32>
    %163 = vector.extract_strided_slice %162 {offsets = [0, 0], sizes = [8, 128], strides = [1, 1]} : vector<8x512xf32> to vector<8x128xf32>
    %164 = arith.negf %163 : vector<8x128xf32>
    %165 = math.exp %164 : vector<8x128xf32>
    %cst_66 = arith.constant 1.000000e+00 : f32
    %166 = vector.broadcast %cst_66 : f32 to vector<8x128xf32>
    %167 = arith.addf %166, %165 : vector<8x128xf32>
    %168 = arith.divf %166, %167 : vector<8x128xf32>
    %169 = vector.extract_strided_slice %162 {offsets = [0, 128], sizes = [8, 128], strides = [1, 1]} : vector<8x512xf32> to vector<8x128xf32>
    %170 = arith.negf %169 : vector<8x128xf32>
    %171 = math.exp %170 : vector<8x128xf32>
    %cst_67 = arith.constant 1.000000e+00 : f32
    %172 = vector.broadcast %cst_67 : f32 to vector<8x128xf32>
    %173 = arith.addf %172, %171 : vector<8x128xf32>
    %174 = arith.divf %172, %173 : vector<8x128xf32>
    %175 = vector.extract_strided_slice %162 {offsets = [0, 256], sizes = [8, 128], strides = [1, 1]} : vector<8x512xf32> to vector<8x128xf32>
    %176 = math.tanh %175 : vector<8x128xf32>
    %177 = vector.extract_strided_slice %162 {offsets = [0, 384], sizes = [8, 128], strides = [1, 1]} : vector<8x512xf32> to vector<8x128xf32>
    %178 = arith.negf %177 : vector<8x128xf32>
    %179 = math.exp %178 : vector<8x128xf32>
    %cst_68 = arith.constant 1.000000e+00 : f32
    %180 = vector.broadcast %cst_68 : f32 to vector<8x128xf32>
    %181 = arith.addf %180, %179 : vector<8x128xf32>
    %182 = arith.divf %180, %181 : vector<8x128xf32>
    %183 = arith.mulf %174, %118 : vector<8x128xf32>
    %184 = arith.mulf %168, %176 : vector<8x128xf32>
    %185 = arith.addf %183, %184 : vector<8x128xf32>
    %186 = math.tanh %185 : vector<8x128xf32>
    %187 = arith.mulf %182, %186 : vector<8x128xf32>
    %c0_69 = arith.constant 0 : index
    %c0_70 = arith.constant 0 : index
    %188 = vector.load %arg8[%c0_69, %c0_70] : memref<1x512xf32, #tpu.memory_space<vmem>>, vector<1x512xf32>
    %189 = vector.broadcast %188 : vector<1x512xf32> to vector<8x512xf32>
    %190 = arith.addf %189, %155 : vector<8x512xf32>
    %191 = arith.truncf %187 : vector<8x128xf32> to vector<8x128xbf16>
    %c0_71 = arith.constant 0 : index
    %c0_72 = arith.constant 0 : index
    %192 = vector.load %arg6[%c0_71, %c0_72] : memref<128x512xbf16, #tpu.memory_space<vmem>>, vector<128x512xbf16>
    %cst_73 = arith.constant dense<0.000000e+00> : vector<8x512xf32>
    %193 = tpu.matmul %191, %192, %cst_73 {dimension_numbers = #tpu.dot_dimension_numbers<[1], [0], [0], [1], [0, 0, 1, 1], [], []>} : vector<8x128xbf16>, vector<128x512xbf16>, vector<8x512xf32> -> vector<8x512xf32>
    %194 = arith.addf %190, %193 : vector<8x512xf32>
    %195 = vector.extract_strided_slice %194 {offsets = [0, 0], sizes = [8, 128], strides = [1, 1]} : vector<8x512xf32> to vector<8x128xf32>
    %196 = arith.negf %195 : vector<8x128xf32>
    %197 = math.exp %196 : vector<8x128xf32>
    %cst_74 = arith.constant 1.000000e+00 : f32
    %198 = vector.broadcast %cst_74 : f32 to vector<8x128xf32>
    %199 = arith.addf %198, %197 : vector<8x128xf32>
    %200 = arith.divf %198, %199 : vector<8x128xf32>
    %201 = vector.extract_strided_slice %194 {offsets = [0, 128], sizes = [8, 128], strides = [1, 1]} : vector<8x512xf32> to vector<8x128xf32>
    %202 = arith.negf %201 : vector<8x128xf32>
    %203 = math.exp %202 : vector<8x128xf32>
    %cst_75 = arith.constant 1.000000e+00 : f32
    %204 = vector.broadcast %cst_75 : f32 to vector<8x128xf32>
    %205 = arith.addf %204, %203 : vector<8x128xf32>
    %206 = arith.divf %204, %205 : vector<8x128xf32>
    %207 = vector.extract_strided_slice %194 {offsets = [0, 256], sizes = [8, 128], strides = [1, 1]} : vector<8x512xf32> to vector<8x128xf32>
    %208 = math.tanh %207 : vector<8x128xf32>
    %209 = vector.extract_strided_slice %194 {offsets = [0, 384], sizes = [8, 128], strides = [1, 1]} : vector<8x512xf32> to vector<8x128xf32>
    %210 = arith.negf %209 : vector<8x128xf32>
    %211 = math.exp %210 : vector<8x128xf32>
    %cst_76 = arith.constant 1.000000e+00 : f32
    %212 = vector.broadcast %cst_76 : f32 to vector<8x128xf32>
    %213 = arith.addf %212, %211 : vector<8x128xf32>
    %214 = arith.divf %212, %213 : vector<8x128xf32>
    %215 = arith.mulf %206, %150 : vector<8x128xf32>
    %216 = arith.mulf %200, %208 : vector<8x128xf32>
    %217 = arith.addf %215, %216 : vector<8x128xf32>
    %218 = math.tanh %217 : vector<8x128xf32>
    %219 = arith.mulf %214, %218 : vector<8x128xf32>
    %c3_i32 = arith.constant 3 : i32
    %220 = arith.truncf %219 : vector<8x128xf32> to vector<8x128xbf16>
    %c0_77 = arith.constant 0 : index
    %c0_78 = arith.constant 0 : index
    %221 = vector.load %arg7[%c0_77, %c0_78] : memref<128x512xbf16, #tpu.memory_space<vmem>>, vector<128x512xbf16>
    %cst_79 = arith.constant dense<0.000000e+00> : vector<8x512xf32>
    %222 = tpu.matmul %220, %221, %cst_79 {dimension_numbers = #tpu.dot_dimension_numbers<[1], [0], [0], [1], [0, 0, 1, 1], [], []>} : vector<8x128xbf16>, vector<128x512xbf16>, vector<8x512xf32> -> vector<8x512xf32>
    %c8_i32_80 = arith.constant 8 : i32
    %223 = arith.muli %c3_i32, %c8_i32_80 : i32
    %224 = arith.index_cast %223 : i32 to index
    %c0_81 = arith.constant 0 : index
    %225 = vector.load %arg11[%224, %c0_81] : memref<64x512xf32, #tpu.memory_space<vmem>>, vector<8x512xf32>
    %226 = arith.truncf %187 : vector<8x128xf32> to vector<8x128xbf16>
    %c0_82 = arith.constant 0 : index
    %c0_83 = arith.constant 0 : index
    %227 = vector.load %arg5[%c0_82, %c0_83] : memref<128x512xbf16, #tpu.memory_space<vmem>>, vector<128x512xbf16>
    %cst_84 = arith.constant dense<0.000000e+00> : vector<8x512xf32>
    %228 = tpu.matmul %226, %227, %cst_84 {dimension_numbers = #tpu.dot_dimension_numbers<[1], [0], [0], [1], [0, 0, 1, 1], [], []>} : vector<8x128xbf16>, vector<128x512xbf16>, vector<8x512xf32> -> vector<8x512xf32>
    %229 = arith.addf %225, %228 : vector<8x512xf32>
    %230 = vector.extract_strided_slice %229 {offsets = [0, 0], sizes = [8, 128], strides = [1, 1]} : vector<8x512xf32> to vector<8x128xf32>
    %231 = arith.negf %230 : vector<8x128xf32>
    %232 = math.exp %231 : vector<8x128xf32>
    %cst_85 = arith.constant 1.000000e+00 : f32
    %233 = vector.broadcast %cst_85 : f32 to vector<8x128xf32>
    %234 = arith.addf %233, %232 : vector<8x128xf32>
    %235 = arith.divf %233, %234 : vector<8x128xf32>
    %236 = vector.extract_strided_slice %229 {offsets = [0, 128], sizes = [8, 128], strides = [1, 1]} : vector<8x512xf32> to vector<8x128xf32>
    %237 = arith.negf %236 : vector<8x128xf32>
    %238 = math.exp %237 : vector<8x128xf32>
    %cst_86 = arith.constant 1.000000e+00 : f32
    %239 = vector.broadcast %cst_86 : f32 to vector<8x128xf32>
    %240 = arith.addf %239, %238 : vector<8x128xf32>
    %241 = arith.divf %239, %240 : vector<8x128xf32>
    %242 = vector.extract_strided_slice %229 {offsets = [0, 256], sizes = [8, 128], strides = [1, 1]} : vector<8x512xf32> to vector<8x128xf32>
    %243 = math.tanh %242 : vector<8x128xf32>
    %244 = vector.extract_strided_slice %229 {offsets = [0, 384], sizes = [8, 128], strides = [1, 1]} : vector<8x512xf32> to vector<8x128xf32>
    %245 = arith.negf %244 : vector<8x128xf32>
    %246 = math.exp %245 : vector<8x128xf32>
    %cst_87 = arith.constant 1.000000e+00 : f32
    %247 = vector.broadcast %cst_87 : f32 to vector<8x128xf32>
    %248 = arith.addf %247, %246 : vector<8x128xf32>
    %249 = arith.divf %247, %248 : vector<8x128xf32>
    %250 = arith.mulf %241, %185 : vector<8x128xf32>
    %251 = arith.mulf %235, %243 : vector<8x128xf32>
    %252 = arith.addf %250, %251 : vector<8x128xf32>
    %253 = math.tanh %252 : vector<8x128xf32>
    %254 = arith.mulf %249, %253 : vector<8x128xf32>
    %c0_88 = arith.constant 0 : index
    %c0_89 = arith.constant 0 : index
    %255 = vector.load %arg8[%c0_88, %c0_89] : memref<1x512xf32, #tpu.memory_space<vmem>>, vector<1x512xf32>
    %256 = vector.broadcast %255 : vector<1x512xf32> to vector<8x512xf32>
    %257 = arith.addf %256, %222 : vector<8x512xf32>
    %258 = arith.truncf %254 : vector<8x128xf32> to vector<8x128xbf16>
    %c0_90 = arith.constant 0 : index
    %c0_91 = arith.constant 0 : index
    %259 = vector.load %arg6[%c0_90, %c0_91] : memref<128x512xbf16, #tpu.memory_space<vmem>>, vector<128x512xbf16>
    %cst_92 = arith.constant dense<0.000000e+00> : vector<8x512xf32>
    %260 = tpu.matmul %258, %259, %cst_92 {dimension_numbers = #tpu.dot_dimension_numbers<[1], [0], [0], [1], [0, 0, 1, 1], [], []>} : vector<8x128xbf16>, vector<128x512xbf16>, vector<8x512xf32> -> vector<8x512xf32>
    %261 = arith.addf %257, %260 : vector<8x512xf32>
    %262 = vector.extract_strided_slice %261 {offsets = [0, 0], sizes = [8, 128], strides = [1, 1]} : vector<8x512xf32> to vector<8x128xf32>
    %263 = arith.negf %262 : vector<8x128xf32>
    %264 = math.exp %263 : vector<8x128xf32>
    %cst_93 = arith.constant 1.000000e+00 : f32
    %265 = vector.broadcast %cst_93 : f32 to vector<8x128xf32>
    %266 = arith.addf %265, %264 : vector<8x128xf32>
    %267 = arith.divf %265, %266 : vector<8x128xf32>
    %268 = vector.extract_strided_slice %261 {offsets = [0, 128], sizes = [8, 128], strides = [1, 1]} : vector<8x512xf32> to vector<8x128xf32>
    %269 = arith.negf %268 : vector<8x128xf32>
    %270 = math.exp %269 : vector<8x128xf32>
    %cst_94 = arith.constant 1.000000e+00 : f32
    %271 = vector.broadcast %cst_94 : f32 to vector<8x128xf32>
    %272 = arith.addf %271, %270 : vector<8x128xf32>
    %273 = arith.divf %271, %272 : vector<8x128xf32>
    %274 = vector.extract_strided_slice %261 {offsets = [0, 256], sizes = [8, 128], strides = [1, 1]} : vector<8x512xf32> to vector<8x128xf32>
    %275 = math.tanh %274 : vector<8x128xf32>
    %276 = vector.extract_strided_slice %261 {offsets = [0, 384], sizes = [8, 128], strides = [1, 1]} : vector<8x512xf32> to vector<8x128xf32>
    %277 = arith.negf %276 : vector<8x128xf32>
    %278 = math.exp %277 : vector<8x128xf32>
    %cst_95 = arith.constant 1.000000e+00 : f32
    %279 = vector.broadcast %cst_95 : f32 to vector<8x128xf32>
    %280 = arith.addf %279, %278 : vector<8x128xf32>
    %281 = arith.divf %279, %280 : vector<8x128xf32>
    %282 = arith.mulf %273, %217 : vector<8x128xf32>
    %283 = arith.mulf %267, %275 : vector<8x128xf32>
    %284 = arith.addf %282, %283 : vector<8x128xf32>
    %285 = math.tanh %284 : vector<8x128xf32>
    %286 = arith.mulf %281, %285 : vector<8x128xf32>
    %c4_i32 = arith.constant 4 : i32
    %287 = arith.truncf %286 : vector<8x128xf32> to vector<8x128xbf16>
    %c0_96 = arith.constant 0 : index
    %c0_97 = arith.constant 0 : index
    %288 = vector.load %arg7[%c0_96, %c0_97] : memref<128x512xbf16, #tpu.memory_space<vmem>>, vector<128x512xbf16>
    %cst_98 = arith.constant dense<0.000000e+00> : vector<8x512xf32>
    %289 = tpu.matmul %287, %288, %cst_98 {dimension_numbers = #tpu.dot_dimension_numbers<[1], [0], [0], [1], [0, 0, 1, 1], [], []>} : vector<8x128xbf16>, vector<128x512xbf16>, vector<8x512xf32> -> vector<8x512xf32>
    %c8_i32_99 = arith.constant 8 : i32
    %290 = arith.muli %c4_i32, %c8_i32_99 : i32
    %291 = arith.index_cast %290 : i32 to index
    %c0_100 = arith.constant 0 : index
    %292 = vector.load %arg11[%291, %c0_100] : memref<64x512xf32, #tpu.memory_space<vmem>>, vector<8x512xf32>
    %293 = arith.truncf %254 : vector<8x128xf32> to vector<8x128xbf16>
    %c0_101 = arith.constant 0 : index
    %c0_102 = arith.constant 0 : index
    %294 = vector.load %arg5[%c0_101, %c0_102] : memref<128x512xbf16, #tpu.memory_space<vmem>>, vector<128x512xbf16>
    %cst_103 = arith.constant dense<0.000000e+00> : vector<8x512xf32>
    %295 = tpu.matmul %293, %294, %cst_103 {dimension_numbers = #tpu.dot_dimension_numbers<[1], [0], [0], [1], [0, 0, 1, 1], [], []>} : vector<8x128xbf16>, vector<128x512xbf16>, vector<8x512xf32> -> vector<8x512xf32>
    %296 = arith.addf %292, %295 : vector<8x512xf32>
    %297 = vector.extract_strided_slice %296 {offsets = [0, 0], sizes = [8, 128], strides = [1, 1]} : vector<8x512xf32> to vector<8x128xf32>
    %298 = arith.negf %297 : vector<8x128xf32>
    %299 = math.exp %298 : vector<8x128xf32>
    %cst_104 = arith.constant 1.000000e+00 : f32
    %300 = vector.broadcast %cst_104 : f32 to vector<8x128xf32>
    %301 = arith.addf %300, %299 : vector<8x128xf32>
    %302 = arith.divf %300, %301 : vector<8x128xf32>
    %303 = vector.extract_strided_slice %296 {offsets = [0, 128], sizes = [8, 128], strides = [1, 1]} : vector<8x512xf32> to vector<8x128xf32>
    %304 = arith.negf %303 : vector<8x128xf32>
    %305 = math.exp %304 : vector<8x128xf32>
    %cst_105 = arith.constant 1.000000e+00 : f32
    %306 = vector.broadcast %cst_105 : f32 to vector<8x128xf32>
    %307 = arith.addf %306, %305 : vector<8x128xf32>
    %308 = arith.divf %306, %307 : vector<8x128xf32>
    %309 = vector.extract_strided_slice %296 {offsets = [0, 256], sizes = [8, 128], strides = [1, 1]} : vector<8x512xf32> to vector<8x128xf32>
    %310 = math.tanh %309 : vector<8x128xf32>
    %311 = vector.extract_strided_slice %296 {offsets = [0, 384], sizes = [8, 128], strides = [1, 1]} : vector<8x512xf32> to vector<8x128xf32>
    %312 = arith.negf %311 : vector<8x128xf32>
    %313 = math.exp %312 : vector<8x128xf32>
    %cst_106 = arith.constant 1.000000e+00 : f32
    %314 = vector.broadcast %cst_106 : f32 to vector<8x128xf32>
    %315 = arith.addf %314, %313 : vector<8x128xf32>
    %316 = arith.divf %314, %315 : vector<8x128xf32>
    %317 = arith.mulf %308, %252 : vector<8x128xf32>
    %318 = arith.mulf %302, %310 : vector<8x128xf32>
    %319 = arith.addf %317, %318 : vector<8x128xf32>
    %320 = math.tanh %319 : vector<8x128xf32>
    %321 = arith.mulf %316, %320 : vector<8x128xf32>
    %c0_107 = arith.constant 0 : index
    %c0_108 = arith.constant 0 : index
    %322 = vector.load %arg8[%c0_107, %c0_108] : memref<1x512xf32, #tpu.memory_space<vmem>>, vector<1x512xf32>
    %323 = vector.broadcast %322 : vector<1x512xf32> to vector<8x512xf32>
    %324 = arith.addf %323, %289 : vector<8x512xf32>
    %325 = arith.truncf %321 : vector<8x128xf32> to vector<8x128xbf16>
    %c0_109 = arith.constant 0 : index
    %c0_110 = arith.constant 0 : index
    %326 = vector.load %arg6[%c0_109, %c0_110] : memref<128x512xbf16, #tpu.memory_space<vmem>>, vector<128x512xbf16>
    %cst_111 = arith.constant dense<0.000000e+00> : vector<8x512xf32>
    %327 = tpu.matmul %325, %326, %cst_111 {dimension_numbers = #tpu.dot_dimension_numbers<[1], [0], [0], [1], [0, 0, 1, 1], [], []>} : vector<8x128xbf16>, vector<128x512xbf16>, vector<8x512xf32> -> vector<8x512xf32>
    %328 = arith.addf %324, %327 : vector<8x512xf32>
    %329 = vector.extract_strided_slice %328 {offsets = [0, 0], sizes = [8, 128], strides = [1, 1]} : vector<8x512xf32> to vector<8x128xf32>
    %330 = arith.negf %329 : vector<8x128xf32>
    %331 = math.exp %330 : vector<8x128xf32>
    %cst_112 = arith.constant 1.000000e+00 : f32
    %332 = vector.broadcast %cst_112 : f32 to vector<8x128xf32>
    %333 = arith.addf %332, %331 : vector<8x128xf32>
    %334 = arith.divf %332, %333 : vector<8x128xf32>
    %335 = vector.extract_strided_slice %328 {offsets = [0, 128], sizes = [8, 128], strides = [1, 1]} : vector<8x512xf32> to vector<8x128xf32>
    %336 = arith.negf %335 : vector<8x128xf32>
    %337 = math.exp %336 : vector<8x128xf32>
    %cst_113 = arith.constant 1.000000e+00 : f32
    %338 = vector.broadcast %cst_113 : f32 to vector<8x128xf32>
    %339 = arith.addf %338, %337 : vector<8x128xf32>
    %340 = arith.divf %338, %339 : vector<8x128xf32>
    %341 = vector.extract_strided_slice %328 {offsets = [0, 256], sizes = [8, 128], strides = [1, 1]} : vector<8x512xf32> to vector<8x128xf32>
    %342 = math.tanh %341 : vector<8x128xf32>
    %343 = vector.extract_strided_slice %328 {offsets = [0, 384], sizes = [8, 128], strides = [1, 1]} : vector<8x512xf32> to vector<8x128xf32>
    %344 = arith.negf %343 : vector<8x128xf32>
    %345 = math.exp %344 : vector<8x128xf32>
    %cst_114 = arith.constant 1.000000e+00 : f32
    %346 = vector.broadcast %cst_114 : f32 to vector<8x128xf32>
    %347 = arith.addf %346, %345 : vector<8x128xf32>
    %348 = arith.divf %346, %347 : vector<8x128xf32>
    %349 = arith.mulf %340, %284 : vector<8x128xf32>
    %350 = arith.mulf %334, %342 : vector<8x128xf32>
    %351 = arith.addf %349, %350 : vector<8x128xf32>
    %352 = math.tanh %351 : vector<8x128xf32>
    %353 = arith.mulf %348, %352 : vector<8x128xf32>
    %c5_i32 = arith.constant 5 : i32
    %354 = arith.truncf %353 : vector<8x128xf32> to vector<8x128xbf16>
    %c0_115 = arith.constant 0 : index
    %c0_116 = arith.constant 0 : index
    %355 = vector.load %arg7[%c0_115, %c0_116] : memref<128x512xbf16, #tpu.memory_space<vmem>>, vector<128x512xbf16>
    %cst_117 = arith.constant dense<0.000000e+00> : vector<8x512xf32>
    %356 = tpu.matmul %354, %355, %cst_117 {dimension_numbers = #tpu.dot_dimension_numbers<[1], [0], [0], [1], [0, 0, 1, 1], [], []>} : vector<8x128xbf16>, vector<128x512xbf16>, vector<8x512xf32> -> vector<8x512xf32>
    %c8_i32_118 = arith.constant 8 : i32
    %357 = arith.muli %c5_i32, %c8_i32_118 : i32
    %358 = arith.index_cast %357 : i32 to index
    %c0_119 = arith.constant 0 : index
    %359 = vector.load %arg11[%358, %c0_119] : memref<64x512xf32, #tpu.memory_space<vmem>>, vector<8x512xf32>
    %360 = arith.truncf %321 : vector<8x128xf32> to vector<8x128xbf16>
    %c0_120 = arith.constant 0 : index
    %c0_121 = arith.constant 0 : index
    %361 = vector.load %arg5[%c0_120, %c0_121] : memref<128x512xbf16, #tpu.memory_space<vmem>>, vector<128x512xbf16>
    %cst_122 = arith.constant dense<0.000000e+00> : vector<8x512xf32>
    %362 = tpu.matmul %360, %361, %cst_122 {dimension_numbers = #tpu.dot_dimension_numbers<[1], [0], [0], [1], [0, 0, 1, 1], [], []>} : vector<8x128xbf16>, vector<128x512xbf16>, vector<8x512xf32> -> vector<8x512xf32>
    %363 = arith.addf %359, %362 : vector<8x512xf32>
    %364 = vector.extract_strided_slice %363 {offsets = [0, 0], sizes = [8, 128], strides = [1, 1]} : vector<8x512xf32> to vector<8x128xf32>
    %365 = arith.negf %364 : vector<8x128xf32>
    %366 = math.exp %365 : vector<8x128xf32>
    %cst_123 = arith.constant 1.000000e+00 : f32
    %367 = vector.broadcast %cst_123 : f32 to vector<8x128xf32>
    %368 = arith.addf %367, %366 : vector<8x128xf32>
    %369 = arith.divf %367, %368 : vector<8x128xf32>
    %370 = vector.extract_strided_slice %363 {offsets = [0, 128], sizes = [8, 128], strides = [1, 1]} : vector<8x512xf32> to vector<8x128xf32>
    %371 = arith.negf %370 : vector<8x128xf32>
    %372 = math.exp %371 : vector<8x128xf32>
    %cst_124 = arith.constant 1.000000e+00 : f32
    %373 = vector.broadcast %cst_124 : f32 to vector<8x128xf32>
    %374 = arith.addf %373, %372 : vector<8x128xf32>
    %375 = arith.divf %373, %374 : vector<8x128xf32>
    %376 = vector.extract_strided_slice %363 {offsets = [0, 256], sizes = [8, 128], strides = [1, 1]} : vector<8x512xf32> to vector<8x128xf32>
    %377 = math.tanh %376 : vector<8x128xf32>
    %378 = vector.extract_strided_slice %363 {offsets = [0, 384], sizes = [8, 128], strides = [1, 1]} : vector<8x512xf32> to vector<8x128xf32>
    %379 = arith.negf %378 : vector<8x128xf32>
    %380 = math.exp %379 : vector<8x128xf32>
    %cst_125 = arith.constant 1.000000e+00 : f32
    %381 = vector.broadcast %cst_125 : f32 to vector<8x128xf32>
    %382 = arith.addf %381, %380 : vector<8x128xf32>
    %383 = arith.divf %381, %382 : vector<8x128xf32>
    %384 = arith.mulf %375, %319 : vector<8x128xf32>
    %385 = arith.mulf %369, %377 : vector<8x128xf32>
    %386 = arith.addf %384, %385 : vector<8x128xf32>
    %387 = math.tanh %386 : vector<8x128xf32>
    %388 = arith.mulf %383, %387 : vector<8x128xf32>
    %c0_126 = arith.constant 0 : index
    %c0_127 = arith.constant 0 : index
    %389 = vector.load %arg8[%c0_126, %c0_127] : memref<1x512xf32, #tpu.memory_space<vmem>>, vector<1x512xf32>
    %390 = vector.broadcast %389 : vector<1x512xf32> to vector<8x512xf32>
    %391 = arith.addf %390, %356 : vector<8x512xf32>
    %392 = arith.truncf %388 : vector<8x128xf32> to vector<8x128xbf16>
    %c0_128 = arith.constant 0 : index
    %c0_129 = arith.constant 0 : index
    %393 = vector.load %arg6[%c0_128, %c0_129] : memref<128x512xbf16, #tpu.memory_space<vmem>>, vector<128x512xbf16>
    %cst_130 = arith.constant dense<0.000000e+00> : vector<8x512xf32>
    %394 = tpu.matmul %392, %393, %cst_130 {dimension_numbers = #tpu.dot_dimension_numbers<[1], [0], [0], [1], [0, 0, 1, 1], [], []>} : vector<8x128xbf16>, vector<128x512xbf16>, vector<8x512xf32> -> vector<8x512xf32>
    %395 = arith.addf %391, %394 : vector<8x512xf32>
    %396 = vector.extract_strided_slice %395 {offsets = [0, 0], sizes = [8, 128], strides = [1, 1]} : vector<8x512xf32> to vector<8x128xf32>
    %397 = arith.negf %396 : vector<8x128xf32>
    %398 = math.exp %397 : vector<8x128xf32>
    %cst_131 = arith.constant 1.000000e+00 : f32
    %399 = vector.broadcast %cst_131 : f32 to vector<8x128xf32>
    %400 = arith.addf %399, %398 : vector<8x128xf32>
    %401 = arith.divf %399, %400 : vector<8x128xf32>
    %402 = vector.extract_strided_slice %395 {offsets = [0, 128], sizes = [8, 128], strides = [1, 1]} : vector<8x512xf32> to vector<8x128xf32>
    %403 = arith.negf %402 : vector<8x128xf32>
    %404 = math.exp %403 : vector<8x128xf32>
    %cst_132 = arith.constant 1.000000e+00 : f32
    %405 = vector.broadcast %cst_132 : f32 to vector<8x128xf32>
    %406 = arith.addf %405, %404 : vector<8x128xf32>
    %407 = arith.divf %405, %406 : vector<8x128xf32>
    %408 = vector.extract_strided_slice %395 {offsets = [0, 256], sizes = [8, 128], strides = [1, 1]} : vector<8x512xf32> to vector<8x128xf32>
    %409 = math.tanh %408 : vector<8x128xf32>
    %410 = vector.extract_strided_slice %395 {offsets = [0, 384], sizes = [8, 128], strides = [1, 1]} : vector<8x512xf32> to vector<8x128xf32>
    %411 = arith.negf %410 : vector<8x128xf32>
    %412 = math.exp %411 : vector<8x128xf32>
    %cst_133 = arith.constant 1.000000e+00 : f32
    %413 = vector.broadcast %cst_133 : f32 to vector<8x128xf32>
    %414 = arith.addf %413, %412 : vector<8x128xf32>
    %415 = arith.divf %413, %414 : vector<8x128xf32>
    %416 = arith.mulf %407, %351 : vector<8x128xf32>
    %417 = arith.mulf %401, %409 : vector<8x128xf32>
    %418 = arith.addf %416, %417 : vector<8x128xf32>
    %419 = math.tanh %418 : vector<8x128xf32>
    %420 = arith.mulf %415, %419 : vector<8x128xf32>
    %c6_i32 = arith.constant 6 : i32
    %421 = arith.truncf %420 : vector<8x128xf32> to vector<8x128xbf16>
    %c0_134 = arith.constant 0 : index
    %c0_135 = arith.constant 0 : index
    %422 = vector.load %arg7[%c0_134, %c0_135] : memref<128x512xbf16, #tpu.memory_space<vmem>>, vector<128x512xbf16>
    %cst_136 = arith.constant dense<0.000000e+00> : vector<8x512xf32>
    %423 = tpu.matmul %421, %422, %cst_136 {dimension_numbers = #tpu.dot_dimension_numbers<[1], [0], [0], [1], [0, 0, 1, 1], [], []>} : vector<8x128xbf16>, vector<128x512xbf16>, vector<8x512xf32> -> vector<8x512xf32>
    %c8_i32_137 = arith.constant 8 : i32
    %424 = arith.muli %c6_i32, %c8_i32_137 : i32
    %425 = arith.index_cast %424 : i32 to index
    %c0_138 = arith.constant 0 : index
    %426 = vector.load %arg11[%425, %c0_138] : memref<64x512xf32, #tpu.memory_space<vmem>>, vector<8x512xf32>
    %427 = arith.truncf %388 : vector<8x128xf32> to vector<8x128xbf16>
    %c0_139 = arith.constant 0 : index
    %c0_140 = arith.constant 0 : index
    %428 = vector.load %arg5[%c0_139, %c0_140] : memref<128x512xbf16, #tpu.memory_space<vmem>>, vector<128x512xbf16>
    %cst_141 = arith.constant dense<0.000000e+00> : vector<8x512xf32>
    %429 = tpu.matmul %427, %428, %cst_141 {dimension_numbers = #tpu.dot_dimension_numbers<[1], [0], [0], [1], [0, 0, 1, 1], [], []>} : vector<8x128xbf16>, vector<128x512xbf16>, vector<8x512xf32> -> vector<8x512xf32>
    %430 = arith.addf %426, %429 : vector<8x512xf32>
    %431 = vector.extract_strided_slice %430 {offsets = [0, 0], sizes = [8, 128], strides = [1, 1]} : vector<8x512xf32> to vector<8x128xf32>
    %432 = arith.negf %431 : vector<8x128xf32>
    %433 = math.exp %432 : vector<8x128xf32>
    %cst_142 = arith.constant 1.000000e+00 : f32
    %434 = vector.broadcast %cst_142 : f32 to vector<8x128xf32>
    %435 = arith.addf %434, %433 : vector<8x128xf32>
    %436 = arith.divf %434, %435 : vector<8x128xf32>
    %437 = vector.extract_strided_slice %430 {offsets = [0, 128], sizes = [8, 128], strides = [1, 1]} : vector<8x512xf32> to vector<8x128xf32>
    %438 = arith.negf %437 : vector<8x128xf32>
    %439 = math.exp %438 : vector<8x128xf32>
    %cst_143 = arith.constant 1.000000e+00 : f32
    %440 = vector.broadcast %cst_143 : f32 to vector<8x128xf32>
    %441 = arith.addf %440, %439 : vector<8x128xf32>
    %442 = arith.divf %440, %441 : vector<8x128xf32>
    %443 = vector.extract_strided_slice %430 {offsets = [0, 256], sizes = [8, 128], strides = [1, 1]} : vector<8x512xf32> to vector<8x128xf32>
    %444 = math.tanh %443 : vector<8x128xf32>
    %445 = vector.extract_strided_slice %430 {offsets = [0, 384], sizes = [8, 128], strides = [1, 1]} : vector<8x512xf32> to vector<8x128xf32>
    %446 = arith.negf %445 : vector<8x128xf32>
    %447 = math.exp %446 : vector<8x128xf32>
    %cst_144 = arith.constant 1.000000e+00 : f32
    %448 = vector.broadcast %cst_144 : f32 to vector<8x128xf32>
    %449 = arith.addf %448, %447 : vector<8x128xf32>
    %450 = arith.divf %448, %449 : vector<8x128xf32>
    %451 = arith.mulf %442, %386 : vector<8x128xf32>
    %452 = arith.mulf %436, %444 : vector<8x128xf32>
    %453 = arith.addf %451, %452 : vector<8x128xf32>
    %454 = math.tanh %453 : vector<8x128xf32>
    %455 = arith.mulf %450, %454 : vector<8x128xf32>
    %c0_145 = arith.constant 0 : index
    %c0_146 = arith.constant 0 : index
    %456 = vector.load %arg8[%c0_145, %c0_146] : memref<1x512xf32, #tpu.memory_space<vmem>>, vector<1x512xf32>
    %457 = vector.broadcast %456 : vector<1x512xf32> to vector<8x512xf32>
    %458 = arith.addf %457, %423 : vector<8x512xf32>
    %459 = arith.truncf %455 : vector<8x128xf32> to vector<8x128xbf16>
    %c0_147 = arith.constant 0 : index
    %c0_148 = arith.constant 0 : index
    %460 = vector.load %arg6[%c0_147, %c0_148] : memref<128x512xbf16, #tpu.memory_space<vmem>>, vector<128x512xbf16>
    %cst_149 = arith.constant dense<0.000000e+00> : vector<8x512xf32>
    %461 = tpu.matmul %459, %460, %cst_149 {dimension_numbers = #tpu.dot_dimension_numbers<[1], [0], [0], [1], [0, 0, 1, 1], [], []>} : vector<8x128xbf16>, vector<128x512xbf16>, vector<8x512xf32> -> vector<8x512xf32>
    %462 = arith.addf %458, %461 : vector<8x512xf32>
    %463 = vector.extract_strided_slice %462 {offsets = [0, 0], sizes = [8, 128], strides = [1, 1]} : vector<8x512xf32> to vector<8x128xf32>
    %464 = arith.negf %463 : vector<8x128xf32>
    %465 = math.exp %464 : vector<8x128xf32>
    %cst_150 = arith.constant 1.000000e+00 : f32
    %466 = vector.broadcast %cst_150 : f32 to vector<8x128xf32>
    %467 = arith.addf %466, %465 : vector<8x128xf32>
    %468 = arith.divf %466, %467 : vector<8x128xf32>
    %469 = vector.extract_strided_slice %462 {offsets = [0, 128], sizes = [8, 128], strides = [1, 1]} : vector<8x512xf32> to vector<8x128xf32>
    %470 = arith.negf %469 : vector<8x128xf32>
    %471 = math.exp %470 : vector<8x128xf32>
    %cst_151 = arith.constant 1.000000e+00 : f32
    %472 = vector.broadcast %cst_151 : f32 to vector<8x128xf32>
    %473 = arith.addf %472, %471 : vector<8x128xf32>
    %474 = arith.divf %472, %473 : vector<8x128xf32>
    %475 = vector.extract_strided_slice %462 {offsets = [0, 256], sizes = [8, 128], strides = [1, 1]} : vector<8x512xf32> to vector<8x128xf32>
    %476 = math.tanh %475 : vector<8x128xf32>
    %477 = vector.extract_strided_slice %462 {offsets = [0, 384], sizes = [8, 128], strides = [1, 1]} : vector<8x512xf32> to vector<8x128xf32>
    %478 = arith.negf %477 : vector<8x128xf32>
    %479 = math.exp %478 : vector<8x128xf32>
    %cst_152 = arith.constant 1.000000e+00 : f32
    %480 = vector.broadcast %cst_152 : f32 to vector<8x128xf32>
    %481 = arith.addf %480, %479 : vector<8x128xf32>
    %482 = arith.divf %480, %481 : vector<8x128xf32>
    %483 = arith.mulf %474, %418 : vector<8x128xf32>
    %484 = arith.mulf %468, %476 : vector<8x128xf32>
    %485 = arith.addf %483, %484 : vector<8x128xf32>
    %486 = math.tanh %485 : vector<8x128xf32>
    %487 = arith.mulf %482, %486 : vector<8x128xf32>
    %c7_i32 = arith.constant 7 : i32
    %488 = arith.truncf %487 : vector<8x128xf32> to vector<8x128xbf16>
    %c0_153 = arith.constant 0 : index
    %c0_154 = arith.constant 0 : index
    %489 = vector.load %arg7[%c0_153, %c0_154] : memref<128x512xbf16, #tpu.memory_space<vmem>>, vector<128x512xbf16>
    %cst_155 = arith.constant dense<0.000000e+00> : vector<8x512xf32>
    %490 = tpu.matmul %488, %489, %cst_155 {dimension_numbers = #tpu.dot_dimension_numbers<[1], [0], [0], [1], [0, 0, 1, 1], [], []>} : vector<8x128xbf16>, vector<128x512xbf16>, vector<8x512xf32> -> vector<8x512xf32>
    %c8_i32_156 = arith.constant 8 : i32
    %491 = arith.muli %c7_i32, %c8_i32_156 : i32
    %492 = arith.index_cast %491 : i32 to index
    %c0_157 = arith.constant 0 : index
    %493 = vector.load %arg11[%492, %c0_157] : memref<64x512xf32, #tpu.memory_space<vmem>>, vector<8x512xf32>
    %494 = arith.truncf %455 : vector<8x128xf32> to vector<8x128xbf16>
    %c0_158 = arith.constant 0 : index
    %c0_159 = arith.constant 0 : index
    %495 = vector.load %arg5[%c0_158, %c0_159] : memref<128x512xbf16, #tpu.memory_space<vmem>>, vector<128x512xbf16>
    %cst_160 = arith.constant dense<0.000000e+00> : vector<8x512xf32>
    %496 = tpu.matmul %494, %495, %cst_160 {dimension_numbers = #tpu.dot_dimension_numbers<[1], [0], [0], [1], [0, 0, 1, 1], [], []>} : vector<8x128xbf16>, vector<128x512xbf16>, vector<8x512xf32> -> vector<8x512xf32>
    %497 = arith.addf %493, %496 : vector<8x512xf32>
    %498 = vector.extract_strided_slice %497 {offsets = [0, 0], sizes = [8, 128], strides = [1, 1]} : vector<8x512xf32> to vector<8x128xf32>
    %499 = arith.negf %498 : vector<8x128xf32>
    %500 = math.exp %499 : vector<8x128xf32>
    %cst_161 = arith.constant 1.000000e+00 : f32
    %501 = vector.broadcast %cst_161 : f32 to vector<8x128xf32>
    %502 = arith.addf %501, %500 : vector<8x128xf32>
    %503 = arith.divf %501, %502 : vector<8x128xf32>
    %504 = vector.extract_strided_slice %497 {offsets = [0, 128], sizes = [8, 128], strides = [1, 1]} : vector<8x512xf32> to vector<8x128xf32>
    %505 = arith.negf %504 : vector<8x128xf32>
    %506 = math.exp %505 : vector<8x128xf32>
    %cst_162 = arith.constant 1.000000e+00 : f32
    %507 = vector.broadcast %cst_162 : f32 to vector<8x128xf32>
    %508 = arith.addf %507, %506 : vector<8x128xf32>
    %509 = arith.divf %507, %508 : vector<8x128xf32>
    %510 = vector.extract_strided_slice %497 {offsets = [0, 256], sizes = [8, 128], strides = [1, 1]} : vector<8x512xf32> to vector<8x128xf32>
    %511 = math.tanh %510 : vector<8x128xf32>
    %512 = vector.extract_strided_slice %497 {offsets = [0, 384], sizes = [8, 128], strides = [1, 1]} : vector<8x512xf32> to vector<8x128xf32>
    %513 = arith.negf %512 : vector<8x128xf32>
    %514 = math.exp %513 : vector<8x128xf32>
    %cst_163 = arith.constant 1.000000e+00 : f32
    %515 = vector.broadcast %cst_163 : f32 to vector<8x128xf32>
    %516 = arith.addf %515, %514 : vector<8x128xf32>
    %517 = arith.divf %515, %516 : vector<8x128xf32>
    %518 = arith.mulf %509, %453 : vector<8x128xf32>
    %519 = arith.mulf %503, %511 : vector<8x128xf32>
    %520 = arith.addf %518, %519 : vector<8x128xf32>
    %521 = math.tanh %520 : vector<8x128xf32>
    %522 = arith.mulf %517, %521 : vector<8x128xf32>
    %c0_164 = arith.constant 0 : index
    %c0_165 = arith.constant 0 : index
    %523 = vector.load %arg8[%c0_164, %c0_165] : memref<1x512xf32, #tpu.memory_space<vmem>>, vector<1x512xf32>
    %524 = vector.broadcast %523 : vector<1x512xf32> to vector<8x512xf32>
    %525 = arith.addf %524, %490 : vector<8x512xf32>
    %526 = arith.truncf %522 : vector<8x128xf32> to vector<8x128xbf16>
    %c0_166 = arith.constant 0 : index
    %c0_167 = arith.constant 0 : index
    %527 = vector.load %arg6[%c0_166, %c0_167] : memref<128x512xbf16, #tpu.memory_space<vmem>>, vector<128x512xbf16>
    %cst_168 = arith.constant dense<0.000000e+00> : vector<8x512xf32>
    %528 = tpu.matmul %526, %527, %cst_168 {dimension_numbers = #tpu.dot_dimension_numbers<[1], [0], [0], [1], [0, 0, 1, 1], [], []>} : vector<8x128xbf16>, vector<128x512xbf16>, vector<8x512xf32> -> vector<8x512xf32>
    %529 = arith.addf %525, %528 : vector<8x512xf32>
    %530 = vector.extract_strided_slice %529 {offsets = [0, 0], sizes = [8, 128], strides = [1, 1]} : vector<8x512xf32> to vector<8x128xf32>
    %531 = arith.negf %530 : vector<8x128xf32>
    %532 = math.exp %531 : vector<8x128xf32>
    %cst_169 = arith.constant 1.000000e+00 : f32
    %533 = vector.broadcast %cst_169 : f32 to vector<8x128xf32>
    %534 = arith.addf %533, %532 : vector<8x128xf32>
    %535 = arith.divf %533, %534 : vector<8x128xf32>
    %536 = vector.extract_strided_slice %529 {offsets = [0, 128], sizes = [8, 128], strides = [1, 1]} : vector<8x512xf32> to vector<8x128xf32>
    %537 = arith.negf %536 : vector<8x128xf32>
    %538 = math.exp %537 : vector<8x128xf32>
    %cst_170 = arith.constant 1.000000e+00 : f32
    %539 = vector.broadcast %cst_170 : f32 to vector<8x128xf32>
    %540 = arith.addf %539, %538 : vector<8x128xf32>
    %541 = arith.divf %539, %540 : vector<8x128xf32>
    %542 = vector.extract_strided_slice %529 {offsets = [0, 256], sizes = [8, 128], strides = [1, 1]} : vector<8x512xf32> to vector<8x128xf32>
    %543 = math.tanh %542 : vector<8x128xf32>
    %544 = vector.extract_strided_slice %529 {offsets = [0, 384], sizes = [8, 128], strides = [1, 1]} : vector<8x512xf32> to vector<8x128xf32>
    %545 = arith.negf %544 : vector<8x128xf32>
    %546 = math.exp %545 : vector<8x128xf32>
    %cst_171 = arith.constant 1.000000e+00 : f32
    %547 = vector.broadcast %cst_171 : f32 to vector<8x128xf32>
    %548 = arith.addf %547, %546 : vector<8x128xf32>
    %549 = arith.divf %547, %548 : vector<8x128xf32>
    %550 = arith.mulf %541, %485 : vector<8x128xf32>
    %551 = arith.mulf %535, %543 : vector<8x128xf32>
    %552 = arith.addf %550, %551 : vector<8x128xf32>
    %553 = math.tanh %552 : vector<8x128xf32>
    %554 = arith.mulf %549, %553 : vector<8x128xf32>
    %c8_i32_172 = arith.constant 8 : i32
    %c0_173 = arith.constant 0 : index
    %c0_174 = arith.constant 0 : index
    %c0_175 = arith.constant 0 : index
    %555 = vector.load %arg9[%c0_173, %c0_174, %c0_175] : memref<2x8x128xf32, #tpu.memory_space<vmem>>, vector<1x8x128xf32>
    %556 = vector.shape_cast %555 : vector<1x8x128xf32> to vector<8x128xf32>
    %557 = vector.shape_cast %522 : vector<8x128xf32> to vector<1x8x128xf32>
    tpu.vector_store %arg9[%c0_173, %c0_174, %c0_175], %557 {strides = array<i32>} : memref<2x8x128xf32, #tpu.memory_space<vmem>>, vector<1x8x128xf32>,
    %c0_176 = arith.constant 0 : index
    %c0_177 = arith.constant 0 : index
    %c0_178 = arith.constant 0 : index
    %558 = vector.load %arg10[%c0_176, %c0_177, %c0_178] : memref<2x8x128xf32, #tpu.memory_space<vmem>>, vector<1x8x128xf32>
    %559 = vector.shape_cast %558 : vector<1x8x128xf32> to vector<8x128xf32>
    %560 = vector.shape_cast %520 : vector<8x128xf32> to vector<1x8x128xf32>
    tpu.vector_store %arg10[%c0_176, %c0_177, %c0_178], %560 {strides = array<i32>} : memref<2x8x128xf32, #tpu.memory_space<vmem>>, vector<1x8x128xf32>,
    %c1_179 = arith.constant 1 : index
    %c0_180 = arith.constant 0 : index
    %c0_181 = arith.constant 0 : index
    %561 = vector.load %arg9[%c1_179, %c0_180, %c0_181] : memref<2x8x128xf32, #tpu.memory_space<vmem>>, vector<1x8x128xf32>
    %562 = vector.shape_cast %561 : vector<1x8x128xf32> to vector<8x128xf32>
    %563 = vector.shape_cast %554 : vector<8x128xf32> to vector<1x8x128xf32>
    tpu.vector_store %arg9[%c1_179, %c0_180, %c0_181], %563 {strides = array<i32>} : memref<2x8x128xf32, #tpu.memory_space<vmem>>, vector<1x8x128xf32>,
    %c1_182 = arith.constant 1 : index
    %c0_183 = arith.constant 0 : index
    %c0_184 = arith.constant 0 : index
    %564 = vector.load %arg10[%c1_182, %c0_183, %c0_184] : memref<2x8x128xf32, #tpu.memory_space<vmem>>, vector<1x8x128xf32>
    %565 = vector.shape_cast %564 : vector<1x8x128xf32> to vector<8x128xf32>
    %566 = vector.shape_cast %552 : vector<8x128xf32> to vector<1x8x128xf32>
    tpu.vector_store %arg10[%c1_182, %c0_183, %c0_184], %566 {strides = array<i32>} : memref<2x8x128xf32, #tpu.memory_space<vmem>>, vector<1x8x128xf32>,
    return
  }
  func.func @transform_0(%arg0: i32, %arg1: i32) -> (i32, i32, i32) {
    %c0_i32 = arith.constant 0 : i32
    %c0_i32_0 = arith.constant 0 : i32
    return %arg0, %arg1, %c0_i32 : i32, i32, i32
  }
  func.func @transform_1(%arg0: i32, %arg1: i32) -> (i32, i32) {
    %c0_i32 = arith.constant 0 : i32
    %c0_i32_0 = arith.constant 0 : i32
    %c0_i32_1 = arith.constant 0 : i32
    return %c0_i32, %c0_i32_0 : i32, i32
  }
  func.func @transform_2(%arg0: i32, %arg1: i32) -> (i32, i32) {
    %c0_i32 = arith.constant 0 : i32
    %c0_i32_0 = arith.constant 0 : i32
    %c0_i32_1 = arith.constant 0 : i32
    return %c0_i32, %c0_i32_0 : i32, i32
  }
  func.func @transform_3(%arg0: i32, %arg1: i32) -> (i32, i32) {
    %c0_i32 = arith.constant 0 : i32
    %c0_i32_0 = arith.constant 0 : i32
    %c0_i32_1 = arith.constant 0 : i32
    return %c0_i32, %c0_i32_0 : i32, i32
  }
  func.func @transform_4(%arg0: i32, %arg1: i32) -> (i32, i32) {
    %c0_i32 = arith.constant 0 : i32
    %c0_i32_0 = arith.constant 0 : i32
    %c0_i32_1 = arith.constant 0 : i32
    return %c0_i32, %c0_i32_0 : i32, i32
  }
  func.func @transform_5(%arg0: i32, %arg1: i32) -> (i32, i32) {
    %c0_i32 = arith.constant 0 : i32
    %c0_i32_0 = arith.constant 0 : i32
    %c0_i32_1 = arith.constant 0 : i32
    return %c0_i32, %c0_i32_0 : i32, i32
  }
  func.func @transform_6(%arg0: i32, %arg1: i32) -> (i32, i32) {
    %c0_i32 = arith.constant 0 : i32
    %c0_i32_0 = arith.constant 0 : i32
    %c0_i32_1 = arith.constant 0 : i32
    return %c0_i32, %c0_i32_0 : i32, i32
  }
  func.func @transform_7(%arg0: i32, %arg1: i32) -> (i32, i32, i32) {
    %c0_i32 = arith.constant 0 : i32
    %c0_i32_0 = arith.constant 0 : i32
    %c0_i32_1 = arith.constant 0 : i32
    return %c0_i32, %arg0, %c0_i32_0 : i32, i32, i32
  }
  func.func @transform_8(%arg0: i32, %arg1: i32) -> (i32, i32, i32) {
    %c0_i32 = arith.constant 0 : i32
    %c0_i32_0 = arith.constant 0 : i32
    %c0_i32_1 = arith.constant 0 : i32
    return %c0_i32, %arg0, %c0_i32_0 : i32, i32, i32
  }
}

</mosaic_0001>

<bundles_post_ra>
// kernel: encoder_forward.1
= control target key start
LH: loop header
LB: loop body
LE: loop exit
PB: predicated region body
PF: predicated region fallthrough
CT: control target
= control target key end

     0   :  { %14 = vsyncpa [#allocation4], 0  ;;  %s6489_s0 = inlined_call_operand.vmem [shape: bf16[1,64,128], index: 0, kind: input, shape index: {}]   ;;  %s6490_s1 = inlined_call_operand.hbm [shape: bf16[128,512], index: 1, kind: input, shape index: {}]   ;;  %s6491_s2 = inlined_call_operand.vmem [shape: f32[1,512], index: 2, kind: input, shape index: {}]   ;;  %s6492_s3 = inlined_call_operand.hbm [shape: bf16[128,512], index: 3, kind: input, shape index: {}]   ;;  %s6493_s4 = inlined_call_operand.hbm [shape: bf16[128,512], index: 4, kind: input, shape index: {}]   ;;  %s6494_s5 = inlined_call_operand.hbm [shape: bf16[128,512], index: 5, kind: input, shape index: {}]   ;;  %s6495_s6 = inlined_call_operand.vmem [shape: f32[1,512], index: 6, kind: input, shape index: {}]   ;;  %s6496_s7 = inlined_call_operand.vmem [shape: f32[2,8,128], index: 7, kind: output, shape index: {0}]   ;;  %s6497_s8 = inlined_call_operand.vmem [shape: f32[2,8,128], index: 8, kind: output, shape index: {1}]  }
   0x1   :  { %15 = vsyncpa [#allocation6], 0 }
   0x2   :  { %16 = vsyncpa [#allocation9], 0  ;;  %s4658_s27 = smov [#allocation5]   ;;  %s4659_s29 = smov [#allocation3]  }
   0x3   :  { %s38_s28 = sshll.u32 %s4658_s27, 4  ;;  %s24_s30 = sshll.u32 %s4659_s29, 4  ;;  %s39_s28 = int_to_ptr.vmem [resolvable:$true] %s38_s28  ;;  %s4711_s30 = int_to_ptr.vmem [resolvable:$true] %s24_s30 }
   0x4   :  { %s4564_s11 = scalar_lea.hbm %s6492_s3, 4096 }
   0x5   :  { %p4565_p0 = scmp.ne.s32.totalorder %s6492_s3, %s4564_s11  ;;  %p4568_p1 = scmp.lt.u32.totalorder %s4564_s11, %s6492_s3 }
   0x7   :  { %p4570_p2 = pnand %p4568_p1, %p4565_p0 }
   0x9   :  { %4573 = shalt.err (!%p4570_p2)
}
   0xa   :  { %s4574_s16 = scalar_lea.vmem %s39_s28, 4096  ;;  %p4579_p4 = scmp.lt.s32.totalorder %s39_s28, %s39_s28 }
   0xb   :  { %p4575_p3 = scmp.ne.s32.totalorder %s39_s28, %s4574_s16  ;;  %p4580_p5 = scmp.lt.s32.totalorder %s4574_s16, %s4574_s16 }
   0xd   :  { %p4581_p6 = por %p4580_p5, %p4579_p4 }
   0xf   :  { %p4582_p7 = pnand %p4581_p6, %p4575_p3 }
  0x11   :  { %4585 = shalt.err (!%p4582_p7)
}
  0x12   :  { %s4660_s17 = smov 256   ;;  %s4661_s18 = smov 16  }
  0x13   :  { %44 = dma.hbm_to_vmem [thread:$0]  %s6492_s3, 4096, %s39_s28, [#allocation6], %s4660_s17, %s4660_s17, %s4661_s18  }
  0x14   :  { %s4586_s23 = scalar_lea.hbm %s6490_s1, 4096 }
  0x15   :  { %p4587_p8 = scmp.ne.s32.totalorder %s6490_s1, %s4586_s23  ;;  %p4590_p9 = scmp.lt.u32.totalorder %s4586_s23, %s6490_s1 }
  0x17   :  { %p4592_p10 = pnand %p4590_p9, %p4587_p8 }
  0x19   :  { %4595 = shalt.err (!%p4592_p10)
}
  0x1a   :  { %s4596_s29 = scalar_lea.vmem %s4711_s30, 4096  ;;  %p4601_p12 = scmp.lt.s32.totalorder %s4711_s30, %s4711_s30 }
  0x1b   :  { %p4597_p11 = scmp.ne.s32.totalorder %s4711_s30, %s4596_s29  ;;  %p4602_p13 = scmp.lt.s32.totalorder %s4596_s29, %s4596_s29 }
  0x1d   :  { %p4603_p0 = por %p4602_p13, %p4601_p12 }
  0x1f   :  { %p4604_p1 = pnand %p4603_p0, %p4597_p11 }
  0x21   :  { %4607 = shalt.err (!%p4604_p1)
}
  0x22   :  { %30 = dma.hbm_to_vmem [thread:$0]  %s6490_s1, 4096, %s4711_s30, [#allocation4], %s4660_s17, %s4660_s17, %s4661_s18  }
  0x23   :  { %s4662_s9 = smov [#allocation7]   ;;  %s4663_s11 = smov [#allocation8]  }
  0x24   :  { %s50_s10 = sshll.u32 %s4662_s9, 4  ;;  %s62_s12 = sshll.u32 %s4663_s11, 4  ;;  %s51_s10 = int_to_ptr.vmem [resolvable:$true] %s50_s10  ;;  %s4748_s12 = int_to_ptr.vmem [resolvable:$true] %s62_s12 }
  0x25   :  { %s4608_s15 = scalar_lea.hbm %s6493_s4, 4096 }
  0x26   :  { %p4609_p2 = scmp.ne.s32.totalorder %s6493_s4, %s4608_s15  ;;  %p4612_p3 = scmp.lt.u32.totalorder %s4608_s15, %s6493_s4 }
  0x28   :  { %p4614_p4 = pnand %p4612_p3, %p4609_p2 }
  0x2a   :  { %4617 = shalt.err (!%p4614_p4)
}
  0x2b   :  { %s4618_s1 = scalar_lea.vmem %s51_s10, 4096  ;;  %p4623_p6 = scmp.lt.s32.totalorder %s51_s10, %s51_s10 }
  0x2c   :  { %p4619_p5 = scmp.ne.s32.totalorder %s51_s10, %s4618_s1  ;;  %p4624_p7 = scmp.lt.s32.totalorder %s4618_s1, %s4618_s1 }
  0x2e   :  { %p4625_p8 = por %p4624_p7, %p4623_p6 }
  0x30   :  { %p4626_p9 = pnand %p4625_p8, %p4619_p5 }
  0x32   :  { %4629 = shalt.err (!%p4626_p9)
}
  0x33   :  { %56 = dma.hbm_to_vmem [thread:$0]  %s6493_s4, 4096, %s51_s10, [#allocation6], %s4660_s17, %s4660_s17, %s4661_s18  }
  0x34   :  { %s4630_s25 = scalar_lea.hbm %s6494_s5, 4096 }
  0x35   :  { %p4631_p10 = scmp.ne.s32.totalorder %s6494_s5, %s4630_s25  ;;  %p4634_p11 = scmp.lt.u32.totalorder %s4630_s25, %s6494_s5 }
  0x37   :  { %p4636_p12 = pnand %p4634_p11, %p4631_p10 }
  0x39   :  { %4639 = shalt.err (!%p4636_p12)
}
  0x3a   :  { %s4640_s28 = scalar_lea.vmem %s4748_s12, 4096  ;;  %p4645_p0 = scmp.lt.s32.totalorder %s4748_s12, %s4748_s12 }
  0x3b   :  { %p4641_p13 = scmp.ne.s32.totalorder %s4748_s12, %s4640_s28  ;;  %p4646_p1 = scmp.lt.s32.totalorder %s4640_s28, %s4640_s28 }
  0x3d   :  { %p4647_p2 = por %p4646_p1, %p4645_p0 }
  0x3f   :  { %p4648_p3 = pnand %p4647_p2, %p4641_p13 }
  0x41   :  { %4651 = shalt.err (!%p4648_p3)
}
  0x42   :  { %68 = dma.hbm_to_vmem [thread:$0]  %s6494_s5, 4096, %s4748_s12, [#allocation9], %s4660_s17, %s4660_s17, %s4661_s18  }
  0x43   :  { %4652 = dma.done.wait [#allocation4], 4096  }
  0x44   :  { %4653 = vsyncadd [#allocation4], 4294963200 }
  0x45   :  { %4654 = dma.done.wait [#allocation6], 8192  }
  0x46   :  { %4655 = vsyncadd [#allocation6], 4294959104 }
  0x47   :  { %4656 = dma.done.wait [#allocation9], 4096  }
  0x48   :  { %4657 = vsyncadd [#allocation9], 4294963200  ;;  %v6498_v0 = vmov 0   ;;  %v3920_v1 = vld [vmem:[#allocation3 + $0x4] ss:$16 sps:$4 sm:$0xff]   ;;  %v3981_v44 = vld [vmem:[%s6489_s0 + $0x8] sm:$0xff]  }
  0x49   :  { %370 = vmatprep.mubr.bf16.mxu0 %v6498_v0  ;;  %443 = vmatprep.mubr.bf16.mxu1 %v6498_v0  ;;  %v3922_v2 = vld [vmem:[#allocation3 + $0xc] ss:$16 sps:$4 sm:$0xff]   ;;  %v3924_v3 = vld [vmem:[#allocation3] ss:$16 sps:$4 sm:$0xff]   ;;  %v3925_v4 = vld [vmem:[#allocation3 + $0x8] ss:$16 sps:$4 sm:$0xff]  }
  0x4a   :  { %338 = vmatprep.subr.bf16.mxu0 %v3920_v1  ;;  %411 = vmatprep.subr.bf16.mxu1 %v3922_v2  ;;  %v3926_v5 = vld [vmem:[#allocation3 + $0x24] ss:$16 sps:$4 sm:$0xff]   ;;  %v3928_v6 = vld [vmem:[#allocation3 + $0x2c] ss:$16 sps:$4 sm:$0xff]   ;;  %v3930_v7 = vld [vmem:[#allocation3 + $0x20] ss:$16 sps:$4 sm:$0xff]  }
  0x4b   :  { %339 = vmatpush1.bf16.msra.mxu0 %v3924_v3  ;;  %412 = vmatpush1.bf16.msra.mxu1 %v3925_v4  ;;  %v3931_v8 = vld [vmem:[#allocation3 + $0x28] ss:$16 sps:$4 sm:$0xff]   ;;  %v3932_v9 = vld [vmem:[#allocation3 + $0x44] ss:$16 sps:$4 sm:$0xff]   ;;  %v3934_v10 = vld [vmem:[#allocation3 + $0x4c] ss:$16 sps:$4 sm:$0xff]  }
  0x4c   :  { %340 = vmatprep.subr.bf16.mxu0 %v3926_v5  ;;  %413 = vmatprep.subr.bf16.mxu1 %v3928_v6  ;;  %v3936_v11 = vld [vmem:[#allocation3 + $0x40] ss:$16 sps:$4 sm:$0xff]   ;;  %v3937_v12 = vld [vmem:[#allocation3 + $0x48] ss:$16 sps:$4 sm:$0xff]   ;;  %v3938_v13 = vld [vmem:[#allocation3 + $0x64] ss:$16 sps:$4 sm:$0xff]  }
  0x4d   :  { %v3940_v14 = vld [vmem:[#allocation3 + $0x6c] ss:$16 sps:$4 sm:$0xff]   ;;  %v3942_v15 = vld [vmem:[#allocation3 + $0x60] ss:$16 sps:$4 sm:$0xff]   ;;  %v3943_v16 = vld [vmem:[#allocation3 + $0x68] ss:$16 sps:$4 sm:$0xff]  }
  0x4e   :  { %v3944_v17 = vld [vmem:[#allocation3 + $0x84] ss:$16 sps:$4 sm:$0xff]   ;;  %v3946_v18 = vld [vmem:[#allocation3 + $0x8c] ss:$16 sps:$4 sm:$0xff]   ;;  %v3948_v19 = vld [vmem:[#allocation3 + $0x80] ss:$16 sps:$4 sm:$0xff]  }
  0x4f   :  { %341 = vmatpush1.bf16.msra.mxu0 %v3930_v7  ;;  %414 = vmatpush1.bf16.msra.mxu1 %v3931_v8  ;;  %v3949_v20 = vld [vmem:[#allocation3 + $0x88] ss:$16 sps:$4 sm:$0xff]   ;;  %v3950_v21 = vld [vmem:[#allocation3 + $0xa4] ss:$16 sps:$4 sm:$0xff]   ;;  %v3952_v22 = vld [vmem:[#allocation3 + $0xac] ss:$16 sps:$4 sm:$0xff]  }
  0x50   :  { %342 = vmatprep.subr.bf16.mxu0 %v3932_v9  ;;  %415 = vmatprep.subr.bf16.mxu1 %v3934_v10  ;;  %v3954_v23 = vld [vmem:[#allocation3 + $0xa0] ss:$16 sps:$4 sm:$0xff]   ;;  %v3955_v24 = vld [vmem:[#allocation3 + $0xa8] ss:$16 sps:$4 sm:$0xff]   ;;  %v3956_v25 = vld [vmem:[#allocation3 + $0xc4] ss:$16 sps:$4 sm:$0xff]  }
  0x51   :  { %v3958_v26 = vld [vmem:[#allocation3 + $0xcc] ss:$16 sps:$4 sm:$0xff]   ;;  %v3960_v27 = vld [vmem:[#allocation3 + $0xc0] ss:$16 sps:$4 sm:$0xff]   ;;  %v3961_v28 = vld [vmem:[#allocation3 + $0xc8] ss:$16 sps:$4 sm:$0xff]  }
  0x52   :  { %v3962_v29 = vld [vmem:[#allocation3 + $0xe4] ss:$16 sps:$4 sm:$0xff]   ;;  %v3964_v30 = vld [vmem:[#allocation3 + $0xec] ss:$16 sps:$4 sm:$0xff]   ;;  %v3966_v31 = vld [vmem:[#allocation3 + $0xe0] ss:$16 sps:$4 sm:$0xff]  }
  0x53   :  { %343 = vmatpush1.bf16.msra.mxu0 %v3936_v11  ;;  %416 = vmatpush1.bf16.msra.mxu1 %v3937_v12  ;;  %v3967_v32 = vld [vmem:[#allocation3 + $0xe8] ss:$16 sps:$4 sm:$0xff]   ;;  %v4787_v33 = vld [vmem:[#allocation8 + $0x4] ss:$16 sps:$4 sm:$0xff]   ;;  %v4789_v34 = vld [vmem:[#allocation8 + $0xc] ss:$16 sps:$4 sm:$0xff]  }
  0x54   :  { %344 = vmatprep.subr.bf16.mxu0 %v3938_v13  ;;  %417 = vmatprep.subr.bf16.mxu1 %v3940_v14  ;;  %v3968_v35 = vld [vmem:[%s6489_s0] sm:$0xff]   ;;  %v4796_v37 = vld [vmem:[#allocation8 + $0x8] ss:$16 sps:$4 sm:$0xff]   ;;  %v4802_v39 = vld [vmem:[#allocation8 + $0x2c] ss:$16 sps:$4 sm:$0xff]   ;;  %v4665_v12 = vmov 0.0|0.0  }
  0x55   :  { %v4794_v36 = vld [vmem:[#allocation8] ss:$16 sps:$4 sm:$0xff]   ;;  %v4800_v38 = vld [vmem:[#allocation8 + $0x24] ss:$16 sps:$4 sm:$0xff]   ;;  %v4808_v41 = vld [vmem:[#allocation8 + $0x28] ss:$16 sps:$4 sm:$0xff]  }
  0x56   :  { %v4804_v40 = vld [vmem:[#allocation8 + $0x20] ss:$16 sps:$4 sm:$0xff]   ;;  %v4812_v42 = vld [vmem:[#allocation8 + $0x44] ss:$16 sps:$4 sm:$0xff]   ;;  %v4814_v43 = vld [vmem:[#allocation8 + $0x4c] ss:$16 sps:$4 sm:$0xff]  }
  0x57   :  { %345 = vmatpush1.bf16.msra.mxu0 %v3942_v15  ;;  %418 = vmatpush1.bf16.msra.mxu1 %v3943_v16  ;;  %v4821_v45 = vld [vmem:[#allocation8 + $0x40] ss:$16 sps:$4 sm:$0xff]   ;;  %v4823_v46 = vld [vmem:[#allocation8 + $0x48] ss:$16 sps:$4 sm:$0xff]   ;;  %v4827_v47 = vld [vmem:[#allocation8 + $0x64] ss:$16 sps:$4 sm:$0xff]  }
  0x58   :  { %346 = vmatprep.subr.bf16.mxu0 %v3944_v17  ;;  %419 = vmatprep.subr.bf16.mxu1 %v3946_v18  ;;  %v4831_v48 = vld [vmem:[#allocation8 + $0x6c] ss:$16 sps:$4 sm:$0xff]   ;;  %v4833_v49 = vld [vmem:[#allocation8 + $0x60] ss:$16 sps:$4 sm:$0xff]   ;;  %v4835_v50 = vld [vmem:[#allocation8 + $0x68] ss:$16 sps:$4 sm:$0xff]  }
  0x59   :  { %v4839_v51 = vld [vmem:[#allocation8 + $0x84] ss:$16 sps:$4 sm:$0xff]   ;;  %v4843_v52 = vld [vmem:[#allocation8 + $0x8c] ss:$16 sps:$4 sm:$0xff]   ;;  %v4850_v54 = vld [vmem:[#allocation8 + $0x80] ss:$16 sps:$4 sm:$0xff]  }
  0x5a   :  { %v3994_v53 = vld [vmem:[%s6489_s0 + $0x10] sm:$0xff]   ;;  %v4854_v55 = vld [vmem:[#allocation8 + $0x88] ss:$16 sps:$4 sm:$0xff]   ;;  %v4860_v57 = vld [vmem:[#allocation8 + $0xac] ss:$16 sps:$4 sm:$0xff]  }
  0x5b   :  { %347 = vmatpush1.bf16.msra.mxu0 %v3948_v19  ;;  %420 = vmatpush1.bf16.msra.mxu1 %v3949_v20  ;;  %v4856_v56 = vld [vmem:[#allocation8 + $0xa4] ss:$16 sps:$4 sm:$0xff]   ;;  %v4862_v58 = vld [vmem:[#allocation8 + $0xa0] ss:$16 sps:$4 sm:$0xff]   ;;  %v4864_v59 = vld [vmem:[#allocation8 + $0xa8] ss:$16 sps:$4 sm:$0xff]  }
  0x5c   :  { %348 = vmatprep.subr.bf16.mxu0 %v3950_v21  ;;  %421 = vmatprep.subr.bf16.mxu1 %v3952_v22  ;;  %v4868_v60 = vld [vmem:[#allocation8 + $0xc4] ss:$16 sps:$4 sm:$0xff]   ;;  %v4872_v61 = vld [vmem:[#allocation8 + $0xcc] ss:$16 sps:$4 sm:$0xff]   ;;  %v4879_v63 = vld [vmem:[#allocation8 + $0xc0] ss:$16 sps:$4 sm:$0xff]  }
  0x5d   :  { %v4007_v62 = vld [vmem:[%s6489_s0 + $0x18] sm:$0xff]   ;;  %v4885_v2 = vld [vmem:[#allocation8 + $0xe4] ss:$16 sps:$4 sm:$0xff]   ;;  %v4891_v4 = vld [vmem:[#allocation8 + $0xe0] ss:$16 sps:$4 sm:$0xff]  }
  0x5e   :  { %v4883_v1 = vld [vmem:[#allocation8 + $0xc8] ss:$16 sps:$4 sm:$0xff]   ;;  %v4889_v3 = vld [vmem:[#allocation8 + $0xec] ss:$16 sps:$4 sm:$0xff]   ;;  %v4897_v6 = vld [vmem:[#allocation5 + $0x4] ss:$16 sps:$4 sm:$0xff]  }
  0x5f   :  { %349 = vmatpush1.bf16.msra.mxu0 %v3954_v23  ;;  %422 = vmatpush1.bf16.msra.mxu1 %v3955_v24  ;;  %v4893_v5 = vld [vmem:[#allocation8 + $0xe8] ss:$16 sps:$4 sm:$0xff]   ;;  %v4901_v7 = vld [vmem:[#allocation5 + $0xc] ss:$16 sps:$4 sm:$0xff]   ;;  %v4905_v8 = vld [vmem:[#allocation5] ss:$16 sps:$4 sm:$0xff]  }
  0x60   :  { %350 = vmatprep.subr.bf16.mxu0 %v3956_v25  ;;  %423 = vmatprep.subr.bf16.mxu1 %v3958_v26  ;;  %v4909_v9 = vld [vmem:[#allocation5 + $0x8] ss:$16 sps:$4 sm:$0xff]   ;;  %v4911_v10 = vld [vmem:[#allocation5 + $0x24] ss:$16 sps:$4 sm:$0xff]   ;;  %v4915_v11 = vld [vmem:[#allocation5 + $0x2c] ss:$16 sps:$4 sm:$0xff]  }
  0x61   :  { %v4917_v13 = vld [vmem:[#allocation5 + $0x20] ss:$16 sps:$4 sm:$0xff]   ;;  %v4919_v14 = vld [vmem:[#allocation5 + $0x28] ss:$16 sps:$4 sm:$0xff]   ;;  %v4921_v15 = vld [vmem:[#allocation5 + $0x44] ss:$16 sps:$4 sm:$0xff]  }
  0x62   :  { %6873 = vst [vmem:[#allocation13_spill] sm:$0xff] %v4917_v13  ;;  %6874 = vst [vmem:[#allocation14_spill] sm:$0xff] %v4919_v14  ;;  %v4925_v16 = vld [vmem:[#allocation5 + $0x4c] ss:$16 sps:$4 sm:$0xff]   ;;  %v4929_v17 = vld [vmem:[#allocation5 + $0x40] ss:$16 sps:$4 sm:$0xff]  }
  0x63   :  { %351 = vmatpush1.bf16.msra.mxu0 %v3960_v27  ;;  %424 = vmatpush1.bf16.msra.mxu1 %v3961_v28  ;;  %6875 = vst [vmem:[#allocation15_spill] sm:$0xff] %v4921_v15  ;;  %6876 = vst [vmem:[#allocation16_spill] sm:$0xff] %v4925_v16  ;;  %v4931_v18 = vld [vmem:[#allocation5 + $0x48] ss:$16 sps:$4 sm:$0xff]   ;;  %v4935_v19 = vld [vmem:[#allocation5 + $0x64] ss:$16 sps:$4 sm:$0xff]  }
  0x64   :  { %352 = vmatprep.subr.bf16.mxu0 %v3962_v29  ;;  %425 = vmatprep.subr.bf16.mxu1 %v3964_v30  ;;  %6877 = vst [vmem:[#allocation17_spill] sm:$0xff] %v4929_v17  ;;  %6878 = vst [vmem:[#allocation18_spill] sm:$0xff] %v4931_v18  ;;  %v4937_v20 = vld [vmem:[#allocation5 + $0x6c] ss:$16 sps:$4 sm:$0xff]   ;;  %v4943_v21 = vld [vmem:[#allocation5 + $0x60] ss:$16 sps:$4 sm:$0xff]  }
  0x65   :  { %6879 = vst [vmem:[#allocation19_spill] sm:$0xff] %v4935_v19  ;;  %6880 = vst [vmem:[#allocation20_spill] sm:$0xff] %v4937_v20  ;;  %v4945_v22 = vld [vmem:[#allocation5 + $0x68] ss:$16 sps:$4 sm:$0xff]   ;;  %v4947_v23 = vld [vmem:[#allocation5 + $0x84] ss:$16 sps:$4 sm:$0xff]  }
  0x66   :  { %6881 = vst [vmem:[#allocation21_spill] sm:$0xff] %v4943_v21  ;;  %6882 = vst [vmem:[#allocation22_spill] sm:$0xff] %v4945_v22  ;;  %v4949_v24 = vld [vmem:[#allocation5 + $0x8c] ss:$16 sps:$4 sm:$0xff]   ;;  %v4957_v25 = vld [vmem:[#allocation5 + $0x80] ss:$16 sps:$4 sm:$0xff]  }
  0x67   :  { %353 = vmatpush1.bf16.msra.mxu0 %v3966_v31  ;;  %426 = vmatpush1.bf16.msra.mxu1 %v3967_v32  ;;  %6883 = vst [vmem:[#allocation23_spill] sm:$0xff] %v4947_v23  ;;  %6884 = vst [vmem:[#allocation24_spill] sm:$0xff] %v4949_v24  ;;  %v4959_v26 = vld [vmem:[#allocation5 + $0x88] ss:$16 sps:$4 sm:$0xff]   ;;  %v4963_v27 = vld [vmem:[#allocation5 + $0xa4] ss:$16 sps:$4 sm:$0xff]  }
  0x68   :  { %715 = vmatprep.subr.bf16.mxu0 %v4787_v33  ;;  %756 = vmatprep.subr.bf16.mxu1 %v4789_v34  ;;  %6885 = vst [vmem:[#allocation25_spill] sm:$0xff] %v4957_v25  ;;  %6886 = vst [vmem:[#allocation26_spill] sm:$0xff] %v4959_v26  ;;  %v4965_v28 = vld [vmem:[#allocation5 + $0xac] ss:$16 sps:$4 sm:$0xff]   ;;  %v4969_v29 = vld [vmem:[#allocation5 + $0xa0] ss:$16 sps:$4 sm:$0xff]  }
  0x69   :  { %6887 = vst [vmem:[#allocation27_spill] sm:$0xff] %v4963_v27  ;;  %6888 = vst [vmem:[#allocation28_spill] sm:$0xff] %v4965_v28  ;;  %v4971_v30 = vld [vmem:[#allocation5 + $0xa8] ss:$16 sps:$4 sm:$0xff]   ;;  %v4975_v31 = vld [vmem:[#allocation5 + $0xc4] ss:$16 sps:$4 sm:$0xff]  }
  0x6a   :  { %371 = vmatmul.mubr.bf16.vlgmr.msra.gmra.mrb[0].mxu0 %v3968_v35  ;;  %444 = vmatmul.mubr.bf16.vlgmr.msra.gmra.mrb[0].mxu1 %v3968_v35  ;;  %6889 = vst [vmem:[#allocation29_spill] sm:$0xff] %v4969_v29  ;;  %6890 = vst [vmem:[#allocation30_spill] sm:$0xff] %v4971_v30  ;;  %v4977_v32 = vld [vmem:[#allocation5 + $0xcc] ss:$16 sps:$4 sm:$0xff]   ;;  %v4981_v35 = vld [vmem:[#allocation5 + $0xc0] ss:$16 sps:$4 sm:$0xff]  }
  0x6b   :  { %716 = vmatpush1.bf16.msra.mxu0 %v4794_v36  ;;  %757 = vmatpush1.bf16.msra.mxu1 %v4796_v37  ;;  %6891 = vst [vmem:[#allocation31_spill] sm:$0xff] %v4975_v31  ;;  %6892 = vst [vmem:[#allocation32_spill] sm:$0xff] %v4977_v32 }
  0x6c   :  { %717 = vmatprep.subr.bf16.mxu0 %v4800_v38  ;;  %758 = vmatprep.subr.bf16.mxu1 %v4802_v39  ;;  %6893 = vst [vmem:[#allocation33_spill] sm:$0xff] %v4981_v35 }
  0x6d   :  { %380 = vmatprep.mubr.bf16.mxu0 %v6498_v0  ;;  %453 = vmatprep.mubr.bf16.mxu1 %v6498_v0 }
  0x6f   :  { %718 = vmatpush1.bf16.msra.mxu0 %v4804_v40  ;;  %759 = vmatpush1.bf16.msra.mxu1 %v4808_v41 }
  0x70   :  { %719 = vmatprep.subr.bf16.mxu0 %v4812_v42  ;;  %760 = vmatprep.subr.bf16.mxu1 %v4814_v43 }
  0x72   :  { %381 = vmatmul.mubr.bf16.gmra.mrb[4].mxu0 %v3981_v44  ;;  %454 = vmatmul.mubr.bf16.gmra.mrb[4].mxu1 %v3981_v44  ;;  %v4983_v44 = vld [vmem:[#allocation5 + $0xc8] ss:$16 sps:$4 sm:$0xff]  }
  0x73   :  { %720 = vmatpush1.bf16.msra.mxu0 %v4821_v45  ;;  %761 = vmatpush1.bf16.msra.mxu1 %v4823_v46  ;;  %6894 = vst [vmem:[#allocation34_spill] sm:$0xff] %v4983_v44 }
  0x74   :  { %721 = vmatprep.subr.bf16.mxu0 %v4827_v47  ;;  %762 = vmatprep.subr.bf16.mxu1 %v4831_v48 }
  0x75   :  { %390 = vmatprep.mubr.bf16.mxu0 %v6498_v0  ;;  %463 = vmatprep.mubr.bf16.mxu1 %v6498_v0 }
  0x77   :  { %722 = vmatpush1.bf16.msra.mxu0 %v4833_v49  ;;  %763 = vmatpush1.bf16.msra.mxu1 %v4835_v50 }
  0x78   :  { %723 = vmatprep.subr.bf16.mxu0 %v4839_v51  ;;  %764 = vmatprep.subr.bf16.mxu1 %v4843_v52 }
  0x7a   :  { %391 = vmatmul.mubr.bf16.gmra.mrb[8].mxu0 %v3994_v53  ;;  %464 = vmatmul.mubr.bf16.gmra.mrb[8].mxu1 %v3994_v53  ;;  %v4987_v53 = vld [vmem:[#allocation5 + $0xe4] ss:$16 sps:$4 sm:$0xff]  }
  0x7b   :  { %724 = vmatpush1.bf16.msra.mxu0 %v4850_v54  ;;  %765 = vmatpush1.bf16.msra.mxu1 %v4854_v55  ;;  %6895 = vst [vmem:[#allocation35_spill] sm:$0xff] %v4987_v53 }
  0x7c   :  { %725 = vmatprep.subr.bf16.mxu0 %v4856_v56  ;;  %766 = vmatprep.subr.bf16.mxu1 %v4860_v57 }
  0x7d   :  { %400 = vmatprep.mubr.bf16.mxu0 %v6498_v0  ;;  %473 = vmatprep.mubr.bf16.mxu1 %v6498_v0 }
  0x7f   :  { %726 = vmatpush1.bf16.msra.mxu0 %v4862_v58  ;;  %767 = vmatpush1.bf16.msra.mxu1 %v4864_v59 }
  0x80   :  { %727 = vmatprep.subr.bf16.mxu0 %v4868_v60  ;;  %768 = vmatprep.subr.bf16.mxu1 %v4872_v61 }
  0x82   :  { %401 = vmatmul.mubr.bf16.gmra.mrb[12].mxu0 %v4007_v62  ;;  %474 = vmatmul.mubr.bf16.gmra.mrb[12].mxu1 %v4007_v62  ;;  %v4989_v62 = vld [vmem:[#allocation5 + $0xec] ss:$16 sps:$4 sm:$0xff]  }
  0x83   :  { %728 = vmatpush1.bf16.msra.mxu0 %v4879_v63  ;;  %769 = vmatpush1.bf16.msra.mxu1 %v4883_v1  ;;  %6896 = vst [vmem:[#allocation36_spill] sm:$0xff] %v4989_v62 }
  0x84   :  { %729 = vmatprep.subr.bf16.mxu0 %v4885_v2  ;;  %770 = vmatprep.subr.bf16.mxu1 %v4889_v3 }
  0x85   :  { %747 = vmatprep.mubr.bf16.mxu0 %v6498_v0  ;;  %788 = vmatprep.mubr.bf16.mxu1 %v6498_v0 }
  0x87   :  { %730 = vmatpush1.bf16.msra.mxu0 %v4891_v4  ;;  %771 = vmatpush1.bf16.msra.mxu1 %v4893_v5 }
  0x88   :  { %994 = vmatprep.subr.bf16.mxu0 %v4897_v6  ;;  %1035 = vmatprep.subr.bf16.mxu1 %v4901_v7 }
  0x8a   :  { %748 = vmatmul.mubr.bf16.vlgmr.msra.gmra.mrb[16].mxu0 %v4665_v12  ;;  %789 = vmatmul.mubr.bf16.vlgmr.msra.gmra.mrb[16].mxu1 %v4665_v12 }
  0x8b   :  { %995 = vmatpush1.bf16.msra.mxu0 %v4905_v8  ;;  %1036 = vmatpush1.bf16.msra.mxu1 %v4909_v9 }
  0x8c   :  { %996 = vmatprep.subr.bf16.mxu0 %v4911_v10  ;;  %1037 = vmatprep.subr.bf16.mxu1 %v4915_v11 }
  0x8d   :  { %1026 = vmatprep.mubr.bf16.mxu0 %v6498_v0  ;;  %1067 = vmatprep.mubr.bf16.mxu1 %v6498_v0  ;;  %v4993_v0 = vld [vmem:[#allocation5 + $0xe0] ss:$16 sps:$4 sm:$0xff]  }
  0x8e   :  { %6897 = vst [vmem:[#allocation37_spill] sm:$0xff] %v4993_v0 }
  0x8f   :  { %997 = vmatpush1.bf16.msra.mxu0 %v4917_v13  ;;  %1038 = vmatpush1.bf16.msra.mxu1 %v4919_v14 }
  0x90   :  { %998 = vmatprep.subr.bf16.mxu0 %v4921_v15  ;;  %1039 = vmatprep.subr.bf16.mxu1 %v4925_v16 }
  0x93   :  { %999 = vmatpush1.bf16.msra.mxu0 %v4929_v17  ;;  %1040 = vmatpush1.bf16.msra.mxu1 %v4931_v18 }
  0x94   :  { %1000 = vmatprep.subr.bf16.mxu0 %v4935_v19  ;;  %1041 = vmatprep.subr.bf16.mxu1 %v4937_v20 }
  0x97   :  { %1001 = vmatpush1.bf16.msra.mxu0 %v4943_v21  ;;  %1042 = vmatpush1.bf16.msra.mxu1 %v4945_v22 }
  0x98   :  { %1002 = vmatprep.subr.bf16.mxu0 %v4947_v23  ;;  %1043 = vmatprep.subr.bf16.mxu1 %v4949_v24 }
  0x9b   :  { %1003 = vmatpush1.bf16.msra.mxu0 %v4957_v25  ;;  %1044 = vmatpush1.bf16.msra.mxu1 %v4959_v26 }
  0x9c   :  { %1004 = vmatprep.subr.bf16.mxu0 %v4963_v27  ;;  %1045 = vmatprep.subr.bf16.mxu1 %v4965_v28  ;;  %v5061_v28 = vld [vmem:[#allocation7 + $0xac] ss:$16 sps:$4 sm:$0xff]  }
  0x9d   :  { %6921 = vst [vmem:[#allocation60_spill] sm:$0xff] %v5061_v28 }
  0x9f   :  { %1005 = vmatpush1.bf16.msra.mxu0 %v4969_v29  ;;  %1046 = vmatpush1.bf16.msra.mxu1 %v4971_v30  ;;  %v4995_v29 = vld [vmem:[#allocation5 + $0xe8] ss:$16 sps:$4 sm:$0xff]  }
  0xa0   :  { %1006 = vmatprep.subr.bf16.mxu0 %v4975_v31  ;;  %1047 = vmatprep.subr.bf16.mxu1 %v4977_v32  ;;  %6898 = vst [vmem:[#allocation38_spill] sm:$0xff] %v4995_v29  ;;  %v6899_v32 = vmov 0   ;;  %v5007_v31 = vld [vmem:[#allocation7] ss:$16 sps:$4 sm:$0xff]   ;;  %v5009_v30 = vld [vmem:[#allocation7 + $0x8] ss:$16 sps:$4 sm:$0xff]  }
  0xa1   :  { %6902 = vst [vmem:[#allocation41_spill] sm:$0xff] %v5007_v31  ;;  %6903 = vst [vmem:[#allocation42_spill] sm:$0xff] %v5009_v30 }
  0xa3   :  { %1007 = vmatpush1.bf16.msra.mxu0 %v4981_v35  ;;  %1048 = vmatpush1.bf16.msra.mxu1 %v4983_v44  ;;  %v5003_v35 = vld [vmem:[#allocation7 + $0x4] ss:$16 sps:$4 sm:$0xff]   ;;  %v5005_v44 = vld [vmem:[#allocation7 + $0xc] ss:$16 sps:$4 sm:$0xff]  }
  0xa4   :  { %1008 = vmatprep.subr.bf16.mxu0 %v4987_v53  ;;  %1049 = vmatprep.subr.bf16.mxu1 %v4989_v62  ;;  %6900 = vst [vmem:[#allocation39_spill] sm:$0xff] %v5003_v35  ;;  %6901 = vst [vmem:[#allocation40_spill] sm:$0xff] %v5005_v44  ;;  %v5021_v62 = vld [vmem:[#allocation7 + $0x28] ss:$16 sps:$4 sm:$0xff]   ;;  %v5059_v53 = vld [vmem:[#allocation7 + $0xa4] ss:$16 sps:$4 sm:$0xff]  }
  0xa5   :  { %6907 = vst [vmem:[#allocation46_spill] sm:$0xff] %v5021_v62  ;;  %6920 = vst [vmem:[#allocation59_spill] sm:$0xff] %v5059_v53 }
  0xa7   :  { %1009 = vmatpush1.bf16.msra.mxu0 %v4993_v0  ;;  %1050 = vmatpush1.bf16.msra.mxu1 %v4995_v29  ;;  %v5017_v29 = vld [vmem:[#allocation7 + $0x2c] ss:$16 sps:$4 sm:$0xff]   ;;  %v5019_v0 = vld [vmem:[#allocation7 + $0x20] ss:$16 sps:$4 sm:$0xff]  }
  0xa8   :  { %1323 = vmatprep.subr.bf16.mxu0 %v5003_v35  ;;  %1364 = vmatprep.subr.bf16.mxu1 %v5005_v44  ;;  %6905 = vst [vmem:[#allocation44_spill] sm:$0xff] %v5017_v29  ;;  %6906 = vst [vmem:[#allocation45_spill] sm:$0xff] %v5019_v0  ;;  %v5027_v44 = vld [vmem:[#allocation7 + $0x44] ss:$16 sps:$4 sm:$0xff]   ;;  %v5033_v35 = vld [vmem:[#allocation7 + $0x48] ss:$16 sps:$4 sm:$0xff]  }
  0xa9   :  { %6908 = vst [vmem:[#allocation47_spill] sm:$0xff] %v5027_v44  ;;  %6911 = vst [vmem:[#allocation50_spill] sm:$0xff] %v5033_v35 }
  0xaa   :  { %1027 = vmatmul.mubr.bf16.vlgmr.msra.gmra.mrb[20].mxu0 %v4665_v12  ;;  %1068 = vmatmul.mubr.bf16.vlgmr.msra.gmra.mrb[20].mxu1 %v4665_v12  ;;  %v5015_v12 = vld [vmem:[#allocation7 + $0x24] ss:$16 sps:$4 sm:$0xff]  }
  0xab   :  { %1355 = vmatprep.mubr.bf16.mxu0 %v6899_v32  ;;  %1396 = vmatprep.mubr.bf16.mxu1 %v6899_v32  ;;  %6904 = vst [vmem:[#allocation43_spill] sm:$0xff] %v5015_v12 }
  0xac   :  { %1324 = vmatpush1.bf16.msra.mxu0 %v5007_v31  ;;  %1365 = vmatpush1.bf16.msra.mxu1 %v5009_v30  ;;  %v5029_v31 = vld [vmem:[#allocation7 + $0x4c] ss:$16 sps:$4 sm:$0xff]   ;;  %v5031_v30 = vld [vmem:[#allocation7 + $0x40] ss:$16 sps:$4 sm:$0xff]  }
  0xad   :  { %1325 = vmatprep.subr.bf16.mxu0 %v5015_v12  ;;  %1366 = vmatprep.subr.bf16.mxu1 %v5017_v29  ;;  %6909 = vst [vmem:[#allocation48_spill] sm:$0xff] %v5029_v31  ;;  %6910 = vst [vmem:[#allocation49_spill] sm:$0xff] %v5031_v30  ;;  %v5039_v29 = vld [vmem:[#allocation7 + $0x64] ss:$16 sps:$4 sm:$0xff]   ;;  %v5045_v12 = vld [vmem:[#allocation7 + $0x68] ss:$16 sps:$4 sm:$0xff]  }
  0xae   :  { %6912 = vst [vmem:[#allocation51_spill] sm:$0xff] %v5039_v29  ;;  %6915 = vst [vmem:[#allocation54_spill] sm:$0xff] %v5045_v12 }
  0xb0   :  { %1326 = vmatpush1.bf16.msra.mxu0 %v5019_v0  ;;  %1367 = vmatpush1.bf16.msra.mxu1 %v5021_v62  ;;  %v5041_v0 = vld [vmem:[#allocation7 + $0x6c] ss:$16 sps:$4 sm:$0xff]   ;;  %v5043_v62 = vld [vmem:[#allocation7 + $0x60] ss:$16 sps:$4 sm:$0xff]  }
  0xb1   :  { %1327 = vmatprep.subr.bf16.mxu0 %v5027_v44  ;;  %1368 = vmatprep.subr.bf16.mxu1 %v5029_v31  ;;  %6913 = vst [vmem:[#allocation52_spill] sm:$0xff] %v5041_v0  ;;  %6914 = vst [vmem:[#allocation53_spill] sm:$0xff] %v5043_v62  ;;  %v5051_v31 = vld [vmem:[#allocation7 + $0x84] ss:$16 sps:$4 sm:$0xff]   ;;  %v5057_v44 = vld [vmem:[#allocation7 + $0x88] ss:$16 sps:$4 sm:$0xff]  }
  0xb2   :  { %6916 = vst [vmem:[#allocation55_spill] sm:$0xff] %v5051_v31  ;;  %6919 = vst [vmem:[#allocation58_spill] sm:$0xff] %v5057_v44 }
  0xb4   :  { %1328 = vmatpush1.bf16.msra.mxu0 %v5031_v30  ;;  %1369 = vmatpush1.bf16.msra.mxu1 %v5033_v35  ;;  %v5053_v30 = vld [vmem:[#allocation7 + $0x8c] ss:$16 sps:$4 sm:$0xff]   ;;  %v5055_v35 = vld [vmem:[#allocation7 + $0x80] ss:$16 sps:$4 sm:$0xff]  }
  0xb5   :  { %1329 = vmatprep.subr.bf16.mxu0 %v5039_v29  ;;  %1370 = vmatprep.subr.bf16.mxu1 %v5041_v0  ;;  %6917 = vst [vmem:[#allocation56_spill] sm:$0xff] %v5053_v30  ;;  %6918 = vst [vmem:[#allocation57_spill] sm:$0xff] %v5055_v35  ;;  %v5073_v0 = vld [vmem:[#allocation7 + $0xc4] ss:$16 sps:$4 sm:$0xff]   ;;  %v5075_v29 = vld [vmem:[#allocation7 + $0xcc] ss:$16 sps:$4 sm:$0xff]  }
  0xb6   :  { %6924 = vst [vmem:[#allocation63_spill] sm:$0xff] %v5073_v0  ;;  %6925 = vst [vmem:[#allocation64_spill] sm:$0xff] %v5075_v29 }
  0xb8   :  { %1330 = vmatpush1.bf16.msra.mxu0 %v5043_v62  ;;  %1371 = vmatpush1.bf16.msra.mxu1 %v5045_v12  ;;  %v5067_v12 = vld [vmem:[#allocation7 + $0xa0] ss:$16 sps:$4 sm:$0xff]   ;;  %v5069_v62 = vld [vmem:[#allocation7 + $0xa8] ss:$16 sps:$4 sm:$0xff]  }
  0xb9   :  { %1331 = vmatprep.subr.bf16.mxu0 %v5051_v31  ;;  %1372 = vmatprep.subr.bf16.mxu1 %v5053_v30  ;;  %6922 = vst [vmem:[#allocation61_spill] sm:$0xff] %v5067_v12  ;;  %6923 = vst [vmem:[#allocation62_spill] sm:$0xff] %v5069_v62  ;;  %v5079_v30 = vld [vmem:[#allocation7 + $0xc0] ss:$16 sps:$4 sm:$0xff]  }
  0xba   :  { %6926 = vst [vmem:[#allocation65_spill] sm:$0xff] %v5079_v30 }
  0xbc   :  { %1332 = vmatpush1.bf16.msra.mxu0 %v5055_v35  ;;  %1373 = vmatpush1.bf16.msra.mxu1 %v5057_v44  ;;  %v5081_v35 = vld [vmem:[#allocation7 + $0xc8] ss:$16 sps:$4 sm:$0xff]   ;;  %v5085_v44 = vld [vmem:[#allocation7 + $0xe4] ss:$16 sps:$4 sm:$0xff]  }
  0xbd   :  { %1333 = vmatprep.subr.bf16.mxu0 %v5059_v53  ;;  %1374 = vmatprep.subr.bf16.mxu1 %v5061_v28  ;;  %6927 = vst [vmem:[#allocation66_spill] sm:$0xff] %v5081_v35  ;;  %6928 = vst [vmem:[#allocation67_spill] sm:$0xff] %v5085_v44  ;;  %v5087_v53 = vld [vmem:[#allocation7 + $0xec] ss:$16 sps:$4 sm:$0xff]   ;;  %v5091_v28 = vld [vmem:[#allocation7 + $0xe0] ss:$16 sps:$4 sm:$0xff]  }
  0xbe   :  { %6929 = vst [vmem:[#allocation68_spill] sm:$0xff] %v5087_v53  ;;  %6930 = vst [vmem:[#allocation69_spill] sm:$0xff] %v5091_v28 }
  0xc0   :  { %1334 = vmatpush1.bf16.msra.mxu0 %v5067_v12  ;;  %1375 = vmatpush1.bf16.msra.mxu1 %v5069_v62  ;;  %v5093_v12 = vld [vmem:[#allocation7 + $0xe8] ss:$16 sps:$4 sm:$0xff]  }
  0xc1   :  { %1335 = vmatprep.subr.bf16.mxu0 %v5073_v0  ;;  %1376 = vmatprep.subr.bf16.mxu1 %v5075_v29  ;;  %6931 = vst [vmem:[#allocation70_spill] sm:$0xff] %v5093_v12  ;;  %v134_v29 = vlaneseq }
  0xc4   :  { %1336 = vmatpush1.bf16.msra.mxu0 %v5079_v30  ;;  %1377 = vmatpush1.bf16.msra.mxu1 %v5081_v35  ;;  %v5101_v30 = vshrl.u32 %v134_v29, 7 }
  0xc5   :  { %1337 = vmatprep.subr.bf16.mxu0 %v5085_v44  ;;  %1378 = vmatprep.subr.bf16.mxu1 %v5087_v53  ;;  %v132_v44 = vld [vmem:[%s6491_s2] sm:$0xf] }
  0xc6   :  { %v6593_v35 = vsub.s32 0, %v5101_v30  ;;  %v6595_v0 = vsub.s32 2, %v5101_v30  ;;  %v6598_v53 = vsub.s32 3, %v5101_v30 }
  0xc8   :  { %1338 = vmatpush1.bf16.msra.mxu0 %v5091_v28  ;;  %1379 = vmatpush1.bf16.msra.mxu1 %v5093_v12  ;;  %v6602_v28 = vsub.s32 1, %v5101_v30  ;;  %v5120_v62 = vrot.slane %v132_v44, %v6598_v53 }
  0xc9   :  { %1434 = vmatprep.subr.bf16.mxu0 %v4787_v33  ;;  %1475 = vmatprep.subr.bf16.mxu1 %v4789_v34  ;;  %v5112_v33 = vrot.slane %v132_v44, %v6593_v35  ;;  %v5116_v34 = vrot.slane %v132_v44, %v6595_v0 }
  0xca   :  { %v141_v26 = vrot.slane %v132_v44, %v6602_v28 }
 0x13d   :  { %v372_v29 = vpop.f32.mrb[0].mxu0  ;;  %v445_v12 = vpop.f32.mrb[0].mxu1 }
 0x13e   :  { %v374_v31 = vpop.f32.mrb[1].mxu0  ;;  %v447_v27 = vpop.f32.mrb[1].mxu1 }
 0x13f   :  { %v376_v25 = vpop.f32.mrb[2].mxu0  ;;  %v449_v24 = vpop.f32.mrb[2].mxu1 }
 0x140   :  { %v5125_v35 = vadd.f32 %v376_v25, %v5112_v33  ;;  %v378_v23 = vpop.f32.mrb[3].mxu0  ;;  %v5128_v0 = vadd.f32 %v449_v24, %v5116_v34  ;;  %v451_v22 = vpop.f32.mrb[3].mxu1 }
 0x141   :  { %v5130_v21 = vadd.f32 %v378_v23, %v141_v26  ;;  %v5133_v53 = vadd.f32 %v451_v22, %v5120_v62 }
 0x142   :  { %6932 = vst [vmem:[#allocation71_spill] sm:$0xff] %v5125_v35  ;;  %6933 = vst [vmem:[#allocation72_spill] sm:$0xff] %v5128_v0 }
 0x143   :  { %6934 = vst [vmem:[#allocation73_spill] sm:$0xff] %v5130_v21  ;;  %6935 = vst [vmem:[#allocation74_spill] sm:$0xff] %v5133_v53 }
 0x145   :  { %v382_v20 = vpop.f32.mrb[4].mxu0  ;;  %v455_v19 = vpop.f32.mrb[4].mxu1 }
 0x146   :  { %v5136_v18 = vadd.f32 %v382_v20, %v5112_v33  ;;  %v384_v44 = vpop.f32.mrb[5].mxu0  ;;  %v5139_v28 = vadd.f32 %v455_v19, %v5116_v34  ;;  %v457_v25 = vpop.f32.mrb[5].mxu1 }
 0x147   :  { %v5141_v35 = vadd.f32 %v384_v44, %v141_v26  ;;  %v386_v24 = vpop.f32.mrb[6].mxu0  ;;  %v5144_v0 = vadd.f32 %v457_v25, %v5120_v62  ;;  %v459_v23 = vpop.f32.mrb[6].mxu1 }
 0x148   :  { %6936 = vst [vmem:[#allocation75_spill] sm:$0xff] %v5136_v18  ;;  %6937 = vst [vmem:[#allocation76_spill] sm:$0xff] %v5139_v28  ;;  %v5147_v22 = vadd.f32 %v386_v24, %v5112_v33  ;;  %v388_v53 = vpop.f32.mrb[7].mxu0  ;;  %v5150_v21 = vadd.f32 %v459_v23, %v5116_v34  ;;  %v461_v20 = vpop.f32.mrb[7].mxu1 }
 0x149   :  { %6938 = vst [vmem:[#allocation77_spill] sm:$0xff] %v5141_v35  ;;  %6939 = vst [vmem:[#allocation78_spill] sm:$0xff] %v5144_v0  ;;  %v5152_v18 = vadd.f32 %v388_v53, %v141_v26  ;;  %v5155_v19 = vadd.f32 %v461_v20, %v5120_v62 }
 0x14a   :  { %6940 = vst [vmem:[#allocation79_spill] sm:$0xff] %v5147_v22  ;;  %6941 = vst [vmem:[#allocation80_spill] sm:$0xff] %v5150_v21 }
 0x14b   :  { %6942 = vst [vmem:[#allocation81_spill] sm:$0xff] %v5152_v18  ;;  %6943 = vst [vmem:[#allocation82_spill] sm:$0xff] %v5155_v19 }
 0x14d   :  { %v392_v44 = vpop.f32.mrb[8].mxu0  ;;  %v465_v35 = vpop.f32.mrb[8].mxu1 }
 0x14e   :  { %v5158_v28 = vadd.f32 %v392_v44, %v5112_v33  ;;  %v394_v25 = vpop.f32.mrb[9].mxu0  ;;  %v5161_v0 = vadd.f32 %v465_v35, %v5116_v34  ;;  %v467_v24 = vpop.f32.mrb[9].mxu1 }
 0x14f   :  { %v5163_v22 = vadd.f32 %v394_v25, %v141_v26  ;;  %v396_v23 = vpop.f32.mrb[10].mxu0  ;;  %v5166_v21 = vadd.f32 %v467_v24, %v5120_v62  ;;  %v469_v53 = vpop.f32.mrb[10].mxu1 }
 0x150   :  { %6944 = vst [vmem:[#allocation83_spill] sm:$0xff] %v5158_v28  ;;  %6945 = vst [vmem:[#allocation84_spill] sm:$0xff] %v5161_v0  ;;  %v5169_v20 = vadd.f32 %v396_v23, %v5112_v33  ;;  %v398_v19 = vpop.f32.mrb[11].mxu0  ;;  %v5172_v18 = vadd.f32 %v469_v53, %v5116_v34  ;;  %v471_v44 = vpop.f32.mrb[11].mxu1 }
 0x151   :  { %6946 = vst [vmem:[#allocation85_spill] sm:$0xff] %v5163_v22  ;;  %6947 = vst [vmem:[#allocation86_spill] sm:$0xff] %v5166_v21  ;;  %v5174_v28 = vadd.f32 %v398_v19, %v141_v26  ;;  %v5177_v35 = vadd.f32 %v471_v44, %v5120_v62 }
 0x152   :  { %6948 = vst [vmem:[#allocation87_spill] sm:$0xff] %v5169_v20  ;;  %6949 = vst [vmem:[#allocation88_spill] sm:$0xff] %v5172_v18 }
 0x153   :  { %6950 = vst [vmem:[#allocation89_spill] sm:$0xff] %v5174_v28  ;;  %6951 = vst [vmem:[#allocation90_spill] sm:$0xff] %v5177_v35 }
 0x155   :  { %v402_v25 = vpop.f32.mrb[12].mxu0  ;;  %v475_v22 = vpop.f32.mrb[12].mxu1 }
 0x156   :  { %v5180_v0 = vadd.f32 %v402_v25, %v5112_v33  ;;  %v404_v24 = vpop.f32.mrb[13].mxu0  ;;  %v5183_v21 = vadd.f32 %v475_v22, %v5116_v34  ;;  %v477_v23 = vpop.f32.mrb[13].mxu1 }
 0x157   :  { %v5185_v20 = vadd.f32 %v404_v24, %v141_v26  ;;  %v406_v53 = vpop.f32.mrb[14].mxu0  ;;  %v5188_v18 = vadd.f32 %v477_v23, %v5120_v62  ;;  %v479_v19 = vpop.f32.mrb[14].mxu1  ;;  %v373_v24 = vadd.f32 %v372_v29, %v5112_v33  ;;  %v375_v23 = vadd.f32 %v374_v31, %v141_v26 }
 0x158   :  { %6952 = vst [vmem:[#allocation91_spill] sm:$0xff] %v5180_v0  ;;  %6953 = vst [vmem:[#allocation92_spill] sm:$0xff] %v5183_v21  ;;  %v5191_v44 = vadd.f32 %v406_v53, %v5112_v33  ;;  %v408_v35 = vpop.f32.mrb[15].mxu0  ;;  %v5194_v28 = vadd.f32 %v479_v19, %v5116_v34  ;;  %v481_v25 = vpop.f32.mrb[15].mxu1 }
 0x159   :  { %6954 = vst [vmem:[#allocation93_spill] sm:$0xff] %v5185_v20  ;;  %6955 = vst [vmem:[#allocation94_spill] sm:$0xff] %v5188_v18  ;;  %v5196_v0 = vadd.f32 %v408_v35, %v141_v26  ;;  %v5199_v22 = vadd.f32 %v481_v25, %v5120_v62  ;;  %v446_v20 = vadd.f32 %v445_v12, %v5116_v34 }
 0x15a   :  { %6956 = vst [vmem:[#allocation95_spill] sm:$0xff] %v5191_v44  ;;  %6957 = vst [vmem:[#allocation96_spill] sm:$0xff] %v5194_v28  ;;  %v448_v18 = vadd.f32 %v447_v27, %v5120_v62 }
 0x15b   :  { %6958 = vst [vmem:[#allocation97_spill] sm:$0xff] %v5196_v0  ;;  %6959 = vst [vmem:[#allocation98_spill] sm:$0xff] %v5199_v22 }
 0x17d   :  { %v1028_v21 = vpop.f32.mrb[20].mxu0  ;;  %v1069_v53 = vpop.f32.mrb[20].mxu1 }
 0x17e   :  { %v1076_v44 = vadd.f32 %v1028_v21, %v373_v24  ;;  %v1078_v17 = vadd.f32 %v1069_v53, %v446_v20  ;;  %v1030_v16 = vpop.f32.mrb[21].mxu0  ;;  %v1071_v19 = vpop.f32.mrb[21].mxu1 }
 0x17f   :  { %v1077_v28 = vadd.f32 %v1030_v16, %v375_v23  ;;  %v1079_v15 = vadd.f32 %v1071_v19, %v448_v18  ;;  %v1032_v35 = vpop.f32.mrb[22].mxu0  ;;  %v1073_v0 = vpop.f32.mrb[22].mxu1 }
 0x180   :  { %v3734_v14 = vmul.f32 -1.442695, %v1076_v44  ;;  %v1033_v25 = vpop.f32.mrb[23].mxu0  ;;  %v1074_v22 = vpop.f32.mrb[23].mxu1  ;;  %v6965_v35 = vld [vmem:[#allocation13_spill] sm:$0xff] }
 0x181   :  { %v3735_v13 = vmul.f32 -1.442695, %v1077_v28  ;;  %v3736_v12 = vmul.f32 -1.442695, %v1079_v15  ;;  %v6966_v25 = vld [vmem:[#allocation14_spill] sm:$0xff] }
 0x182   :  { %4116 = vpow2.f32 %v3734_v14 }
 0x183   :  { %4118 = vpow2.f32 %v3735_v13 }
 0x184   :  { %4120 = vpow2.f32 %v3736_v12  ;;  %v6967_v12 = vld [vmem:[#allocation15_spill] sm:$0xff] }
 0x185   :  { %4122 = vtanh.f32 %v1078_v17 }
 0x18c   :  { %v4117_v26 = vpop.eup %4116 }
 0x18d   :  { %v4119_v31 = vpop.eup %4118  ;;  %v1083_v27 = vadd.f32 1.0, %v4117_v26  ;;  %v6968_v26 = vld [vmem:[#allocation16_spill] sm:$0xff] }
 0x18e   :  { %v1089_v21 = vadd.f32 1.0, %v4119_v31  ;;  %v4121_v62 = vpop.eup %4120  ;;  %v6969_v31 = vld [vmem:[#allocation17_spill] sm:$0xff] }
 0x18f   :  { %4124 = vrcp.f32 %v1083_v27  ;;  %v4123_v16 = vpop.eup %4122  ;;  %v1096_v34 = vadd.f32 1.0, %v4121_v62  ;;  %v6974_v27 = vld [vmem:[#allocation22_spill] sm:$0xff]  ;;  %v6976_v62 = vld [vmem:[#allocation24_spill] sm:$0xff] }
 0x190   :  { %4126 = vrcp.f32 %v1089_v21  ;;  %v6975_v21 = vld [vmem:[#allocation23_spill] sm:$0xff] }
 0x191   :  { %4128 = vrcp.f32 %v1096_v34  ;;  %v6981_v34 = vld [vmem:[#allocation29_spill] sm:$0xff] }
 0x199   :  { %v4125_v18 = vpop.eup %4124 }
 0x19a   :  { %v4127_v33 = vpop.eup %4126  ;;  %v1100_v0 = vmul.f32 %v4125_v18, %v4123_v16  ;;  %v6977_v16 = vld [vmem:[#allocation25_spill] sm:$0xff]  ;;  %v6978_v18 = vld [vmem:[#allocation26_spill] sm:$0xff] }
 0x19b   :  { %v1099_v29 = vmul.f32 0.0, %v4127_v33  ;;  %v4129_v13 = vpop.eup %4128  ;;  %v6979_v33 = vld [vmem:[#allocation27_spill] sm:$0xff] }
 0x19d   :  { %v5204_v20 = vadd.f32 %v1100_v0, %v1099_v29  ;;  %v6980_v0 = vld [vmem:[#allocation28_spill] sm:$0xff]  ;;  %v6982_v29 = vld [vmem:[#allocation30_spill] sm:$0xff] }
 0x19f   :  { %4130 = vtanh.f32 %v5204_v20 }
 0x1a9   :  { %v4131_v14 = vpop.eup %4130 }
 0x1aa   :  { %v1103_v15 = vmul.f32 %v4131_v14, %v4129_v13  ;;  %v6983_v13 = vld [vmem:[#allocation31_spill] sm:$0xff]  ;;  %v6984_v14 = vld [vmem:[#allocation32_spill] sm:$0xff] }
 0x1ac   :  { %v5207_v28 = vpack.c.bf16 %v1103_v15, %v1103_v15  ;;  %v6985_v15 = vld [vmem:[#allocation33_spill] sm:$0xff] }
 0x1ae   :  { %1356 = vmatmul.mubr.bf16.vlgmr.msra.gmra.mrb[16].mxu0 %v5207_v28  ;;  %1397 = vmatmul.mubr.bf16.vlgmr.msra.gmra.mrb[16].mxu1 %v5207_v28 }
 0x1af   :  { %1435 = vmatpush1.bf16.msra.mxu0 %v4794_v36  ;;  %1476 = vmatpush1.bf16.msra.mxu1 %v4796_v37  ;;  %v1104_v36 = vld [vmem:[%s6495_s6] sm:$0xf]  ;;  %v6960_v37 = vsub.s32 0, %v5101_v30 }
 0x1b0   :  { %1436 = vmatprep.subr.bf16.mxu0 %v4800_v38  ;;  %1477 = vmatprep.subr.bf16.mxu1 %v4802_v39  ;;  %v6962_v39 = vsub.s32 1, %v5101_v30 }
 0x1b1   :  { %1466 = vmatprep.mubr.bf16.mxu0 %v6899_v32  ;;  %1507 = vmatprep.mubr.bf16.mxu1 %v6899_v32  ;;  %v5250_v38 = vrot.slane %v1104_v36, %v6960_v37  ;;  %v6987_v37 = vld [vmem:[#allocation35_spill] sm:$0xff] }
 0x1b3   :  { %1437 = vmatpush1.bf16.msra.mxu0 %v4804_v40  ;;  %1478 = vmatpush1.bf16.msra.mxu1 %v4808_v41  ;;  %6961 = vst [vmem:[#allocation99_spill] sm:$0xff] %v5250_v38  ;;  %v5254_v40 = vrot.slane %v1104_v36, %v6962_v39  ;;  %v6988_v39 = vld [vmem:[#allocation36_spill] sm:$0xff] }
 0x1b4   :  { %1438 = vmatprep.subr.bf16.mxu0 %v4812_v42  ;;  %1479 = vmatprep.subr.bf16.mxu1 %v4814_v43 }
 0x1b7   :  { %1439 = vmatpush1.bf16.msra.mxu0 %v4821_v45  ;;  %1480 = vmatpush1.bf16.msra.mxu1 %v4823_v46 }
 0x1b8   :  { %1440 = vmatprep.subr.bf16.mxu0 %v4827_v47  ;;  %1481 = vmatprep.subr.bf16.mxu1 %v4831_v48 }
 0x1bb   :  { %1441 = vmatpush1.bf16.msra.mxu0 %v4833_v49  ;;  %1482 = vmatpush1.bf16.msra.mxu1 %v4835_v50 }
 0x1bc   :  { %1442 = vmatprep.subr.bf16.mxu0 %v4839_v51  ;;  %1483 = vmatprep.subr.bf16.mxu1 %v4843_v52 }
 0x1bf   :  { %1443 = vmatpush1.bf16.msra.mxu0 %v4850_v54  ;;  %1484 = vmatpush1.bf16.msra.mxu1 %v4854_v55  ;;  %v6963_v55 = vsub.s32 3, %v5101_v30 }
 0x1c0   :  { %1444 = vmatprep.subr.bf16.mxu0 %v4856_v56  ;;  %1485 = vmatprep.subr.bf16.mxu1 %v4860_v57 }
 0x1c1   :  { %v5260_v56 = vrot.slane %v1104_v36, %v6963_v55  ;;  %v7002_v55 = vld [vmem:[#allocation50_spill] sm:$0xff] }
 0x1c3   :  { %1445 = vmatpush1.bf16.msra.mxu0 %v4862_v58  ;;  %1486 = vmatpush1.bf16.msra.mxu1 %v4864_v59  ;;  %v6964_v58 = vsub.s32 2, %v5101_v30 }
 0x1c4   :  { %1446 = vmatprep.subr.bf16.mxu0 %v4868_v60  ;;  %1487 = vmatprep.subr.bf16.mxu1 %v4872_v61 }
 0x1c5   :  { %v5265_v59 = vrot.slane %v1104_v36, %v6964_v58  ;;  %v6986_v36 = vld [vmem:[#allocation34_spill] sm:$0xff]  ;;  %v7004_v58 = vld [vmem:[#allocation52_spill] sm:$0xff] }
 0x1c7   :  { %1447 = vmatpush1.bf16.msra.mxu0 %v4879_v63  ;;  %1488 = vmatpush1.bf16.msra.mxu1 %v4883_v1 }
 0x1c8   :  { %1448 = vmatprep.subr.bf16.mxu0 %v4885_v2  ;;  %1489 = vmatprep.subr.bf16.mxu1 %v4889_v3 }
 0x1cb   :  { %1449 = vmatpush1.bf16.msra.mxu0 %v4891_v4  ;;  %1490 = vmatpush1.bf16.msra.mxu1 %v4893_v5 }
 0x1cc   :  { %1520 = vmatprep.subr.bf16.mxu0 %v4897_v6  ;;  %1561 = vmatprep.subr.bf16.mxu1 %v4901_v7 }
 0x281   :  { %v1357_v41 = vpop.f32.mrb[16].mxu0  ;;  %v1398_v42 = vpop.f32.mrb[16].mxu1 }
 0x282   :  { %v3816_v43 = vadd.f32 %v1357_v41, %v5250_v38  ;;  %v1359_v45 = vpop.f32.mrb[17].mxu0  ;;  %v1400_v46 = vpop.f32.mrb[17].mxu1  ;;  %v3818_v61 = vadd.f32 %v1398_v42, %v5265_v59  ;;  %v6989_v41 = vld [vmem:[#allocation37_spill] sm:$0xff]  ;;  %v6990_v42 = vld [vmem:[#allocation38_spill] sm:$0xff] }
 0x283   :  { %v3817_v47 = vadd.f32 %v1359_v45, %v5254_v40  ;;  %v1361_v48 = vpop.f32.mrb[18].mxu0  ;;  %v1402_v49 = vpop.f32.mrb[18].mxu1  ;;  %v3819_v57 = vadd.f32 %v1400_v46, %v5260_v56  ;;  %v6992_v45 = vld [vmem:[#allocation40_spill] sm:$0xff]  ;;  %v6993_v46 = vld [vmem:[#allocation41_spill] sm:$0xff] }
 0x284   :  { %v3769_v50 = vmul.f32 -1.442695, %v3816_v43  ;;  %v1362_v51 = vpop.f32.mrb[19].mxu0  ;;  %v1403_v52 = vpop.f32.mrb[19].mxu1  ;;  %v6991_v43 = vld [vmem:[#allocation39_spill] sm:$0xff]  ;;  %v6996_v49 = vld [vmem:[#allocation44_spill] sm:$0xff] }
 0x285   :  { %v3770_v54 = vmul.f32 -1.442695, %v3817_v47  ;;  %v3771_v60 = vmul.f32 -1.442695, %v3819_v57  ;;  %v6994_v47 = vld [vmem:[#allocation42_spill] sm:$0xff]  ;;  %v6995_v48 = vld [vmem:[#allocation43_spill] sm:$0xff] }
 0x286   :  { %4132 = vpow2.f32 %v3769_v50  ;;  %v6997_v50 = vld [vmem:[#allocation45_spill] sm:$0xff]  ;;  %v6998_v51 = vld [vmem:[#allocation46_spill] sm:$0xff]  ;;  %v6999_v52 = vld [vmem:[#allocation47_spill] sm:$0xff] }
 0x287   :  { %4134 = vpow2.f32 %v3770_v54  ;;  %v7000_v54 = vld [vmem:[#allocation48_spill] sm:$0xff]  ;;  %v7003_v57 = vld [vmem:[#allocation51_spill] sm:$0xff] }
 0x288   :  { %4136 = vpow2.f32 %v3771_v60  ;;  %v7005_v60 = vld [vmem:[#allocation53_spill] sm:$0xff] }
 0x289   :  { %4138 = vtanh.f32 %v3818_v61  ;;  %v7006_v61 = vld [vmem:[#allocation54_spill] sm:$0xff] }
 0x290   :  { %v4133_v63 = vpop.eup %4132 }
 0x291   :  { %v4135_v1 = vpop.eup %4134  ;;  %v1412_v2 = vadd.f32 1.0, %v4133_v63  ;;  %v7007_v63 = vld [vmem:[#allocation55_spill] sm:$0xff] }
 0x292   :  { %v1418_v3 = vadd.f32 1.0, %v4135_v1  ;;  %v4137_v4 = vpop.eup %4136  ;;  %v7008_v1 = vld [vmem:[#allocation56_spill] sm:$0xff] }
 0x293   :  { %4140 = vrcp.f32 %v1412_v2  ;;  %v4139_v5 = vpop.eup %4138  ;;  %v1425_v44 = vadd.f32 1.0, %v4137_v4  ;;  %v7009_v2 = vld [vmem:[#allocation57_spill] sm:$0xff]  ;;  %v7011_v4 = vld [vmem:[#allocation59_spill] sm:$0xff] }
 0x294   :  { %4142 = vrcp.f32 %v1418_v3  ;;  %v7010_v3 = vld [vmem:[#allocation58_spill] sm:$0xff] }
 0x295   :  { %4144 = vrcp.f32 %v1425_v44  ;;  %v7016_v44 = vld [vmem:[#allocation64_spill] sm:$0xff] }
 0x29d   :  { %v4141_v6 = vpop.eup %4140 }
 0x29e   :  { %v4143_v7 = vpop.eup %4142  ;;  %v1429_v17 = vmul.f32 %v4141_v6, %v4139_v5  ;;  %v7012_v5 = vld [vmem:[#allocation60_spill] sm:$0xff]  ;;  %v7013_v6 = vld [vmem:[#allocation61_spill] sm:$0xff] }
 0x29f   :  { %v1428_v30 = vmul.f32 0.0, %v4143_v7  ;;  %v4145_v24 = vpop.eup %4144  ;;  %v7014_v7 = vld [vmem:[#allocation62_spill] sm:$0xff] }
 0x2a1   :  { %v5268_v22 = vadd.f32 %v1429_v17, %v1428_v30  ;;  %v7015_v17 = vld [vmem:[#allocation63_spill] sm:$0xff]  ;;  %v7017_v30 = vld [vmem:[#allocation65_spill] sm:$0xff] }
 0x2a3   :  { %4146 = vtanh.f32 %v5268_v22 }
 0x2ad   :  { %v4147_v23 = vpop.eup %4146 }
 0x2ae   :  { %v1432_v53 = vmul.f32 %v4147_v23, %v4145_v24  ;;  %v7018_v24 = vld [vmem:[#allocation66_spill] sm:$0xff]  ;;  %v7019_v23 = vld [vmem:[#allocation67_spill] sm:$0xff] }
 0x2b0   :  { %v1433_v19 = vpack.c.bf16 %v1432_v53, %v1432_v53  ;;  %v7020_v53 = vld [vmem:[#allocation68_spill] sm:$0xff] }
 0x2b2   :  { %1467 = vmatmul.mubr.bf16.vlgmr.msra.gmra.mrb[24].mxu0 %v1433_v19  ;;  %1508 = vmatmul.mubr.bf16.vlgmr.msra.gmra.mrb[24].mxu1 %v1433_v19  ;;  %v7021_v19 = vld [vmem:[#allocation69_spill] sm:$0xff] }
 0x2b3   :  { %1521 = vmatpush1.bf16.msra.mxu0 %v4905_v8  ;;  %1562 = vmatpush1.bf16.msra.mxu1 %v4909_v9  ;;  %v6970_v8 = vld [vmem:[#allocation18_spill] sm:$0xff]  ;;  %v6971_v9 = vld [vmem:[#allocation19_spill] sm:$0xff] }
 0x2b4   :  { %1522 = vmatprep.subr.bf16.mxu0 %v4911_v10  ;;  %1563 = vmatprep.subr.bf16.mxu1 %v4915_v11  ;;  %v6972_v10 = vld [vmem:[#allocation20_spill] sm:$0xff]  ;;  %v6973_v11 = vld [vmem:[#allocation21_spill] sm:$0xff] }
 0x2b5   :  { %1552 = vmatprep.mubr.bf16.mxu0 %v6899_v32  ;;  %1593 = vmatprep.mubr.bf16.mxu1 %v6899_v32 }
 0x2b7   :  { %1523 = vmatpush1.bf16.msra.mxu0 %v6965_v35  ;;  %1564 = vmatpush1.bf16.msra.mxu1 %v6966_v25  ;;  %v7022_v35 = vld [vmem:[#allocation70_spill] sm:$0xff]  ;;  %v5339_v25 = vld [vmem:[#allocation8 + $0x4] ss:$16 sps:$4 sm:$0xff]  }
 0x2b8   :  { %1524 = vmatprep.subr.bf16.mxu0 %v6967_v12  ;;  %1565 = vmatprep.subr.bf16.mxu1 %v6968_v26  ;;  %7023 = vst [vmem:[#allocation13_spill] sm:$0xff] %v5339_v25  ;;  %v5342_v12 = vld [vmem:[#allocation8 + $0xc] ss:$16 sps:$4 sm:$0xff]  }
 0x2b9   :  { %7024 = vst [vmem:[#allocation14_spill] sm:$0xff] %v5342_v12 }
 0x2bb   :  { %1525 = vmatpush1.bf16.msra.mxu0 %v6969_v31  ;;  %1566 = vmatpush1.bf16.msra.mxu1 %v6970_v8  ;;  %v7025_v8 = vld [vmem:[#allocation71_spill] sm:$0xff] }
 0x2bc   :  { %1526 = vmatprep.subr.bf16.mxu0 %v6971_v9  ;;  %1567 = vmatprep.subr.bf16.mxu1 %v6972_v10  ;;  %v7026_v10 = vld [vmem:[#allocation72_spill] sm:$0xff] }
 0x2bf   :  { %1527 = vmatpush1.bf16.msra.mxu0 %v6973_v11  ;;  %1568 = vmatpush1.bf16.msra.mxu1 %v6974_v27 }
 0x2c0   :  { %1528 = vmatprep.subr.bf16.mxu0 %v6975_v21  ;;  %1569 = vmatprep.subr.bf16.mxu1 %v6976_v62  ;;  %v7027_v62 = vld [vmem:[#allocation73_spill] sm:$0xff] }
 0x2c3   :  { %1529 = vmatpush1.bf16.msra.mxu0 %v6977_v16  ;;  %1570 = vmatpush1.bf16.msra.mxu1 %v6978_v18 }
 0x2c4   :  { %1530 = vmatprep.subr.bf16.mxu0 %v6979_v33  ;;  %1571 = vmatprep.subr.bf16.mxu1 %v6980_v0 }
 0x2c7   :  { %1531 = vmatpush1.bf16.msra.mxu0 %v6981_v34  ;;  %1572 = vmatpush1.bf16.msra.mxu1 %v6982_v29 }
 0x2c8   :  { %1532 = vmatprep.subr.bf16.mxu0 %v6983_v13  ;;  %1573 = vmatprep.subr.bf16.mxu1 %v6984_v14 }
 0x2cb   :  { %1533 = vmatpush1.bf16.msra.mxu0 %v6985_v15  ;;  %1574 = vmatpush1.bf16.msra.mxu1 %v6986_v36 }
 0x2cc   :  { %1534 = vmatprep.subr.bf16.mxu0 %v6987_v37  ;;  %1575 = vmatprep.subr.bf16.mxu1 %v6988_v39 }
 0x2cf   :  { %1535 = vmatpush1.bf16.msra.mxu0 %v6989_v41  ;;  %1576 = vmatpush1.bf16.msra.mxu1 %v6990_v42 }
 0x2d0   :  { %1635 = vmatprep.subr.bf16.mxu0 %v6991_v43  ;;  %1676 = vmatprep.subr.bf16.mxu1 %v6992_v45 }
 0x2d2   :  { %1553 = vmatmul.mubr.bf16.vlgmr.msra.gmra.mrb[28].mxu0 %v5207_v28  ;;  %1594 = vmatmul.mubr.bf16.vlgmr.msra.gmra.mrb[28].mxu1 %v5207_v28  ;;  %v7001_v28 = vld [vmem:[#allocation49_spill] sm:$0xff] }
 0x2d3   :  { %1636 = vmatpush1.bf16.msra.mxu0 %v6993_v46  ;;  %1677 = vmatpush1.bf16.msra.mxu1 %v6994_v47 }
 0x2d4   :  { %1637 = vmatprep.subr.bf16.mxu0 %v6995_v48  ;;  %1678 = vmatprep.subr.bf16.mxu1 %v6996_v49 }
 0x2d5   :  { %1667 = vmatprep.mubr.bf16.mxu0 %v6899_v32  ;;  %1708 = vmatprep.mubr.bf16.mxu1 %v6899_v32 }
 0x2d7   :  { %1638 = vmatpush1.bf16.msra.mxu0 %v6997_v50  ;;  %1679 = vmatpush1.bf16.msra.mxu1 %v6998_v51 }
 0x2d8   :  { %1639 = vmatprep.subr.bf16.mxu0 %v6999_v52  ;;  %1680 = vmatprep.subr.bf16.mxu1 %v7000_v54 }
 0x2db   :  { %1640 = vmatpush1.bf16.msra.mxu0 %v7001_v28  ;;  %1681 = vmatpush1.bf16.msra.mxu1 %v7002_v55 }
 0x2dc   :  { %1641 = vmatprep.subr.bf16.mxu0 %v7003_v57  ;;  %1682 = vmatprep.subr.bf16.mxu1 %v7004_v58 }
 0x2df   :  { %1642 = vmatpush1.bf16.msra.mxu0 %v7005_v60  ;;  %1683 = vmatpush1.bf16.msra.mxu1 %v7006_v61 }
 0x2e0   :  { %1643 = vmatprep.subr.bf16.mxu0 %v7007_v63  ;;  %1684 = vmatprep.subr.bf16.mxu1 %v7008_v1 }
 0x2e3   :  { %1644 = vmatpush1.bf16.msra.mxu0 %v7009_v2  ;;  %1685 = vmatpush1.bf16.msra.mxu1 %v7010_v3 }
 0x2e4   :  { %1645 = vmatprep.subr.bf16.mxu0 %v7011_v4  ;;  %1686 = vmatprep.subr.bf16.mxu1 %v7012_v5 }
 0x2e7   :  { %1646 = vmatpush1.bf16.msra.mxu0 %v7013_v6  ;;  %1687 = vmatpush1.bf16.msra.mxu1 %v7014_v7 }
 0x2e8   :  { %1647 = vmatprep.subr.bf16.mxu0 %v7015_v17  ;;  %1688 = vmatprep.subr.bf16.mxu1 %v7016_v44 }
 0x2eb   :  { %1648 = vmatpush1.bf16.msra.mxu0 %v7017_v30  ;;  %1689 = vmatpush1.bf16.msra.mxu1 %v7018_v24 }
 0x2ec   :  { %1649 = vmatprep.subr.bf16.mxu0 %v7019_v23  ;;  %1690 = vmatprep.subr.bf16.mxu1 %v7020_v53  ;;  %v7028_v53 = vld [vmem:[#allocation74_spill] sm:$0xff] }
 0x2ef   :  { %1650 = vmatpush1.bf16.msra.mxu0 %v7021_v19  ;;  %1691 = vmatpush1.bf16.msra.mxu1 %v7022_v35 }
 0x2f0   :  { %1746 = vmatprep.subr.bf16.mxu0 %v5339_v25  ;;  %1787 = vmatprep.subr.bf16.mxu1 %v5342_v12 }
 0x3a5   :  { %v1554_v26 = vpop.f32.mrb[28].mxu0  ;;  %v1595_v31 = vpop.f32.mrb[28].mxu1 }
 0x3a6   :  { %v1602_v9 = vadd.f32 %v1554_v26, %v7025_v8  ;;  %v1604_v11 = vadd.f32 %v1595_v31, %v7026_v10  ;;  %v1556_v27 = vpop.f32.mrb[29].mxu0  ;;  %v1597_v21 = vpop.f32.mrb[29].mxu1 }
 0x3a7   :  { %v1603_v19 = vadd.f32 %v1556_v27, %v7027_v62  ;;  %v1605_v35 = vadd.f32 %v1597_v21, %v7028_v53  ;;  %v1558_v23 = vpop.f32.mrb[30].mxu0  ;;  %v1599_v24 = vpop.f32.mrb[30].mxu1  ;;  %v5374_v27 = vld [vmem:[#allocation8 + $0x28] ss:$16 sps:$4 sm:$0xff]   ;;  %v5377_v21 = vld [vmem:[#allocation8 + $0x44] ss:$16 sps:$4 sm:$0xff]  }
 0x3a8   :  { %v3772_v30 = vmul.f32 -1.442695, %v1602_v9  ;;  %v1559_v25 = vpop.f32.mrb[31].mxu0  ;;  %v1600_v44 = vpop.f32.mrb[31].mxu1  ;;  %7031 = vst [vmem:[#allocation17_spill] sm:$0xff] %v5374_v27  ;;  %7032 = vst [vmem:[#allocation18_spill] sm:$0xff] %v5377_v21 }
 0x3a9   :  { %v3773_v17 = vmul.f32 -1.442695, %v1603_v19  ;;  %v3774_v12 = vmul.f32 -1.442695, %v1605_v35  ;;  %v5360_v25 = vld [vmem:[#allocation8 + $0x8] ss:$16 sps:$4 sm:$0xff]  }
 0x3aa   :  { %4148 = vpow2.f32 %v3772_v30  ;;  %v5380_v62 = vld [vmem:[#allocation8 + $0x4c] ss:$16 sps:$4 sm:$0xff]  }
 0x3ab   :  { %4150 = vpow2.f32 %v3773_v17  ;;  %7033 = vst [vmem:[#allocation19_spill] sm:$0xff] %v5380_v62 }
 0x3ac   :  { %4152 = vpow2.f32 %v3774_v12  ;;  %v5366_v12 = vld [vmem:[#allocation8 + $0x2c] ss:$16 sps:$4 sm:$0xff]  }
 0x3ad   :  { %4154 = vtanh.f32 %v1604_v11  ;;  %7029 = vst [vmem:[#allocation15_spill] sm:$0xff] %v5366_v12  ;;  %v5371_v11 = vld [vmem:[#allocation8 + $0x20] ss:$16 sps:$4 sm:$0xff]  }
 0x3ae   :  { %7030 = vst [vmem:[#allocation16_spill] sm:$0xff] %v5371_v11 }
 0x3b4   :  { %v4149_v7 = vpop.eup %4148 }
 0x3b5   :  { %v4151_v6 = vpop.eup %4150  ;;  %v1609_v26 = vadd.f32 1.0, %v4149_v7 }
 0x3b6   :  { %v1615_v31 = vadd.f32 1.0, %v4151_v6  ;;  %v4153_v8 = vpop.eup %4152  ;;  %v5357_v6 = vld [vmem:[#allocation8] ss:$16 sps:$4 sm:$0xff]  }
 0x3b7   :  { %4156 = vrcp.f32 %v1609_v26  ;;  %v4155_v10 = vpop.eup %4154  ;;  %v1622_v9 = vadd.f32 1.0, %v4153_v8  ;;  %v5383_v26 = vld [vmem:[#allocation8 + $0x40] ss:$16 sps:$4 sm:$0xff]   ;;  %v5389_v8 = vld [vmem:[#allocation8 + $0x64] ss:$16 sps:$4 sm:$0xff]  }
 0x3b8   :  { %4158 = vrcp.f32 %v1615_v31  ;;  %7034 = vst [vmem:[#allocation20_spill] sm:$0xff] %v5383_v26  ;;  %v5386_v31 = vld [vmem:[#allocation8 + $0x48] ss:$16 sps:$4 sm:$0xff]   ;;  %7036 = vst [vmem:[#allocation22_spill] sm:$0xff] %v5389_v8 }
 0x3b9   :  { %4160 = vrcp.f32 %v1622_v9  ;;  %7035 = vst [vmem:[#allocation21_spill] sm:$0xff] %v5386_v31  ;;  %v5404_v9 = vld [vmem:[#allocation8 + $0x8c] ss:$16 sps:$4 sm:$0xff]  }
 0x3ba   :  { %7041 = vst [vmem:[#allocation27_spill] sm:$0xff] %v5404_v9 }
 0x3c1   :  { %v4157_v53 = vpop.eup %4156 }
 0x3c2   :  { %v4159_v23 = vpop.eup %4158  ;;  %v1626_v24 = vmul.f32 %v4157_v53, %v4155_v10  ;;  %v5392_v10 = vld [vmem:[#allocation8 + $0x6c] ss:$16 sps:$4 sm:$0xff]   ;;  %v5395_v53 = vld [vmem:[#allocation8 + $0x60] ss:$16 sps:$4 sm:$0xff]  }
 0x3c3   :  { %v1625_v44 = vmul.f32 %v4159_v23, %v5204_v20  ;;  %v4161_v17 = vpop.eup %4160  ;;  %v5363_v20 = vld [vmem:[#allocation8 + $0x24] ss:$16 sps:$4 sm:$0xff]   ;;  %7037 = vst [vmem:[#allocation23_spill] sm:$0xff] %v5392_v10  ;;  %7038 = vst [vmem:[#allocation24_spill] sm:$0xff] %v5395_v53  ;;  %v5398_v23 = vld [vmem:[#allocation8 + $0x68] ss:$16 sps:$4 sm:$0xff]  }
 0x3c4   :  { %7039 = vst [vmem:[#allocation25_spill] sm:$0xff] %v5398_v23 }
 0x3c5   :  { %v5350_v19 = vadd.f32 %v1626_v24, %v1625_v44  ;;  %v5401_v24 = vld [vmem:[#allocation8 + $0x84] ss:$16 sps:$4 sm:$0xff]   ;;  %v5407_v44 = vld [vmem:[#allocation8 + $0x80] ss:$16 sps:$4 sm:$0xff]  }
 0x3c6   :  { %7040 = vst [vmem:[#allocation26_spill] sm:$0xff] %v5401_v24  ;;  %7042 = vst [vmem:[#allocation28_spill] sm:$0xff] %v5407_v44 }
 0x3c7   :  { %4162 = vtanh.f32 %v5350_v19 }
 0x3d1   :  { %v4163_v7 = vpop.eup %4162 }
 0x3d2   :  { %v1629_v30 = vmul.f32 %v4163_v7, %v4161_v17  ;;  %v5410_v17 = vld [vmem:[#allocation8 + $0x88] ss:$16 sps:$4 sm:$0xff]   ;;  %v5413_v7 = vld [vmem:[#allocation8 + $0xa4] ss:$16 sps:$4 sm:$0xff]  }
 0x3d3   :  { %7043 = vst [vmem:[#allocation29_spill] sm:$0xff] %v5410_v17  ;;  %7044 = vst [vmem:[#allocation30_spill] sm:$0xff] %v5413_v7 }
 0x3d4   :  { %v5353_v35 = vpack.c.bf16 %v1629_v30, %v1629_v30  ;;  %v5416_v30 = vld [vmem:[#allocation8 + $0xac] ss:$16 sps:$4 sm:$0xff]  }
 0x3d5   :  { %7045 = vst [vmem:[#allocation31_spill] sm:$0xff] %v5416_v30 }
 0x3d6   :  { %1668 = vmatmul.mubr.bf16.vlgmr.msra.gmra.mrb[24].mxu0 %v5353_v35  ;;  %1709 = vmatmul.mubr.bf16.vlgmr.msra.gmra.mrb[24].mxu1 %v5353_v35 }
 0x3d7   :  { %1747 = vmatpush1.bf16.msra.mxu0 %v5357_v6  ;;  %1788 = vmatpush1.bf16.msra.mxu1 %v5360_v25 }
 0x3d8   :  { %1748 = vmatprep.subr.bf16.mxu0 %v5363_v20  ;;  %1789 = vmatprep.subr.bf16.mxu1 %v5366_v12 }
 0x3d9   :  { %1778 = vmatprep.mubr.bf16.mxu0 %v6899_v32  ;;  %1819 = vmatprep.mubr.bf16.mxu1 %v6899_v32 }
 0x3db   :  { %1749 = vmatpush1.bf16.msra.mxu0 %v5371_v11  ;;  %1790 = vmatpush1.bf16.msra.mxu1 %v5374_v27 }
 0x3dc   :  { %1750 = vmatprep.subr.bf16.mxu0 %v5377_v21  ;;  %1791 = vmatprep.subr.bf16.mxu1 %v5380_v62 }
 0x3df   :  { %1751 = vmatpush1.bf16.msra.mxu0 %v5383_v26  ;;  %1792 = vmatpush1.bf16.msra.mxu1 %v5386_v31 }
 0x3e0   :  { %1752 = vmatprep.subr.bf16.mxu0 %v5389_v8  ;;  %1793 = vmatprep.subr.bf16.mxu1 %v5392_v10 }
 0x3e3   :  { %1753 = vmatpush1.bf16.msra.mxu0 %v5395_v53  ;;  %1794 = vmatpush1.bf16.msra.mxu1 %v5398_v23 }
 0x3e4   :  { %1754 = vmatprep.subr.bf16.mxu0 %v5401_v24  ;;  %1795 = vmatprep.subr.bf16.mxu1 %v5404_v9  ;;  %v5419_v24 = vld [vmem:[#allocation8 + $0xa0] ss:$16 sps:$4 sm:$0xff]   ;;  %v5422_v9 = vld [vmem:[#allocation8 + $0xa8] ss:$16 sps:$4 sm:$0xff]  }
 0x3e5   :  { %7046 = vst [vmem:[#allocation32_spill] sm:$0xff] %v5419_v24  ;;  %7047 = vst [vmem:[#allocation33_spill] sm:$0xff] %v5422_v9 }
 0x3e7   :  { %1755 = vmatpush1.bf16.msra.mxu0 %v5407_v44  ;;  %1796 = vmatpush1.bf16.msra.mxu1 %v5410_v17  ;;  %v5425_v44 = vld [vmem:[#allocation8 + $0xc4] ss:$16 sps:$4 sm:$0xff]   ;;  %v5428_v17 = vld [vmem:[#allocation8 + $0xcc] ss:$16 sps:$4 sm:$0xff]  }
 0x3e8   :  { %1756 = vmatprep.subr.bf16.mxu0 %v5413_v7  ;;  %1797 = vmatprep.subr.bf16.mxu1 %v5416_v30  ;;  %7048 = vst [vmem:[#allocation34_spill] sm:$0xff] %v5425_v44  ;;  %7049 = vst [vmem:[#allocation35_spill] sm:$0xff] %v5428_v17  ;;  %v5431_v7 = vld [vmem:[#allocation8 + $0xc0] ss:$16 sps:$4 sm:$0xff]   ;;  %v5434_v30 = vld [vmem:[#allocation8 + $0xc8] ss:$16 sps:$4 sm:$0xff]  }
 0x3e9   :  { %7050 = vst [vmem:[#allocation36_spill] sm:$0xff] %v5431_v7  ;;  %7051 = vst [vmem:[#allocation37_spill] sm:$0xff] %v5434_v30 }
 0x3eb   :  { %1757 = vmatpush1.bf16.msra.mxu0 %v5419_v24  ;;  %1798 = vmatpush1.bf16.msra.mxu1 %v5422_v9  ;;  %v5437_v24 = vld [vmem:[#allocation8 + $0xe4] ss:$16 sps:$4 sm:$0xff]   ;;  %v5440_v9 = vld [vmem:[#allocation8 + $0xec] ss:$16 sps:$4 sm:$0xff]  }
 0x3ec   :  { %1758 = vmatprep.subr.bf16.mxu0 %v5425_v44  ;;  %1799 = vmatprep.subr.bf16.mxu1 %v5428_v17  ;;  %7052 = vst [vmem:[#allocation38_spill] sm:$0xff] %v5437_v24  ;;  %7053 = vst [vmem:[#allocation39_spill] sm:$0xff] %v5440_v9  ;;  %v5443_v44 = vld [vmem:[#allocation8 + $0xe0] ss:$16 sps:$4 sm:$0xff]   ;;  %v5446_v17 = vld [vmem:[#allocation8 + $0xe8] ss:$16 sps:$4 sm:$0xff]  }
 0x3ed   :  { %7054 = vst [vmem:[#allocation40_spill] sm:$0xff] %v5443_v44  ;;  %7055 = vst [vmem:[#allocation41_spill] sm:$0xff] %v5446_v17 }
 0x3ef   :  { %1759 = vmatpush1.bf16.msra.mxu0 %v5431_v7  ;;  %1800 = vmatpush1.bf16.msra.mxu1 %v5434_v30  ;;  %v5449_v7 = vld [vmem:[#allocation5 + $0x4] ss:$16 sps:$4 sm:$0xff]   ;;  %v5452_v30 = vld [vmem:[#allocation5 + $0xc] ss:$16 sps:$4 sm:$0xff]  }
 0x3f0   :  { %1760 = vmatprep.subr.bf16.mxu0 %v5437_v24  ;;  %1801 = vmatprep.subr.bf16.mxu1 %v5440_v9  ;;  %7056 = vst [vmem:[#allocation42_spill] sm:$0xff] %v5449_v7  ;;  %7057 = vst [vmem:[#allocation43_spill] sm:$0xff] %v5452_v30 }
 0x3f3   :  { %1761 = vmatpush1.bf16.msra.mxu0 %v5443_v44  ;;  %1802 = vmatpush1.bf16.msra.mxu1 %v5446_v17 }
 0x3f4   :  { %1832 = vmatprep.subr.bf16.mxu0 %v5449_v7  ;;  %1873 = vmatprep.subr.bf16.mxu1 %v5452_v30 }
 0x4a9   :  { %v1669_v24 = vpop.f32.mrb[24].mxu0  ;;  %v1710_v23 = vpop.f32.mrb[24].mxu1 }
 0x4aa   :  { %v3820_v9 = vadd.f32 %v1669_v24, %v5250_v38  ;;  %v1671_v53 = vpop.f32.mrb[25].mxu0  ;;  %v1712_v10 = vpop.f32.mrb[25].mxu1  ;;  %v3822_v30 = vadd.f32 %v1710_v23, %v5265_v59 }
 0x4ab   :  { %v3821_v44 = vadd.f32 %v1671_v53, %v5254_v40  ;;  %v1673_v8 = vpop.f32.mrb[26].mxu0  ;;  %v1714_v31 = vpop.f32.mrb[26].mxu1  ;;  %v3823_v7 = vadd.f32 %v1712_v10, %v5260_v56 }
 0x4ac   :  { %v3775_v26 = vmul.f32 -1.442695, %v3820_v9  ;;  %v1674_v17 = vpop.f32.mrb[27].mxu0  ;;  %v1715_v62 = vpop.f32.mrb[27].mxu1 }
 0x4ad   :  { %v3776_v21 = vmul.f32 -1.442695, %v3821_v44  ;;  %v3777_v27 = vmul.f32 -1.442695, %v3823_v7  ;;  %v5472_v17 = vld [vmem:[#allocation5 + $0x2c] ss:$16 sps:$4 sm:$0xff]  }
 0x4ae   :  { %4164 = vpow2.f32 %v3775_v26  ;;  %v5477_v7 = vld [vmem:[#allocation5 + $0x20] ss:$16 sps:$4 sm:$0xff]  }
 0x4af   :  { %4166 = vpow2.f32 %v3776_v21 }
 0x4b0   :  { %4168 = vpow2.f32 %v3777_v27 }
 0x4b1   :  { %4170 = vtanh.f32 %v3822_v30  ;;  %v5480_v30 = vld [vmem:[#allocation5 + $0x28] ss:$16 sps:$4 sm:$0xff]  }
 0x4b8   :  { %v4165_v11 = vpop.eup %4164 }
 0x4b9   :  { %v4167_v12 = vpop.eup %4166  ;;  %v1724_v24 = vadd.f32 1.0, %v4165_v11 }
 0x4ba   :  { %v1730_v38 = vadd.f32 1.0, %v4167_v12  ;;  %v4169_v31 = vpop.eup %4168  ;;  %v5466_v12 = vld [vmem:[#allocation5 + $0x8] ss:$16 sps:$4 sm:$0xff]  }
 0x4bb   :  { %4172 = vrcp.f32 %v1724_v24  ;;  %v4171_v8 = vpop.eup %4170  ;;  %v1737_v26 = vadd.f32 1.0, %v4169_v31  ;;  %v5483_v24 = vld [vmem:[#allocation5 + $0x44] ss:$16 sps:$4 sm:$0xff]   ;;  %v5486_v31 = vld [vmem:[#allocation5 + $0x4c] ss:$16 sps:$4 sm:$0xff]  }
 0x4bc   :  { %4174 = vrcp.f32 %v1730_v38  ;;  %v5463_v38 = vld [vmem:[#allocation5] ss:$16 sps:$4 sm:$0xff]  }
 0x4bd   :  { %4176 = vrcp.f32 %v1737_v26  ;;  %v5501_v26 = vld [vmem:[#allocation5 + $0x60] ss:$16 sps:$4 sm:$0xff]  }
 0x4c5   :  { %v4173_v53 = vpop.eup %4172 }
 0x4c6   :  { %v4175_v62 = vpop.eup %4174  ;;  %v1741_v9 = vmul.f32 %v4173_v53, %v4171_v8  ;;  %v5489_v8 = vld [vmem:[#allocation5 + $0x40] ss:$16 sps:$4 sm:$0xff]   ;;  %v5492_v53 = vld [vmem:[#allocation5 + $0x48] ss:$16 sps:$4 sm:$0xff]  }
 0x4c7   :  { %v1740_v21 = vmul.f32 %v4175_v62, %v5268_v22  ;;  %v4177_v23 = vpop.eup %4176  ;;  %v5469_v22 = vld [vmem:[#allocation5 + $0x24] ss:$16 sps:$4 sm:$0xff]  }
 0x4c8   :  { %v5495_v62 = vld [vmem:[#allocation5 + $0x64] ss:$16 sps:$4 sm:$0xff]  }
 0x4c9   :  { %v5460_v10 = vadd.f32 %v1741_v9, %v1740_v21  ;;  %v5498_v9 = vld [vmem:[#allocation5 + $0x6c] ss:$16 sps:$4 sm:$0xff]   ;;  %v5504_v21 = vld [vmem:[#allocation5 + $0x68] ss:$16 sps:$4 sm:$0xff]  }
 0x4cb   :  { %4178 = vtanh.f32 %v5460_v10 }
 0x4d5   :  { %v4179_v11 = vpop.eup %4178 }
 0x4d6   :  { %v1744_v27 = vmul.f32 %v4179_v11, %v4177_v23  ;;  %v5507_v23 = vld [vmem:[#allocation5 + $0x84] ss:$16 sps:$4 sm:$0xff]   ;;  %v5510_v11 = vld [vmem:[#allocation5 + $0x8c] ss:$16 sps:$4 sm:$0xff]  }
 0x4d8   :  { %v1745_v44 = vpack.c.bf16 %v1744_v27, %v1744_v27 }
 0x4da   :  { %1779 = vmatmul.mubr.bf16.vlgmr.msra.gmra.mrb[32].mxu0 %v1745_v44  ;;  %1820 = vmatmul.mubr.bf16.vlgmr.msra.gmra.mrb[32].mxu1 %v1745_v44 }
 0x4db   :  { %1833 = vmatpush1.bf16.msra.mxu0 %v5463_v38  ;;  %1874 = vmatpush1.bf16.msra.mxu1 %v5466_v12 }
 0x4dc   :  { %1834 = vmatprep.subr.bf16.mxu0 %v5469_v22  ;;  %1875 = vmatprep.subr.bf16.mxu1 %v5472_v17 }
 0x4dd   :  { %1864 = vmatprep.mubr.bf16.mxu0 %v6899_v32  ;;  %1905 = vmatprep.mubr.bf16.mxu1 %v6899_v32 }
 0x4df   :  { %1835 = vmatpush1.bf16.msra.mxu0 %v5477_v7  ;;  %1876 = vmatpush1.bf16.msra.mxu1 %v5480_v30 }
 0x4e0   :  { %1836 = vmatprep.subr.bf16.mxu0 %v5483_v24  ;;  %1877 = vmatprep.subr.bf16.mxu1 %v5486_v31 }
 0x4e3   :  { %1837 = vmatpush1.bf16.msra.mxu0 %v5489_v8  ;;  %1878 = vmatpush1.bf16.msra.mxu1 %v5492_v53 }
 0x4e4   :  { %1838 = vmatprep.subr.bf16.mxu0 %v5495_v62  ;;  %1879 = vmatprep.subr.bf16.mxu1 %v5498_v9 }
 0x4e7   :  { %1839 = vmatpush1.bf16.msra.mxu0 %v5501_v26  ;;  %1880 = vmatpush1.bf16.msra.mxu1 %v5504_v21 }
 0x4e8   :  { %1840 = vmatprep.subr.bf16.mxu0 %v5507_v23  ;;  %1881 = vmatprep.subr.bf16.mxu1 %v5510_v11 }
 0x4eb   :  { %1841 = vmatpush1.bf16.msra.mxu0 %v6977_v16  ;;  %1882 = vmatpush1.bf16.msra.mxu1 %v6978_v18  ;;  %v7058_v16 = vld [vmem:[#allocation61_spill] sm:$0xff]  ;;  %v7059_v18 = vld [vmem:[#allocation62_spill] sm:$0xff] }
 0x4ec   :  { %1842 = vmatprep.subr.bf16.mxu0 %v6979_v33  ;;  %1883 = vmatprep.subr.bf16.mxu1 %v6980_v0  ;;  %v7060_v33 = vld [vmem:[#allocation63_spill] sm:$0xff]  ;;  %v7061_v0 = vld [vmem:[#allocation64_spill] sm:$0xff] }
 0x4ef   :  { %1843 = vmatpush1.bf16.msra.mxu0 %v6981_v34  ;;  %1884 = vmatpush1.bf16.msra.mxu1 %v6982_v29  ;;  %v7062_v34 = vld [vmem:[#allocation65_spill] sm:$0xff]  ;;  %v7063_v29 = vld [vmem:[#allocation66_spill] sm:$0xff] }
 0x4f0   :  { %1844 = vmatprep.subr.bf16.mxu0 %v6983_v13  ;;  %1885 = vmatprep.subr.bf16.mxu1 %v6984_v14  ;;  %v7064_v13 = vld [vmem:[#allocation67_spill] sm:$0xff]  ;;  %v7065_v14 = vld [vmem:[#allocation68_spill] sm:$0xff] }
 0x4f3   :  { %1845 = vmatpush1.bf16.msra.mxu0 %v6985_v15  ;;  %1886 = vmatpush1.bf16.msra.mxu1 %v6986_v36  ;;  %v7066_v15 = vld [vmem:[#allocation69_spill] sm:$0xff]  ;;  %v7067_v36 = vld [vmem:[#allocation70_spill] sm:$0xff] }
 0x4f4   :  { %1846 = vmatprep.subr.bf16.mxu0 %v6987_v37  ;;  %1887 = vmatprep.subr.bf16.mxu1 %v6988_v39  ;;  %v7068_v37 = vld [vmem:[#allocation13_spill] sm:$0xff]  ;;  %v7069_v39 = vld [vmem:[#allocation14_spill] sm:$0xff] }
 0x4f7   :  { %1847 = vmatpush1.bf16.msra.mxu0 %v6989_v41  ;;  %1888 = vmatpush1.bf16.msra.mxu1 %v6990_v42 }
 0x4f8   :  { %1947 = vmatprep.subr.bf16.mxu0 %v6991_v43  ;;  %1988 = vmatprep.subr.bf16.mxu1 %v6992_v45  ;;  %v7070_v43 = vld [vmem:[#allocation75_spill] sm:$0xff] }
 0x4fa   :  { %1865 = vmatmul.mubr.bf16.vlgmr.msra.gmra.mrb[36].mxu0 %v5353_v35  ;;  %1906 = vmatmul.mubr.bf16.vlgmr.msra.gmra.mrb[36].mxu1 %v5353_v35 }
 0x4fb   :  { %1948 = vmatpush1.bf16.msra.mxu0 %v6993_v46  ;;  %1989 = vmatpush1.bf16.msra.mxu1 %v6994_v47  ;;  %v7071_v46 = vld [vmem:[#allocation76_spill] sm:$0xff] }
 0x4fc   :  { %1949 = vmatprep.subr.bf16.mxu0 %v6995_v48  ;;  %1990 = vmatprep.subr.bf16.mxu1 %v6996_v49 }
 0x4fd   :  { %1979 = vmatprep.mubr.bf16.mxu0 %v6899_v32  ;;  %2020 = vmatprep.mubr.bf16.mxu1 %v6899_v32 }
 0x4ff   :  { %1950 = vmatpush1.bf16.msra.mxu0 %v6997_v50  ;;  %1991 = vmatpush1.bf16.msra.mxu1 %v6998_v51  ;;  %v7072_v50 = vld [vmem:[#allocation77_spill] sm:$0xff] }
 0x500   :  { %1951 = vmatprep.subr.bf16.mxu0 %v6999_v52  ;;  %1992 = vmatprep.subr.bf16.mxu1 %v7000_v54  ;;  %v7073_v52 = vld [vmem:[#allocation78_spill] sm:$0xff] }
 0x503   :  { %1952 = vmatpush1.bf16.msra.mxu0 %v7001_v28  ;;  %1993 = vmatpush1.bf16.msra.mxu1 %v7002_v55 }
 0x504   :  { %1953 = vmatprep.subr.bf16.mxu0 %v7003_v57  ;;  %1994 = vmatprep.subr.bf16.mxu1 %v7004_v58 }
 0x507   :  { %1954 = vmatpush1.bf16.msra.mxu0 %v7005_v60  ;;  %1995 = vmatpush1.bf16.msra.mxu1 %v7006_v61 }
 0x508   :  { %1955 = vmatprep.subr.bf16.mxu0 %v7007_v63  ;;  %1996 = vmatprep.subr.bf16.mxu1 %v7008_v1 }
 0x50b   :  { %1956 = vmatpush1.bf16.msra.mxu0 %v7009_v2  ;;  %1997 = vmatpush1.bf16.msra.mxu1 %v7010_v3 }
 0x50c   :  { %1957 = vmatprep.subr.bf16.mxu0 %v7011_v4  ;;  %1998 = vmatprep.subr.bf16.mxu1 %v7012_v5 }
 0x50f   :  { %1958 = vmatpush1.bf16.msra.mxu0 %v7058_v16  ;;  %1999 = vmatpush1.bf16.msra.mxu1 %v7059_v18 }
 0x510   :  { %1959 = vmatprep.subr.bf16.mxu0 %v7060_v33  ;;  %2000 = vmatprep.subr.bf16.mxu1 %v7061_v0 }
 0x513   :  { %1960 = vmatpush1.bf16.msra.mxu0 %v7062_v34  ;;  %2001 = vmatpush1.bf16.msra.mxu1 %v7063_v29 }
 0x514   :  { %1961 = vmatprep.subr.bf16.mxu0 %v7064_v13  ;;  %2002 = vmatprep.subr.bf16.mxu1 %v7065_v14 }
 0x517   :  { %1962 = vmatpush1.bf16.msra.mxu0 %v7066_v15  ;;  %2003 = vmatpush1.bf16.msra.mxu1 %v7067_v36  ;;  %v7075_v15 = vld [vmem:[#allocation16_spill] sm:$0xff]  ;;  %v7076_v36 = vld [vmem:[#allocation17_spill] sm:$0xff] }
 0x518   :  { %2058 = vmatprep.subr.bf16.mxu0 %v7068_v37  ;;  %2099 = vmatprep.subr.bf16.mxu1 %v7069_v39 }
 0x5cd   :  { %v1866_v41 = vpop.f32.mrb[36].mxu0  ;;  %v1907_v42 = vpop.f32.mrb[36].mxu1 }
 0x5ce   :  { %v1914_v45 = vadd.f32 %v1866_v41, %v7070_v43  ;;  %v1916_v47 = vadd.f32 %v1907_v42, %v7071_v46  ;;  %v1868_v48 = vpop.f32.mrb[37].mxu0  ;;  %v1909_v49 = vpop.f32.mrb[37].mxu1  ;;  %v7077_v41 = vld [vmem:[#allocation18_spill] sm:$0xff]  ;;  %v7078_v42 = vld [vmem:[#allocation19_spill] sm:$0xff]  ;;  %v7079_v43 = vld [vmem:[#allocation20_spill] sm:$0xff] }
 0x5cf   :  { %v1915_v51 = vadd.f32 %v1868_v48, %v7072_v50  ;;  %v1917_v54 = vadd.f32 %v1909_v49, %v7073_v52  ;;  %v1870_v28 = vpop.f32.mrb[38].mxu0  ;;  %v1911_v55 = vpop.f32.mrb[38].mxu1  ;;  %v7081_v46 = vld [vmem:[#allocation22_spill] sm:$0xff]  ;;  %v7083_v48 = vld [vmem:[#allocation24_spill] sm:$0xff]  ;;  %v7084_v49 = vld [vmem:[#allocation25_spill] sm:$0xff] }
 0x5d0   :  { %v3778_v57 = vmul.f32 -1.442695, %v1914_v45  ;;  %v1871_v58 = vpop.f32.mrb[39].mxu0  ;;  %v1912_v60 = vpop.f32.mrb[39].mxu1  ;;  %v7080_v45 = vld [vmem:[#allocation21_spill] sm:$0xff]  ;;  %v7085_v50 = vld [vmem:[#allocation26_spill] sm:$0xff] }
 0x5d1   :  { %v3779_v61 = vmul.f32 -1.442695, %v1915_v51  ;;  %v3780_v63 = vmul.f32 -1.442695, %v1917_v54  ;;  %v7086_v51 = vld [vmem:[#allocation27_spill] sm:$0xff]  ;;  %v7087_v52 = vld [vmem:[#allocation28_spill] sm:$0xff] }
 0x5d2   :  { %4180 = vpow2.f32 %v3778_v57  ;;  %v7088_v54 = vld [vmem:[#allocation29_spill] sm:$0xff]  ;;  %v7089_v28 = vld [vmem:[#allocation30_spill] sm:$0xff]  ;;  %v7090_v55 = vld [vmem:[#allocation31_spill] sm:$0xff] }
 0x5d3   :  { %4182 = vpow2.f32 %v3779_v61  ;;  %v7091_v57 = vld [vmem:[#allocation32_spill] sm:$0xff]  ;;  %v7092_v58 = vld [vmem:[#allocation33_spill] sm:$0xff]  ;;  %v7093_v60 = vld [vmem:[#allocation34_spill] sm:$0xff] }
 0x5d4   :  { %4184 = vpow2.f32 %v3780_v63  ;;  %v7094_v61 = vld [vmem:[#allocation35_spill] sm:$0xff]  ;;  %v7095_v63 = vld [vmem:[#allocation36_spill] sm:$0xff] }
 0x5d5   :  { %4186 = vtanh.f32 %v1916_v47  ;;  %v7082_v47 = vld [vmem:[#allocation23_spill] sm:$0xff] }
 0x5dc   :  { %v4181_v1 = vpop.eup %4180 }
 0x5dd   :  { %v4183_v2 = vpop.eup %4182  ;;  %v1921_v3 = vadd.f32 1.0, %v4181_v1  ;;  %v7096_v1 = vld [vmem:[#allocation37_spill] sm:$0xff] }
 0x5de   :  { %v1927_v4 = vadd.f32 1.0, %v4183_v2  ;;  %v4185_v5 = vpop.eup %4184  ;;  %v7097_v2 = vld [vmem:[#allocation38_spill] sm:$0xff] }
 0x5df   :  { %4188 = vrcp.f32 %v1921_v3  ;;  %v4187_v35 = vpop.eup %4186  ;;  %v1934_v18 = vadd.f32 1.0, %v4185_v5  ;;  %v7098_v3 = vld [vmem:[#allocation39_spill] sm:$0xff]  ;;  %v7100_v5 = vld [vmem:[#allocation41_spill] sm:$0xff] }
 0x5e0   :  { %4190 = vrcp.f32 %v1927_v4  ;;  %v7099_v4 = vld [vmem:[#allocation40_spill] sm:$0xff] }
 0x5e1   :  { %4192 = vrcp.f32 %v1934_v18  ;;  %v7103_v18 = vld [vmem:[#allocation99_spill] sm:$0xff] }
 0x5e9   :  { %v4189_v27 = vpop.eup %4188 }
 0x5ea   :  { %v4191_v44 = vpop.eup %4190  ;;  %v1938_v16 = vmul.f32 %v4189_v27, %v4187_v35  ;;  %v7101_v35 = vld [vmem:[#allocation42_spill] sm:$0xff]  ;;  %v7102_v27 = vld [vmem:[#allocation43_spill] sm:$0xff] }
 0x5eb   :  { %v1937_v33 = vmul.f32 %v4191_v44, %v5350_v19  ;;  %v4193_v34 = vpop.eup %4192  ;;  %v7074_v19 = vld [vmem:[#allocation15_spill] sm:$0xff] }
 0x5ed   :  { %v5570_v0 = vadd.f32 %v1938_v16, %v1937_v33 }
 0x5ef   :  { %4194 = vtanh.f32 %v5570_v0 }
 0x5f9   :  { %v4195_v29 = vpop.eup %4194 }
 0x5fa   :  { %v1941_v13 = vmul.f32 %v4195_v29, %v4193_v34 }
 0x5fc   :  { %v5573_v14 = vpack.c.bf16 %v1941_v13, %v1941_v13 }
 0x5fe   :  { %1980 = vmatmul.mubr.bf16.vlgmr.msra.gmra.mrb[32].mxu0 %v5573_v14  ;;  %2021 = vmatmul.mubr.bf16.vlgmr.msra.gmra.mrb[32].mxu1 %v5573_v14 }
 0x5ff   :  { %2059 = vmatpush1.bf16.msra.mxu0 %v5357_v6  ;;  %2100 = vmatpush1.bf16.msra.mxu1 %v5360_v25 }
 0x600   :  { %2060 = vmatprep.subr.bf16.mxu0 %v5363_v20  ;;  %2101 = vmatprep.subr.bf16.mxu1 %v7074_v19 }
 0x601   :  { %2090 = vmatprep.mubr.bf16.mxu0 %v6899_v32  ;;  %2131 = vmatprep.mubr.bf16.mxu1 %v6899_v32 }
 0x603   :  { %2061 = vmatpush1.bf16.msra.mxu0 %v7075_v15  ;;  %2102 = vmatpush1.bf16.msra.mxu1 %v7076_v36 }
 0x604   :  { %2062 = vmatprep.subr.bf16.mxu0 %v7077_v41  ;;  %2103 = vmatprep.subr.bf16.mxu1 %v7078_v42 }
 0x607   :  { %2063 = vmatpush1.bf16.msra.mxu0 %v7079_v43  ;;  %2104 = vmatpush1.bf16.msra.mxu1 %v7080_v45 }
 0x608   :  { %2064 = vmatprep.subr.bf16.mxu0 %v7081_v46  ;;  %2105 = vmatprep.subr.bf16.mxu1 %v7082_v47 }
 0x60b   :  { %2065 = vmatpush1.bf16.msra.mxu0 %v7083_v48  ;;  %2106 = vmatpush1.bf16.msra.mxu1 %v7084_v49 }
 0x60c   :  { %2066 = vmatprep.subr.bf16.mxu0 %v7085_v50  ;;  %2107 = vmatprep.subr.bf16.mxu1 %v7086_v51 }
 0x60f   :  { %2067 = vmatpush1.bf16.msra.mxu0 %v7087_v52  ;;  %2108 = vmatpush1.bf16.msra.mxu1 %v7088_v54 }
 0x610   :  { %2068 = vmatprep.subr.bf16.mxu0 %v7089_v28  ;;  %2109 = vmatprep.subr.bf16.mxu1 %v7090_v55 }
 0x613   :  { %2069 = vmatpush1.bf16.msra.mxu0 %v7091_v57  ;;  %2110 = vmatpush1.bf16.msra.mxu1 %v7092_v58 }
 0x614   :  { %2070 = vmatprep.subr.bf16.mxu0 %v7093_v60  ;;  %2111 = vmatprep.subr.bf16.mxu1 %v7094_v61 }
 0x617   :  { %2071 = vmatpush1.bf16.msra.mxu0 %v7095_v63  ;;  %2112 = vmatpush1.bf16.msra.mxu1 %v7096_v1 }
 0x618   :  { %2072 = vmatprep.subr.bf16.mxu0 %v7097_v2  ;;  %2113 = vmatprep.subr.bf16.mxu1 %v7098_v3 }
 0x61b   :  { %2073 = vmatpush1.bf16.msra.mxu0 %v7099_v4  ;;  %2114 = vmatpush1.bf16.msra.mxu1 %v7100_v5 }
 0x61c   :  { %2144 = vmatprep.subr.bf16.mxu0 %v7101_v35  ;;  %2185 = vmatprep.subr.bf16.mxu1 %v7102_v27 }
 0x6d1   :  { %v1981_v44 = vpop.f32.mrb[32].mxu0  ;;  %v2022_v16 = vpop.f32.mrb[32].mxu1 }
 0x6d2   :  { %v3824_v33 = vadd.f32 %v1981_v44, %v7103_v18  ;;  %v1983_v34 = vpop.f32.mrb[33].mxu0  ;;  %v2024_v29 = vpop.f32.mrb[33].mxu1  ;;  %v3826_v27 = vadd.f32 %v2022_v16, %v5265_v59  ;;  %v5643_v16 = vld [vmem:[#allocation5 + $0xa4] ss:$16 sps:$4 sm:$0xff]  }
 0x6d3   :  { %v3825_v13 = vadd.f32 %v1983_v34, %v5254_v40  ;;  %v1985_v1 = vpop.f32.mrb[34].mxu0  ;;  %v2026_v2 = vpop.f32.mrb[34].mxu1  ;;  %v3827_v35 = vadd.f32 %v2024_v29, %v5260_v56  ;;  %7106 = vst [vmem:[#allocation46_spill] sm:$0xff] %v5643_v16  ;;  %v5649_v29 = vld [vmem:[#allocation5 + $0xa0] ss:$16 sps:$4 sm:$0xff]  }
 0x6d4   :  { %v3781_v63 = vmul.f32 -1.442695, %v3824_v33  ;;  %v1986_v3 = vpop.f32.mrb[35].mxu0  ;;  %v2027_v61 = vpop.f32.mrb[35].mxu1  ;;  %7108 = vst [vmem:[#allocation48_spill] sm:$0xff] %v5649_v29 }
 0x6d5   :  { %v3782_v4 = vmul.f32 -1.442695, %v3825_v13  ;;  %v3783_v5 = vmul.f32 -1.442695, %v3827_v35  ;;  %v5652_v13 = vld [vmem:[#allocation5 + $0xa8] ss:$16 sps:$4 sm:$0xff]  }
 0x6d6   :  { %4196 = vpow2.f32 %v3781_v63  ;;  %7109 = vst [vmem:[#allocation49_spill] sm:$0xff] %v5652_v13 }
 0x6d7   :  { %4198 = vpow2.f32 %v3782_v4 }
 0x6d8   :  { %4200 = vpow2.f32 %v3783_v5 }
 0x6d9   :  { %4202 = vtanh.f32 %v3826_v27 }
 0x6e0   :  { %v4197_v60 = vpop.eup %4196 }
 0x6e1   :  { %v4199_v58 = vpop.eup %4198  ;;  %v2036_v44 = vadd.f32 1.0, %v4197_v60 }
 0x6e2   :  { %v2042_v18 = vadd.f32 1.0, %v4199_v58  ;;  %v4201_v1 = vpop.eup %4200  ;;  %v5640_v58 = vld [vmem:[#allocation5 + $0x88] ss:$16 sps:$4 sm:$0xff]  }
 0x6e3   :  { %4204 = vrcp.f32 %v2036_v44  ;;  %v4203_v2 = vpop.eup %4202  ;;  %v2049_v63 = vadd.f32 1.0, %v4201_v1  ;;  %7105 = vst [vmem:[#allocation45_spill] sm:$0xff] %v5640_v58  ;;  %v5655_v44 = vld [vmem:[#allocation5 + $0xc4] ss:$16 sps:$4 sm:$0xff]   ;;  %v5658_v1 = vld [vmem:[#allocation5 + $0xcc] ss:$16 sps:$4 sm:$0xff]  }
 0x6e4   :  { %4206 = vrcp.f32 %v2042_v18  ;;  %v5646_v18 = vld [vmem:[#allocation5 + $0xac] ss:$16 sps:$4 sm:$0xff]   ;;  %7110 = vst [vmem:[#allocation50_spill] sm:$0xff] %v5655_v44  ;;  %7111 = vst [vmem:[#allocation51_spill] sm:$0xff] %v5658_v1 }
 0x6e5   :  { %4208 = vrcp.f32 %v2049_v63  ;;  %7107 = vst [vmem:[#allocation47_spill] sm:$0xff] %v5646_v18  ;;  %v5673_v63 = vld [vmem:[#allocation5 + $0xe0] ss:$16 sps:$4 sm:$0xff]  }
 0x6e6   :  { %7116 = vst [vmem:[#allocation56_spill] sm:$0xff] %v5673_v63 }
 0x6ed   :  { %v4205_v3 = vpop.eup %4204 }
 0x6ee   :  { %v4207_v61 = vpop.eup %4206  ;;  %v2053_v33 = vmul.f32 %v4205_v3, %v4203_v2  ;;  %v5661_v2 = vld [vmem:[#allocation5 + $0xc0] ss:$16 sps:$4 sm:$0xff]   ;;  %v5664_v3 = vld [vmem:[#allocation5 + $0xc8] ss:$16 sps:$4 sm:$0xff]  }
 0x6ef   :  { %v2052_v4 = vmul.f32 %v4207_v61, %v5460_v10  ;;  %v4209_v35 = vpop.eup %4208  ;;  %v5637_v10 = vld [vmem:[#allocation5 + $0x80] ss:$16 sps:$4 sm:$0xff]   ;;  %7112 = vst [vmem:[#allocation52_spill] sm:$0xff] %v5661_v2  ;;  %7113 = vst [vmem:[#allocation53_spill] sm:$0xff] %v5664_v3  ;;  %v5667_v61 = vld [vmem:[#allocation5 + $0xe4] ss:$16 sps:$4 sm:$0xff]  }
 0x6f0   :  { %7104 = vst [vmem:[#allocation44_spill] sm:$0xff] %v5637_v10  ;;  %7114 = vst [vmem:[#allocation54_spill] sm:$0xff] %v5667_v61 }
 0x6f1   :  { %v5616_v34 = vadd.f32 %v2053_v33, %v2052_v4  ;;  %v5670_v33 = vld [vmem:[#allocation5 + $0xec] ss:$16 sps:$4 sm:$0xff]   ;;  %v5676_v4 = vld [vmem:[#allocation5 + $0xe8] ss:$16 sps:$4 sm:$0xff]  }
 0x6f2   :  { %7115 = vst [vmem:[#allocation55_spill] sm:$0xff] %v5670_v33  ;;  %7117 = vst [vmem:[#allocation57_spill] sm:$0xff] %v5676_v4 }
 0x6f3   :  { %4210 = vtanh.f32 %v5616_v34 }
 0x6fd   :  { %v4211_v60 = vpop.eup %4210 }
 0x6fe   :  { %v2056_v5 = vmul.f32 %v4211_v60, %v4209_v35  ;;  %v5679_v35 = vld [vmem:[#allocation7 + $0x4] ss:$16 sps:$4 sm:$0xff]   ;;  %v5682_v60 = vld [vmem:[#allocation7 + $0xc] ss:$16 sps:$4 sm:$0xff]  }
 0x6ff   :  { %7118 = vst [vmem:[#allocation58_spill] sm:$0xff] %v5679_v35  ;;  %7119 = vst [vmem:[#allocation59_spill] sm:$0xff] %v5682_v60 }
 0x700   :  { %v2057_v27 = vpack.c.bf16 %v2056_v5, %v2056_v5  ;;  %v5687_v5 = vld [vmem:[#allocation7] ss:$16 sps:$4 sm:$0xff]  }
 0x701   :  { %7120 = vst [vmem:[#allocation60_spill] sm:$0xff] %v5687_v5 }
 0x702   :  { %2091 = vmatmul.mubr.bf16.vlgmr.msra.gmra.mrb[40].mxu0 %v2057_v27  ;;  %2132 = vmatmul.mubr.bf16.vlgmr.msra.gmra.mrb[40].mxu1 %v2057_v27  ;;  %v5690_v27 = vld [vmem:[#allocation7 + $0x8] ss:$16 sps:$4 sm:$0xff]  }
 0x703   :  { %2145 = vmatpush1.bf16.msra.mxu0 %v5463_v38  ;;  %2186 = vmatpush1.bf16.msra.mxu1 %v5466_v12  ;;  %7121 = vst [vmem:[#allocation71_spill] sm:$0xff] %v5690_v27 }
 0x704   :  { %2146 = vmatprep.subr.bf16.mxu0 %v5469_v22  ;;  %2187 = vmatprep.subr.bf16.mxu1 %v5472_v17 }
 0x705   :  { %2176 = vmatprep.mubr.bf16.mxu0 %v6899_v32  ;;  %2217 = vmatprep.mubr.bf16.mxu1 %v6899_v32 }
 0x707   :  { %2147 = vmatpush1.bf16.msra.mxu0 %v5477_v7  ;;  %2188 = vmatpush1.bf16.msra.mxu1 %v5480_v30 }
 0x708   :  { %2148 = vmatprep.subr.bf16.mxu0 %v5483_v24  ;;  %2189 = vmatprep.subr.bf16.mxu1 %v5486_v31 }
 0x70b   :  { %2149 = vmatpush1.bf16.msra.mxu0 %v5489_v8  ;;  %2190 = vmatpush1.bf16.msra.mxu1 %v5492_v53 }
 0x70c   :  { %2150 = vmatprep.subr.bf16.mxu0 %v5495_v62  ;;  %2191 = vmatprep.subr.bf16.mxu1 %v5498_v9 }
 0x70f   :  { %2151 = vmatpush1.bf16.msra.mxu0 %v5501_v26  ;;  %2192 = vmatpush1.bf16.msra.mxu1 %v5504_v21 }
 0x710   :  { %2152 = vmatprep.subr.bf16.mxu0 %v5507_v23  ;;  %2193 = vmatprep.subr.bf16.mxu1 %v5510_v11 }
 0x713   :  { %2153 = vmatpush1.bf16.msra.mxu0 %v5637_v10  ;;  %2194 = vmatpush1.bf16.msra.mxu1 %v5640_v58 }
 0x714   :  { %2154 = vmatprep.subr.bf16.mxu0 %v5643_v16  ;;  %2195 = vmatprep.subr.bf16.mxu1 %v5646_v18 }
 0x717   :  { %2155 = vmatpush1.bf16.msra.mxu0 %v5649_v29  ;;  %2196 = vmatpush1.bf16.msra.mxu1 %v5652_v13 }
 0x718   :  { %2156 = vmatprep.subr.bf16.mxu0 %v5655_v44  ;;  %2197 = vmatprep.subr.bf16.mxu1 %v5658_v1  ;;  %v7153_v44 = vld [vmem:[#allocation82_spill] sm:$0xff] }
 0x71b   :  { %2157 = vmatpush1.bf16.msra.mxu0 %v5661_v2  ;;  %2198 = vmatpush1.bf16.msra.mxu1 %v5664_v3  ;;  %v7152_v2 = vld [vmem:[#allocation81_spill] sm:$0xff] }
 0x71c   :  { %2158 = vmatprep.subr.bf16.mxu0 %v5667_v61  ;;  %2199 = vmatprep.subr.bf16.mxu1 %v5670_v33  ;;  %v7151_v33 = vld [vmem:[#allocation80_spill] sm:$0xff] }
 0x71f   :  { %2159 = vmatpush1.bf16.msra.mxu0 %v5673_v63  ;;  %2200 = vmatpush1.bf16.msra.mxu1 %v5676_v4  ;;  %v5693_v4 = vld [vmem:[#allocation7 + $0x24] ss:$16 sps:$4 sm:$0xff]  }
 0x720   :  { %2259 = vmatprep.subr.bf16.mxu0 %v5679_v35  ;;  %2300 = vmatprep.subr.bf16.mxu1 %v5682_v60  ;;  %7122 = vst [vmem:[#allocation72_spill] sm:$0xff] %v5693_v4  ;;  %v5696_v35 = vld [vmem:[#allocation7 + $0x2c] ss:$16 sps:$4 sm:$0xff]   ;;  %v5716_v60 = vld [vmem:[#allocation7 + $0x48] ss:$16 sps:$4 sm:$0xff]   ;;  %v7150_v63 = vld [vmem:[#allocation79_spill] sm:$0xff] }
 0x721   :  { %7123 = vst [vmem:[#allocation73_spill] sm:$0xff] %v5696_v35  ;;  %7129 = vst [vmem:[#allocation65_spill] sm:$0xff] %v5716_v60 }
 0x722   :  { %2177 = vmatmul.mubr.bf16.vlgmr.msra.gmra.mrb[44].mxu0 %v5573_v14  ;;  %2218 = vmatmul.mubr.bf16.vlgmr.msra.gmra.mrb[44].mxu1 %v5573_v14  ;;  %v5701_v14 = vld [vmem:[#allocation7 + $0x20] ss:$16 sps:$4 sm:$0xff]  }
 0x723   :  { %2260 = vmatpush1.bf16.msra.mxu0 %v5687_v5  ;;  %2301 = vmatpush1.bf16.msra.mxu1 %v5690_v27  ;;  %7124 = vst [vmem:[#allocation74_spill] sm:$0xff] %v5701_v14  ;;  %v5704_v5 = vld [vmem:[#allocation7 + $0x28] ss:$16 sps:$4 sm:$0xff]   ;;  %v5707_v27 = vld [vmem:[#allocation7 + $0x44] ss:$16 sps:$4 sm:$0xff]  }
 0x724   :  { %2261 = vmatprep.subr.bf16.mxu0 %v5693_v4  ;;  %2302 = vmatprep.subr.bf16.mxu1 %v5696_v35  ;;  %7125 = vst [vmem:[#allocation61_spill] sm:$0xff] %v5704_v5  ;;  %7126 = vst [vmem:[#allocation62_spill] sm:$0xff] %v5707_v27  ;;  %v5710_v4 = vld [vmem:[#allocation7 + $0x4c] ss:$16 sps:$4 sm:$0xff]   ;;  %v5713_v35 = vld [vmem:[#allocation7 + $0x40] ss:$16 sps:$4 sm:$0xff]  }
 0x725   :  { %2291 = vmatprep.mubr.bf16.mxu0 %v6899_v32  ;;  %2332 = vmatprep.mubr.bf16.mxu1 %v6899_v32  ;;  %7127 = vst [vmem:[#allocation63_spill] sm:$0xff] %v5710_v4  ;;  %7128 = vst [vmem:[#allocation64_spill] sm:$0xff] %v5713_v35 }
 0x727   :  { %2262 = vmatpush1.bf16.msra.mxu0 %v5701_v14  ;;  %2303 = vmatpush1.bf16.msra.mxu1 %v5704_v5  ;;  %v5719_v14 = vld [vmem:[#allocation7 + $0x64] ss:$16 sps:$4 sm:$0xff]   ;;  %v5722_v5 = vld [vmem:[#allocation7 + $0x6c] ss:$16 sps:$4 sm:$0xff]  }
 0x728   :  { %2263 = vmatprep.subr.bf16.mxu0 %v5707_v27  ;;  %2304 = vmatprep.subr.bf16.mxu1 %v5710_v4  ;;  %7130 = vst [vmem:[#allocation66_spill] sm:$0xff] %v5719_v14  ;;  %7131 = vst [vmem:[#allocation67_spill] sm:$0xff] %v5722_v5  ;;  %v5725_v27 = vld [vmem:[#allocation7 + $0x60] ss:$16 sps:$4 sm:$0xff]   ;;  %v5728_v4 = vld [vmem:[#allocation7 + $0x68] ss:$16 sps:$4 sm:$0xff]  }
 0x729   :  { %7132 = vst [vmem:[#allocation68_spill] sm:$0xff] %v5725_v27  ;;  %7133 = vst [vmem:[#allocation69_spill] sm:$0xff] %v5728_v4 }
 0x72b   :  { %2264 = vmatpush1.bf16.msra.mxu0 %v5713_v35  ;;  %2305 = vmatpush1.bf16.msra.mxu1 %v5716_v60  ;;  %v5731_v35 = vld [vmem:[#allocation7 + $0x84] ss:$16 sps:$4 sm:$0xff]   ;;  %v5734_v60 = vld [vmem:[#allocation7 + $0x8c] ss:$16 sps:$4 sm:$0xff]  }
 0x72c   :  { %2265 = vmatprep.subr.bf16.mxu0 %v5719_v14  ;;  %2306 = vmatprep.subr.bf16.mxu1 %v5722_v5  ;;  %7134 = vst [vmem:[#allocation70_spill] sm:$0xff] %v5731_v35  ;;  %7135 = vst [vmem:[#allocation13_spill] sm:$0xff] %v5734_v60  ;;  %v5737_v14 = vld [vmem:[#allocation7 + $0x80] ss:$16 sps:$4 sm:$0xff]   ;;  %v5740_v5 = vld [vmem:[#allocation7 + $0x88] ss:$16 sps:$4 sm:$0xff]  }
 0x72d   :  { %7136 = vst [vmem:[#allocation14_spill] sm:$0xff] %v5737_v14  ;;  %7137 = vst [vmem:[#allocation75_spill] sm:$0xff] %v5740_v5 }
 0x72f   :  { %2266 = vmatpush1.bf16.msra.mxu0 %v5725_v27  ;;  %2307 = vmatpush1.bf16.msra.mxu1 %v5728_v4  ;;  %v5743_v27 = vld [vmem:[#allocation7 + $0xa4] ss:$16 sps:$4 sm:$0xff]   ;;  %v5746_v4 = vld [vmem:[#allocation7 + $0xac] ss:$16 sps:$4 sm:$0xff]  }
 0x730   :  { %2267 = vmatprep.subr.bf16.mxu0 %v5731_v35  ;;  %2308 = vmatprep.subr.bf16.mxu1 %v5734_v60  ;;  %7138 = vst [vmem:[#allocation76_spill] sm:$0xff] %v5743_v27  ;;  %7139 = vst [vmem:[#allocation77_spill] sm:$0xff] %v5746_v4  ;;  %v5749_v35 = vld [vmem:[#allocation7 + $0xa0] ss:$16 sps:$4 sm:$0xff]   ;;  %v5752_v60 = vld [vmem:[#allocation7 + $0xa8] ss:$16 sps:$4 sm:$0xff]  }
 0x731   :  { %7140 = vst [vmem:[#allocation78_spill] sm:$0xff] %v5749_v35  ;;  %7141 = vst [vmem:[#allocation15_spill] sm:$0xff] %v5752_v60 }
 0x733   :  { %2268 = vmatpush1.bf16.msra.mxu0 %v5737_v14  ;;  %2309 = vmatpush1.bf16.msra.mxu1 %v5740_v5  ;;  %v5755_v14 = vld [vmem:[#allocation7 + $0xc4] ss:$16 sps:$4 sm:$0xff]   ;;  %v5758_v5 = vld [vmem:[#allocation7 + $0xcc] ss:$16 sps:$4 sm:$0xff]  }
 0x734   :  { %2269 = vmatprep.subr.bf16.mxu0 %v5743_v27  ;;  %2310 = vmatprep.subr.bf16.mxu1 %v5746_v4  ;;  %7142 = vst [vmem:[#allocation16_spill] sm:$0xff] %v5755_v14  ;;  %7143 = vst [vmem:[#allocation17_spill] sm:$0xff] %v5758_v5  ;;  %v5761_v27 = vld [vmem:[#allocation7 + $0xc0] ss:$16 sps:$4 sm:$0xff]   ;;  %v5764_v4 = vld [vmem:[#allocation7 + $0xc8] ss:$16 sps:$4 sm:$0xff]  }
 0x735   :  { %7144 = vst [vmem:[#allocation18_spill] sm:$0xff] %v5761_v27  ;;  %7145 = vst [vmem:[#allocation19_spill] sm:$0xff] %v5764_v4 }
 0x737   :  { %2270 = vmatpush1.bf16.msra.mxu0 %v5749_v35  ;;  %2311 = vmatpush1.bf16.msra.mxu1 %v5752_v60  ;;  %v5767_v35 = vld [vmem:[#allocation7 + $0xe4] ss:$16 sps:$4 sm:$0xff]   ;;  %v5770_v60 = vld [vmem:[#allocation7 + $0xec] ss:$16 sps:$4 sm:$0xff]  }
 0x738   :  { %2271 = vmatprep.subr.bf16.mxu0 %v5755_v14  ;;  %2312 = vmatprep.subr.bf16.mxu1 %v5758_v5  ;;  %7146 = vst [vmem:[#allocation20_spill] sm:$0xff] %v5767_v35  ;;  %7147 = vst [vmem:[#allocation21_spill] sm:$0xff] %v5770_v60  ;;  %v5773_v14 = vld [vmem:[#allocation7 + $0xe0] ss:$16 sps:$4 sm:$0xff]   ;;  %v5776_v5 = vld [vmem:[#allocation7 + $0xe8] ss:$16 sps:$4 sm:$0xff]  }
 0x739   :  { %7148 = vst [vmem:[#allocation22_spill] sm:$0xff] %v5773_v14  ;;  %7149 = vst [vmem:[#allocation23_spill] sm:$0xff] %v5776_v5 }
 0x73b   :  { %2272 = vmatpush1.bf16.msra.mxu0 %v5761_v27  ;;  %2313 = vmatpush1.bf16.msra.mxu1 %v5764_v4 }
 0x73c   :  { %2273 = vmatprep.subr.bf16.mxu0 %v5767_v35  ;;  %2314 = vmatprep.subr.bf16.mxu1 %v5770_v60 }
 0x73f   :  { %2274 = vmatpush1.bf16.msra.mxu0 %v5773_v14  ;;  %2315 = vmatpush1.bf16.msra.mxu1 %v5776_v5 }
 0x740   :  { %2370 = vmatprep.subr.bf16.mxu0 %v7068_v37  ;;  %2411 = vmatprep.subr.bf16.mxu1 %v7069_v39 }
 0x7f5   :  { %v2178_v4 = vpop.f32.mrb[44].mxu0  ;;  %v2219_v27 = vpop.f32.mrb[44].mxu1 }
 0x7f6   :  { %v2226_v35 = vadd.f32 %v2178_v4, %v7150_v63  ;;  %v2228_v61 = vadd.f32 %v2219_v27, %v7151_v33  ;;  %v2180_v3 = vpop.f32.mrb[45].mxu0  ;;  %v2221_v60 = vpop.f32.mrb[45].mxu1 }
 0x7f7   :  { %v2227_v1 = vadd.f32 %v2180_v3, %v7152_v2  ;;  %v2229_v14 = vadd.f32 %v2221_v60, %v7153_v44  ;;  %v2182_v13 = vpop.f32.mrb[46].mxu0  ;;  %v2223_v29 = vpop.f32.mrb[46].mxu1 }
 0x7f8   :  { %v3784_v18 = vmul.f32 -1.442695, %v2226_v35  ;;  %v2183_v5 = vpop.f32.mrb[47].mxu0  ;;  %v2224_v16 = vpop.f32.mrb[47].mxu1 }
 0x7f9   :  { %v3785_v37 = vmul.f32 -1.442695, %v2227_v1  ;;  %v3786_v39 = vmul.f32 -1.442695, %v2229_v14 }
 0x7fa   :  { %4212 = vpow2.f32 %v3784_v18 }
 0x7fb   :  { %4214 = vpow2.f32 %v3785_v37 }
 0x7fc   :  { %4216 = vpow2.f32 %v3786_v39 }
 0x7fd   :  { %4218 = vtanh.f32 %v2228_v61 }
 0x804   :  { %v4213_v58 = vpop.eup %4212 }
 0x805   :  { %v4215_v10 = vpop.eup %4214  ;;  %v2233_v63 = vadd.f32 1.0, %v4213_v58 }
 0x806   :  { %v2239_v33 = vadd.f32 1.0, %v4215_v10  ;;  %v4217_v2 = vpop.eup %4216 }
 0x807   :  { %4220 = vrcp.f32 %v2233_v63  ;;  %v4219_v3 = vpop.eup %4218  ;;  %v2246_v4 = vadd.f32 1.0, %v4217_v2 }
 0x808   :  { %4222 = vrcp.f32 %v2239_v33 }
 0x809   :  { %4224 = vrcp.f32 %v2246_v4 }
 0x811   :  { %v4221_v44 = vpop.eup %4220 }
 0x812   :  { %v4223_v13 = vpop.eup %4222  ;;  %v2250_v29 = vmul.f32 %v4221_v44, %v4219_v3 }
 0x813   :  { %v2249_v16 = vmul.f32 %v4223_v13, %v5570_v0  ;;  %v4225_v18 = vpop.eup %4224  ;;  %v7157_v0 = vld [vmem:[#allocation36_spill] sm:$0xff] }
 0x815   :  { %v5786_v1 = vadd.f32 %v2250_v29, %v2249_v16 }
 0x817   :  { %4226 = vtanh.f32 %v5786_v1 }
 0x821   :  { %v4227_v58 = vpop.eup %4226 }
 0x822   :  { %v2253_v35 = vmul.f32 %v4227_v58, %v4225_v18 }
 0x824   :  { %v5789_v61 = vpack.c.bf16 %v2253_v35, %v2253_v35 }
 0x826   :  { %2292 = vmatmul.mubr.bf16.vlgmr.msra.gmra.mrb[40].mxu0 %v5789_v61  ;;  %2333 = vmatmul.mubr.bf16.vlgmr.msra.gmra.mrb[40].mxu1 %v5789_v61 }
 0x827   :  { %2371 = vmatpush1.bf16.msra.mxu0 %v5357_v6  ;;  %2412 = vmatpush1.bf16.msra.mxu1 %v5360_v25  ;;  %v7154_v6 = vld [vmem:[#allocation33_spill] sm:$0xff]  ;;  %v7155_v25 = vld [vmem:[#allocation34_spill] sm:$0xff] }
 0x828   :  { %2372 = vmatprep.subr.bf16.mxu0 %v5363_v20  ;;  %2413 = vmatprep.subr.bf16.mxu1 %v7074_v19  ;;  %v7156_v20 = vld [vmem:[#allocation35_spill] sm:$0xff]  ;;  %v7158_v19 = vld [vmem:[#allocation37_spill] sm:$0xff] }
 0x829   :  { %2402 = vmatprep.mubr.bf16.mxu0 %v6899_v32  ;;  %2443 = vmatprep.mubr.bf16.mxu1 %v6899_v32 }
 0x82b   :  { %2373 = vmatpush1.bf16.msra.mxu0 %v7075_v15  ;;  %2414 = vmatpush1.bf16.msra.mxu1 %v7076_v36  ;;  %v7159_v15 = vld [vmem:[#allocation38_spill] sm:$0xff]  ;;  %v7160_v36 = vld [vmem:[#allocation39_spill] sm:$0xff] }
 0x82c   :  { %2374 = vmatprep.subr.bf16.mxu0 %v7077_v41  ;;  %2415 = vmatprep.subr.bf16.mxu1 %v7078_v42  ;;  %v7161_v41 = vld [vmem:[#allocation40_spill] sm:$0xff]  ;;  %v7162_v42 = vld [vmem:[#allocation41_spill] sm:$0xff] }
 0x82f   :  { %2375 = vmatpush1.bf16.msra.mxu0 %v7079_v43  ;;  %2416 = vmatpush1.bf16.msra.mxu1 %v7080_v45  ;;  %v7163_v43 = vld [vmem:[#allocation42_spill] sm:$0xff]  ;;  %v7164_v45 = vld [vmem:[#allocation43_spill] sm:$0xff] }
 0x830   :  { %2376 = vmatprep.subr.bf16.mxu0 %v7081_v46  ;;  %2417 = vmatprep.subr.bf16.mxu1 %v7082_v47 }
 0x833   :  { %2377 = vmatpush1.bf16.msra.mxu0 %v7083_v48  ;;  %2418 = vmatpush1.bf16.msra.mxu1 %v7084_v49  ;;  %v7165_v48 = vld [vmem:[#allocation99_spill] sm:$0xff] }
 0x834   :  { %2378 = vmatprep.subr.bf16.mxu0 %v7085_v50  ;;  %2419 = vmatprep.subr.bf16.mxu1 %v7086_v51 }
 0x837   :  { %2379 = vmatpush1.bf16.msra.mxu0 %v7087_v52  ;;  %2420 = vmatpush1.bf16.msra.mxu1 %v7088_v54 }
 0x838   :  { %2380 = vmatprep.subr.bf16.mxu0 %v7089_v28  ;;  %2421 = vmatprep.subr.bf16.mxu1 %v7090_v55 }
 0x83b   :  { %2381 = vmatpush1.bf16.msra.mxu0 %v7091_v57  ;;  %2422 = vmatpush1.bf16.msra.mxu1 %v7154_v6 }
 0x83c   :  { %2382 = vmatprep.subr.bf16.mxu0 %v7155_v25  ;;  %2423 = vmatprep.subr.bf16.mxu1 %v7156_v20  ;;  %v7183_v20 = vld [vmem:[#allocation71_spill] sm:$0xff] }
 0x83f   :  { %2383 = vmatpush1.bf16.msra.mxu0 %v7157_v0  ;;  %2424 = vmatpush1.bf16.msra.mxu1 %v7158_v19  ;;  %v7184_v0 = vld [vmem:[#allocation72_spill] sm:$0xff]  ;;  %v7185_v19 = vld [vmem:[#allocation73_spill] sm:$0xff] }
 0x840   :  { %2384 = vmatprep.subr.bf16.mxu0 %v7159_v15  ;;  %2425 = vmatprep.subr.bf16.mxu1 %v7160_v36  ;;  %v7186_v15 = vld [vmem:[#allocation74_spill] sm:$0xff]  ;;  %v7187_v36 = vld [vmem:[#allocation61_spill] sm:$0xff] }
 0x843   :  { %2385 = vmatpush1.bf16.msra.mxu0 %v7161_v41  ;;  %2426 = vmatpush1.bf16.msra.mxu1 %v7162_v42  ;;  %v7188_v41 = vld [vmem:[#allocation62_spill] sm:$0xff]  ;;  %v7189_v42 = vld [vmem:[#allocation63_spill] sm:$0xff] }
 0x844   :  { %2456 = vmatprep.subr.bf16.mxu0 %v7163_v43  ;;  %2497 = vmatprep.subr.bf16.mxu1 %v7164_v45  ;;  %v7191_v43 = vld [vmem:[#allocation65_spill] sm:$0xff]  ;;  %v7192_v45 = vld [vmem:[#allocation66_spill] sm:$0xff] }
 0x8f9   :  { %v2293_v46 = vpop.f32.mrb[40].mxu0  ;;  %v2334_v47 = vpop.f32.mrb[40].mxu1 }
 0x8fa   :  { %v3828_v49 = vadd.f32 %v2293_v46, %v7165_v48  ;;  %v2295_v50 = vpop.f32.mrb[41].mxu0  ;;  %v2336_v51 = vpop.f32.mrb[41].mxu1  ;;  %v3830_v14 = vadd.f32 %v2334_v47, %v5265_v59  ;;  %v7193_v46 = vld [vmem:[#allocation67_spill] sm:$0xff]  ;;  %v7194_v47 = vld [vmem:[#allocation68_spill] sm:$0xff] }
 0x8fb   :  { %v3829_v52 = vadd.f32 %v2295_v50, %v5254_v40  ;;  %v2297_v54 = vpop.f32.mrb[42].mxu0  ;;  %v2338_v28 = vpop.f32.mrb[42].mxu1  ;;  %v3831_v5 = vadd.f32 %v2336_v51, %v5260_v56  ;;  %v7196_v50 = vld [vmem:[#allocation70_spill] sm:$0xff]  ;;  %v7197_v51 = vld [vmem:[#allocation13_spill] sm:$0xff] }
 0x8fc   :  { %v3787_v55 = vmul.f32 -1.442695, %v3828_v49  ;;  %v2298_v57 = vpop.f32.mrb[43].mxu0  ;;  %v2339_v10 = vpop.f32.mrb[43].mxu1  ;;  %v7195_v49 = vld [vmem:[#allocation69_spill] sm:$0xff]  ;;  %v7199_v54 = vld [vmem:[#allocation75_spill] sm:$0xff] }
 0x8fd   :  { %v3788_v60 = vmul.f32 -1.442695, %v3829_v52  ;;  %v3789_v27 = vmul.f32 -1.442695, %v3831_v5  ;;  %v7198_v52 = vld [vmem:[#allocation14_spill] sm:$0xff]  ;;  %v7200_v28 = vld [vmem:[#allocation76_spill] sm:$0xff] }
 0x8fe   :  { %4228 = vpow2.f32 %v3787_v55  ;;  %v7201_v55 = vld [vmem:[#allocation77_spill] sm:$0xff]  ;;  %v7202_v57 = vld [vmem:[#allocation78_spill] sm:$0xff]  ;;  %v7203_v10 = vld [vmem:[#allocation15_spill] sm:$0xff] }
 0x8ff   :  { %4230 = vpow2.f32 %v3788_v60  ;;  %v7204_v60 = vld [vmem:[#allocation16_spill] sm:$0xff]  ;;  %v7205_v5 = vld [vmem:[#allocation17_spill] sm:$0xff] }
 0x900   :  { %4232 = vpow2.f32 %v3789_v27  ;;  %v7206_v27 = vld [vmem:[#allocation18_spill] sm:$0xff] }
 0x901   :  { %4234 = vtanh.f32 %v3830_v14  ;;  %v7207_v14 = vld [vmem:[#allocation19_spill] sm:$0xff] }
 0x908   :  { %v4229_v37 = vpop.eup %4228 }
 0x909   :  { %v4231_v39 = vpop.eup %4230  ;;  %v2348_v63 = vadd.f32 1.0, %v4229_v37  ;;  %v7208_v37 = vld [vmem:[#allocation20_spill] sm:$0xff] }
 0x90a   :  { %v2354_v33 = vadd.f32 1.0, %v4231_v39  ;;  %v4233_v2 = vpop.eup %4232  ;;  %v7209_v39 = vld [vmem:[#allocation21_spill] sm:$0xff] }
 0x90b   :  { %4236 = vrcp.f32 %v2348_v63  ;;  %v4235_v3 = vpop.eup %4234  ;;  %v2361_v4 = vadd.f32 1.0, %v4233_v2  ;;  %v7210_v63 = vld [vmem:[#allocation22_spill] sm:$0xff]  ;;  %v5903_v2 = vld [vmem:[#allocation8 + $0x4] ss:$16 sps:$4 sm:$0xff]  }
 0x90c   :  { %4238 = vrcp.f32 %v2354_v33  ;;  %v7211_v33 = vld [vmem:[#allocation23_spill] sm:$0xff]  ;;  %7212 = vst [vmem:[#allocation24_spill] sm:$0xff] %v5903_v2 }
 0x90d   :  { %4240 = vrcp.f32 %v2361_v4 }
 0x915   :  { %v4237_v44 = vpop.eup %4236 }
 0x916   :  { %v4239_v13 = vpop.eup %4238  ;;  %v2365_v29 = vmul.f32 %v4237_v44, %v4235_v3  ;;  %v5906_v3 = vld [vmem:[#allocation8 + $0xc] ss:$16 sps:$4 sm:$0xff]  }
 0x917   :  { %v2364_v16 = vmul.f32 %v4239_v13, %v5616_v34  ;;  %v4241_v58 = vpop.eup %4240  ;;  %v7182_v34 = vld [vmem:[#allocation60_spill] sm:$0xff]  ;;  %7213 = vst [vmem:[#allocation25_spill] sm:$0xff] %v5906_v3 }
 0x919   :  { %v5832_v18 = vadd.f32 %v2365_v29, %v2364_v16  ;;  %v7214_v29 = vld [vmem:[#allocation83_spill] sm:$0xff]  ;;  %v7215_v16 = vld [vmem:[#allocation84_spill] sm:$0xff] }
 0x91b   :  { %4242 = vtanh.f32 %v5832_v18 }
 0x925   :  { %v4243_v35 = vpop.eup %4242 }
 0x926   :  { %v2368_v6 = vmul.f32 %v4243_v35, %v4241_v58 }
 0x928   :  { %v2369_v25 = vpack.c.bf16 %v2368_v6, %v2368_v6 }
 0x92a   :  { %2403 = vmatmul.mubr.bf16.vlgmr.msra.gmra.mrb[48].mxu0 %v2369_v25  ;;  %2444 = vmatmul.mubr.bf16.vlgmr.msra.gmra.mrb[48].mxu1 %v2369_v25  ;;  %v7216_v25 = vld [vmem:[#allocation85_spill] sm:$0xff] }
 0x92b   :  { %2457 = vmatpush1.bf16.msra.mxu0 %v5463_v38  ;;  %2498 = vmatpush1.bf16.msra.mxu1 %v5466_v12  ;;  %v7166_v38 = vld [vmem:[#allocation44_spill] sm:$0xff]  ;;  %v7167_v12 = vld [vmem:[#allocation45_spill] sm:$0xff] }
 0x92c   :  { %2458 = vmatprep.subr.bf16.mxu0 %v5469_v22  ;;  %2499 = vmatprep.subr.bf16.mxu1 %v5472_v17  ;;  %v7168_v22 = vld [vmem:[#allocation46_spill] sm:$0xff]  ;;  %v7169_v17 = vld [vmem:[#allocation47_spill] sm:$0xff] }
 0x92d   :  { %2488 = vmatprep.mubr.bf16.mxu0 %v6899_v32  ;;  %2529 = vmatprep.mubr.bf16.mxu1 %v6899_v32 }
 0x92f   :  { %2459 = vmatpush1.bf16.msra.mxu0 %v5477_v7  ;;  %2500 = vmatpush1.bf16.msra.mxu1 %v5480_v30  ;;  %v7170_v7 = vld [vmem:[#allocation48_spill] sm:$0xff]  ;;  %v7171_v30 = vld [vmem:[#allocation49_spill] sm:$0xff] }
 0x930   :  { %2460 = vmatprep.subr.bf16.mxu0 %v5483_v24  ;;  %2501 = vmatprep.subr.bf16.mxu1 %v5486_v31  ;;  %v7172_v24 = vld [vmem:[#allocation50_spill] sm:$0xff]  ;;  %v7173_v31 = vld [vmem:[#allocation51_spill] sm:$0xff] }
 0x933   :  { %2461 = vmatpush1.bf16.msra.mxu0 %v5489_v8  ;;  %2502 = vmatpush1.bf16.msra.mxu1 %v5492_v53  ;;  %v7174_v8 = vld [vmem:[#allocation52_spill] sm:$0xff]  ;;  %v7175_v53 = vld [vmem:[#allocation53_spill] sm:$0xff] }
 0x934   :  { %2462 = vmatprep.subr.bf16.mxu0 %v5495_v62  ;;  %2503 = vmatprep.subr.bf16.mxu1 %v5498_v9  ;;  %v7176_v62 = vld [vmem:[#allocation54_spill] sm:$0xff]  ;;  %v7177_v9 = vld [vmem:[#allocation55_spill] sm:$0xff] }
 0x937   :  { %2463 = vmatpush1.bf16.msra.mxu0 %v5501_v26  ;;  %2504 = vmatpush1.bf16.msra.mxu1 %v5504_v21  ;;  %v7178_v26 = vld [vmem:[#allocation56_spill] sm:$0xff]  ;;  %v7179_v21 = vld [vmem:[#allocation57_spill] sm:$0xff] }
 0x938   :  { %2464 = vmatprep.subr.bf16.mxu0 %v5507_v23  ;;  %2505 = vmatprep.subr.bf16.mxu1 %v5510_v11  ;;  %v7180_v23 = vld [vmem:[#allocation58_spill] sm:$0xff]  ;;  %v7181_v11 = vld [vmem:[#allocation59_spill] sm:$0xff] }
 0x93b   :  { %2465 = vmatpush1.bf16.msra.mxu0 %v7166_v38  ;;  %2506 = vmatpush1.bf16.msra.mxu1 %v7167_v12 }
 0x93c   :  { %2466 = vmatprep.subr.bf16.mxu0 %v7168_v22  ;;  %2507 = vmatprep.subr.bf16.mxu1 %v7169_v17 }
 0x93f   :  { %2467 = vmatpush1.bf16.msra.mxu0 %v7170_v7  ;;  %2508 = vmatpush1.bf16.msra.mxu1 %v7171_v30 }
 0x940   :  { %2468 = vmatprep.subr.bf16.mxu0 %v7172_v24  ;;  %2509 = vmatprep.subr.bf16.mxu1 %v7173_v31 }
 0x943   :  { %2469 = vmatpush1.bf16.msra.mxu0 %v7174_v8  ;;  %2510 = vmatpush1.bf16.msra.mxu1 %v7175_v53 }
 0x944   :  { %2470 = vmatprep.subr.bf16.mxu0 %v7176_v62  ;;  %2511 = vmatprep.subr.bf16.mxu1 %v7177_v9 }
 0x947   :  { %2471 = vmatpush1.bf16.msra.mxu0 %v7178_v26  ;;  %2512 = vmatpush1.bf16.msra.mxu1 %v7179_v21 }
 0x948   :  { %2571 = vmatprep.subr.bf16.mxu0 %v7180_v23  ;;  %2612 = vmatprep.subr.bf16.mxu1 %v7181_v11 }
 0x94a   :  { %2489 = vmatmul.mubr.bf16.vlgmr.msra.gmra.mrb[52].mxu0 %v5789_v61  ;;  %2530 = vmatmul.mubr.bf16.vlgmr.msra.gmra.mrb[52].mxu1 %v5789_v61  ;;  %v7190_v61 = vld [vmem:[#allocation64_spill] sm:$0xff] }
 0x94b   :  { %2572 = vmatpush1.bf16.msra.mxu0 %v7182_v34  ;;  %2613 = vmatpush1.bf16.msra.mxu1 %v7183_v20 }
 0x94c   :  { %2573 = vmatprep.subr.bf16.mxu0 %v7184_v0  ;;  %2614 = vmatprep.subr.bf16.mxu1 %v7185_v19 }
 0x94d   :  { %2603 = vmatprep.mubr.bf16.mxu0 %v6899_v32  ;;  %2644 = vmatprep.mubr.bf16.mxu1 %v6899_v32 }
 0x94f   :  { %2574 = vmatpush1.bf16.msra.mxu0 %v7186_v15  ;;  %2615 = vmatpush1.bf16.msra.mxu1 %v7187_v36 }
 0x950   :  { %2575 = vmatprep.subr.bf16.mxu0 %v7188_v41  ;;  %2616 = vmatprep.subr.bf16.mxu1 %v7189_v42 }
 0x953   :  { %2576 = vmatpush1.bf16.msra.mxu0 %v7190_v61  ;;  %2617 = vmatpush1.bf16.msra.mxu1 %v7191_v43 }
 0x954   :  { %2577 = vmatprep.subr.bf16.mxu0 %v7192_v45  ;;  %2618 = vmatprep.subr.bf16.mxu1 %v7193_v46 }
 0x957   :  { %2578 = vmatpush1.bf16.msra.mxu0 %v7194_v47  ;;  %2619 = vmatpush1.bf16.msra.mxu1 %v7195_v49 }
 0x958   :  { %2579 = vmatprep.subr.bf16.mxu0 %v7196_v50  ;;  %2620 = vmatprep.subr.bf16.mxu1 %v7197_v51 }
 0x95b   :  { %2580 = vmatpush1.bf16.msra.mxu0 %v7198_v52  ;;  %2621 = vmatpush1.bf16.msra.mxu1 %v7199_v54 }
 0x95c   :  { %2581 = vmatprep.subr.bf16.mxu0 %v7200_v28  ;;  %2622 = vmatprep.subr.bf16.mxu1 %v7201_v55 }
 0x95f   :  { %2582 = vmatpush1.bf16.msra.mxu0 %v7202_v57  ;;  %2623 = vmatpush1.bf16.msra.mxu1 %v7203_v10 }
 0x960   :  { %2583 = vmatprep.subr.bf16.mxu0 %v7204_v60  ;;  %2624 = vmatprep.subr.bf16.mxu1 %v7205_v5 }
 0x963   :  { %2584 = vmatpush1.bf16.msra.mxu0 %v7206_v27  ;;  %2625 = vmatpush1.bf16.msra.mxu1 %v7207_v14 }
 0x964   :  { %2585 = vmatprep.subr.bf16.mxu0 %v7208_v37  ;;  %2626 = vmatprep.subr.bf16.mxu1 %v7209_v39  ;;  %v7217_v39 = vld [vmem:[#allocation86_spill] sm:$0xff] }
 0x967   :  { %2586 = vmatpush1.bf16.msra.mxu0 %v7210_v63  ;;  %2627 = vmatpush1.bf16.msra.mxu1 %v7211_v33 }
 0x968   :  { %2682 = vmatprep.subr.bf16.mxu0 %v5903_v2  ;;  %2723 = vmatprep.subr.bf16.mxu1 %v5906_v3 }
 0xa1d   :  { %v2490_v44 = vpop.f32.mrb[52].mxu0  ;;  %v2531_v13 = vpop.f32.mrb[52].mxu1 }
 0xa1e   :  { %v2538_v4 = vadd.f32 %v2490_v44, %v7214_v29  ;;  %v2540_v58 = vadd.f32 %v2531_v13, %v7215_v16  ;;  %v2492_v35 = vpop.f32.mrb[53].mxu0  ;;  %v2533_v6 = vpop.f32.mrb[53].mxu1 }
 0xa1f   :  { %v2539_v63 = vadd.f32 %v2492_v35, %v7216_v25  ;;  %v2541_v33 = vadd.f32 %v2533_v6, %v7217_v39  ;;  %v2494_v37 = vpop.f32.mrb[54].mxu0  ;;  %v2535_v14 = vpop.f32.mrb[54].mxu1  ;;  %v5938_v35 = vld [vmem:[#allocation8 + $0x28] ss:$16 sps:$4 sm:$0xff]   ;;  %v5941_v6 = vld [vmem:[#allocation8 + $0x44] ss:$16 sps:$4 sm:$0xff]  }
 0xa20   :  { %v3790_v27 = vmul.f32 -1.442695, %v2538_v4  ;;  %v2495_v2 = vpop.f32.mrb[55].mxu0  ;;  %v2536_v5 = vpop.f32.mrb[55].mxu1  ;;  %7220 = vst [vmem:[#allocation28_spill] sm:$0xff] %v5938_v35  ;;  %7221 = vst [vmem:[#allocation29_spill] sm:$0xff] %v5941_v6 }
 0xa21   :  { %v3791_v60 = vmul.f32 -1.442695, %v2539_v63  ;;  %v3792_v3 = vmul.f32 -1.442695, %v2541_v33  ;;  %v5924_v2 = vld [vmem:[#allocation8 + $0x8] ss:$16 sps:$4 sm:$0xff]  }
 0xa22   :  { %4244 = vpow2.f32 %v3790_v27  ;;  %v5944_v25 = vld [vmem:[#allocation8 + $0x4c] ss:$16 sps:$4 sm:$0xff]  }
 0xa23   :  { %4246 = vpow2.f32 %v3791_v60  ;;  %7222 = vst [vmem:[#allocation30_spill] sm:$0xff] %v5944_v25 }
 0xa24   :  { %4248 = vpow2.f32 %v3792_v3  ;;  %v5930_v3 = vld [vmem:[#allocation8 + $0x2c] ss:$16 sps:$4 sm:$0xff]  }
 0xa25   :  { %4250 = vtanh.f32 %v2540_v58  ;;  %7218 = vst [vmem:[#allocation26_spill] sm:$0xff] %v5930_v3  ;;  %v5935_v58 = vld [vmem:[#allocation8 + $0x20] ss:$16 sps:$4 sm:$0xff]  }
 0xa26   :  { %7219 = vst [vmem:[#allocation27_spill] sm:$0xff] %v5935_v58 }
 0xa2c   :  { %v4245_v10 = vpop.eup %4244 }
 0xa2d   :  { %v4247_v57 = vpop.eup %4246  ;;  %v2545_v44 = vadd.f32 1.0, %v4245_v10 }
 0xa2e   :  { %v2551_v13 = vadd.f32 1.0, %v4247_v57  ;;  %v4249_v29 = vpop.eup %4248  ;;  %v5921_v57 = vld [vmem:[#allocation8] ss:$16 sps:$4 sm:$0xff]  }
 0xa2f   :  { %4252 = vrcp.f32 %v2545_v44  ;;  %v4251_v16 = vpop.eup %4250  ;;  %v2558_v4 = vadd.f32 1.0, %v4249_v29  ;;  %v5947_v44 = vld [vmem:[#allocation8 + $0x40] ss:$16 sps:$4 sm:$0xff]   ;;  %v5953_v29 = vld [vmem:[#allocation8 + $0x64] ss:$16 sps:$4 sm:$0xff]  }
 0xa30   :  { %4254 = vrcp.f32 %v2551_v13  ;;  %7223 = vst [vmem:[#allocation31_spill] sm:$0xff] %v5947_v44  ;;  %v5950_v13 = vld [vmem:[#allocation8 + $0x48] ss:$16 sps:$4 sm:$0xff]   ;;  %7225 = vst [vmem:[#allocation79_spill] sm:$0xff] %v5953_v29 }
 0xa31   :  { %4256 = vrcp.f32 %v2558_v4  ;;  %7224 = vst [vmem:[#allocation32_spill] sm:$0xff] %v5950_v13  ;;  %v5968_v4 = vld [vmem:[#allocation8 + $0x8c] ss:$16 sps:$4 sm:$0xff]  }
 0xa32   :  { %7230 = vst [vmem:[#allocation34_spill] sm:$0xff] %v5968_v4 }
 0xa39   :  { %v4253_v39 = vpop.eup %4252 }
 0xa3a   :  { %v4255_v37 = vpop.eup %4254  ;;  %v2562_v14 = vmul.f32 %v4253_v39, %v4251_v16  ;;  %v5956_v16 = vld [vmem:[#allocation8 + $0x6c] ss:$16 sps:$4 sm:$0xff]   ;;  %v5959_v39 = vld [vmem:[#allocation8 + $0x60] ss:$16 sps:$4 sm:$0xff]  }
 0xa3b   :  { %v2561_v5 = vmul.f32 %v4255_v37, %v5786_v1  ;;  %v4257_v60 = vpop.eup %4256  ;;  %v5927_v1 = vld [vmem:[#allocation8 + $0x24] ss:$16 sps:$4 sm:$0xff]   ;;  %7226 = vst [vmem:[#allocation80_spill] sm:$0xff] %v5956_v16  ;;  %7227 = vst [vmem:[#allocation81_spill] sm:$0xff] %v5959_v39  ;;  %v5962_v37 = vld [vmem:[#allocation8 + $0x68] ss:$16 sps:$4 sm:$0xff]  }
 0xa3c   :  { %7228 = vst [vmem:[#allocation82_spill] sm:$0xff] %v5962_v37 }
 0xa3d   :  { %v5914_v63 = vadd.f32 %v2562_v14, %v2561_v5  ;;  %v5965_v14 = vld [vmem:[#allocation8 + $0x84] ss:$16 sps:$4 sm:$0xff]   ;;  %v5971_v5 = vld [vmem:[#allocation8 + $0x80] ss:$16 sps:$4 sm:$0xff]  }
 0xa3e   :  { %7229 = vst [vmem:[#allocation33_spill] sm:$0xff] %v5965_v14  ;;  %7231 = vst [vmem:[#allocation35_spill] sm:$0xff] %v5971_v5 }
 0xa3f   :  { %4258 = vtanh.f32 %v5914_v63 }
 0xa49   :  { %v4259_v10 = vpop.eup %4258 }
 0xa4a   :  { %v2565_v27 = vmul.f32 %v4259_v10, %v4257_v60  ;;  %v5974_v60 = vld [vmem:[#allocation8 + $0x88] ss:$16 sps:$4 sm:$0xff]   ;;  %v5977_v10 = vld [vmem:[#allocation8 + $0xa4] ss:$16 sps:$4 sm:$0xff]  }
 0xa4b   :  { %7232 = vst [vmem:[#allocation36_spill] sm:$0xff] %v5974_v60  ;;  %7233 = vst [vmem:[#allocation37_spill] sm:$0xff] %v5977_v10 }
 0xa4c   :  { %v5917_v33 = vpack.c.bf16 %v2565_v27, %v2565_v27  ;;  %v5980_v27 = vld [vmem:[#allocation8 + $0xac] ss:$16 sps:$4 sm:$0xff]  }
 0xa4d   :  { %7234 = vst [vmem:[#allocation38_spill] sm:$0xff] %v5980_v27 }
 0xa4e   :  { %2604 = vmatmul.mubr.bf16.vlgmr.msra.gmra.mrb[48].mxu0 %v5917_v33  ;;  %2645 = vmatmul.mubr.bf16.vlgmr.msra.gmra.mrb[48].mxu1 %v5917_v33 }
 0xa4f   :  { %2683 = vmatpush1.bf16.msra.mxu0 %v5921_v57  ;;  %2724 = vmatpush1.bf16.msra.mxu1 %v5924_v2 }
 0xa50   :  { %2684 = vmatprep.subr.bf16.mxu0 %v5927_v1  ;;  %2725 = vmatprep.subr.bf16.mxu1 %v5930_v3 }
 0xa51   :  { %2714 = vmatprep.mubr.bf16.mxu0 %v6899_v32  ;;  %2755 = vmatprep.mubr.bf16.mxu1 %v6899_v32 }
 0xa53   :  { %2685 = vmatpush1.bf16.msra.mxu0 %v5935_v58  ;;  %2726 = vmatpush1.bf16.msra.mxu1 %v5938_v35 }
 0xa54   :  { %2686 = vmatprep.subr.bf16.mxu0 %v5941_v6  ;;  %2727 = vmatprep.subr.bf16.mxu1 %v5944_v25 }
 0xa57   :  { %2687 = vmatpush1.bf16.msra.mxu0 %v5947_v44  ;;  %2728 = vmatpush1.bf16.msra.mxu1 %v5950_v13 }
 0xa58   :  { %2688 = vmatprep.subr.bf16.mxu0 %v5953_v29  ;;  %2729 = vmatprep.subr.bf16.mxu1 %v5956_v16 }
 0xa5b   :  { %2689 = vmatpush1.bf16.msra.mxu0 %v5959_v39  ;;  %2730 = vmatpush1.bf16.msra.mxu1 %v5962_v37 }
 0xa5c   :  { %2690 = vmatprep.subr.bf16.mxu0 %v5965_v14  ;;  %2731 = vmatprep.subr.bf16.mxu1 %v5968_v4  ;;  %v5983_v14 = vld [vmem:[#allocation8 + $0xa0] ss:$16 sps:$4 sm:$0xff]   ;;  %v5986_v4 = vld [vmem:[#allocation8 + $0xa8] ss:$16 sps:$4 sm:$0xff]  }
 0xa5d   :  { %7235 = vst [vmem:[#allocation39_spill] sm:$0xff] %v5983_v14  ;;  %7236 = vst [vmem:[#allocation40_spill] sm:$0xff] %v5986_v4 }
 0xa5f   :  { %2691 = vmatpush1.bf16.msra.mxu0 %v5971_v5  ;;  %2732 = vmatpush1.bf16.msra.mxu1 %v5974_v60  ;;  %v5989_v5 = vld [vmem:[#allocation8 + $0xc4] ss:$16 sps:$4 sm:$0xff]   ;;  %v5992_v60 = vld [vmem:[#allocation8 + $0xcc] ss:$16 sps:$4 sm:$0xff]  }
 0xa60   :  { %2692 = vmatprep.subr.bf16.mxu0 %v5977_v10  ;;  %2733 = vmatprep.subr.bf16.mxu1 %v5980_v27  ;;  %7237 = vst [vmem:[#allocation41_spill] sm:$0xff] %v5989_v5  ;;  %7238 = vst [vmem:[#allocation42_spill] sm:$0xff] %v5992_v60  ;;  %v5995_v10 = vld [vmem:[#allocation8 + $0xc0] ss:$16 sps:$4 sm:$0xff]   ;;  %v5998_v27 = vld [vmem:[#allocation8 + $0xc8] ss:$16 sps:$4 sm:$0xff]  }
 0xa61   :  { %7239 = vst [vmem:[#allocation43_spill] sm:$0xff] %v5995_v10  ;;  %7240 = vst [vmem:[#allocation44_spill] sm:$0xff] %v5998_v27 }
 0xa63   :  { %2693 = vmatpush1.bf16.msra.mxu0 %v5983_v14  ;;  %2734 = vmatpush1.bf16.msra.mxu1 %v5986_v4  ;;  %v6001_v14 = vld [vmem:[#allocation8 + $0xe4] ss:$16 sps:$4 sm:$0xff]   ;;  %v6004_v4 = vld [vmem:[#allocation8 + $0xec] ss:$16 sps:$4 sm:$0xff]  }
 0xa64   :  { %2694 = vmatprep.subr.bf16.mxu0 %v5989_v5  ;;  %2735 = vmatprep.subr.bf16.mxu1 %v5992_v60  ;;  %7241 = vst [vmem:[#allocation45_spill] sm:$0xff] %v6001_v14  ;;  %7242 = vst [vmem:[#allocation46_spill] sm:$0xff] %v6004_v4  ;;  %v6007_v5 = vld [vmem:[#allocation8 + $0xe0] ss:$16 sps:$4 sm:$0xff]   ;;  %v6010_v60 = vld [vmem:[#allocation8 + $0xe8] ss:$16 sps:$4 sm:$0xff]  }
 0xa65   :  { %7243 = vst [vmem:[#allocation47_spill] sm:$0xff] %v6007_v5  ;;  %7244 = vst [vmem:[#allocation48_spill] sm:$0xff] %v6010_v60 }
 0xa67   :  { %2695 = vmatpush1.bf16.msra.mxu0 %v5995_v10  ;;  %2736 = vmatpush1.bf16.msra.mxu1 %v5998_v27  ;;  %v6013_v10 = vld [vmem:[#allocation5 + $0x4] ss:$16 sps:$4 sm:$0xff]   ;;  %v6016_v27 = vld [vmem:[#allocation5 + $0xc] ss:$16 sps:$4 sm:$0xff]  }
 0xa68   :  { %2696 = vmatprep.subr.bf16.mxu0 %v6001_v14  ;;  %2737 = vmatprep.subr.bf16.mxu1 %v6004_v4  ;;  %7245 = vst [vmem:[#allocation49_spill] sm:$0xff] %v6013_v10  ;;  %7246 = vst [vmem:[#allocation50_spill] sm:$0xff] %v6016_v27 }
 0xa6b   :  { %2697 = vmatpush1.bf16.msra.mxu0 %v6007_v5  ;;  %2738 = vmatpush1.bf16.msra.mxu1 %v6010_v60 }
 0xa6c   :  { %2768 = vmatprep.subr.bf16.mxu0 %v6013_v10  ;;  %2809 = vmatprep.subr.bf16.mxu1 %v6016_v27 }
 0xb21   :  { %v2605_v14 = vpop.f32.mrb[48].mxu0  ;;  %v2646_v37 = vpop.f32.mrb[48].mxu1 }
 0xb22   :  { %v3832_v4 = vadd.f32 %v2605_v14, %v7165_v48  ;;  %v2607_v39 = vpop.f32.mrb[49].mxu0  ;;  %v2648_v16 = vpop.f32.mrb[49].mxu1  ;;  %v3834_v27 = vadd.f32 %v2646_v37, %v5265_v59 }
 0xb23   :  { %v3833_v5 = vadd.f32 %v2607_v39, %v5254_v40  ;;  %v2609_v29 = vpop.f32.mrb[50].mxu0  ;;  %v2650_v13 = vpop.f32.mrb[50].mxu1  ;;  %v3835_v10 = vadd.f32 %v2648_v16, %v5260_v56 }
 0xb24   :  { %v3793_v44 = vmul.f32 -1.442695, %v3832_v4  ;;  %v2610_v60 = vpop.f32.mrb[51].mxu0  ;;  %v2651_v25 = vpop.f32.mrb[51].mxu1 }
 0xb25   :  { %v3794_v6 = vmul.f32 -1.442695, %v3833_v5  ;;  %v3795_v35 = vmul.f32 -1.442695, %v3835_v10  ;;  %v6036_v60 = vld [vmem:[#allocation5 + $0x2c] ss:$16 sps:$4 sm:$0xff]  }
 0xb26   :  { %4260 = vpow2.f32 %v3793_v44  ;;  %v6041_v10 = vld [vmem:[#allocation5 + $0x20] ss:$16 sps:$4 sm:$0xff]  }
 0xb27   :  { %4262 = vpow2.f32 %v3794_v6 }
 0xb28   :  { %4264 = vpow2.f32 %v3795_v35 }
 0xb29   :  { %4266 = vtanh.f32 %v3834_v27  ;;  %v6044_v27 = vld [vmem:[#allocation5 + $0x28] ss:$16 sps:$4 sm:$0xff]  }
 0xb30   :  { %v4261_v58 = vpop.eup %4260 }
 0xb31   :  { %v4263_v3 = vpop.eup %4262  ;;  %v2660_v14 = vadd.f32 1.0, %v4261_v58 }
 0xb32   :  { %v2666_v48 = vadd.f32 1.0, %v4263_v3  ;;  %v4265_v13 = vpop.eup %4264  ;;  %v6030_v3 = vld [vmem:[#allocation5 + $0x8] ss:$16 sps:$4 sm:$0xff]  }
 0xb33   :  { %4268 = vrcp.f32 %v2660_v14  ;;  %v4267_v29 = vpop.eup %4266  ;;  %v2673_v44 = vadd.f32 1.0, %v4265_v13  ;;  %v6047_v14 = vld [vmem:[#allocation5 + $0x44] ss:$16 sps:$4 sm:$0xff]   ;;  %v6050_v13 = vld [vmem:[#allocation5 + $0x4c] ss:$16 sps:$4 sm:$0xff]  }
 0xb34   :  { %4270 = vrcp.f32 %v2666_v48  ;;  %v6027_v48 = vld [vmem:[#allocation5] ss:$16 sps:$4 sm:$0xff]  }
 0xb35   :  { %4272 = vrcp.f32 %v2673_v44  ;;  %v6065_v44 = vld [vmem:[#allocation5 + $0x60] ss:$16 sps:$4 sm:$0xff]  }
 0xb3d   :  { %v4269_v39 = vpop.eup %4268 }
 0xb3e   :  { %v4271_v25 = vpop.eup %4270  ;;  %v2677_v4 = vmul.f32 %v4269_v39, %v4267_v29  ;;  %v6053_v29 = vld [vmem:[#allocation5 + $0x40] ss:$16 sps:$4 sm:$0xff]   ;;  %v6056_v39 = vld [vmem:[#allocation5 + $0x48] ss:$16 sps:$4 sm:$0xff]  }
 0xb3f   :  { %v2676_v6 = vmul.f32 %v4271_v25, %v5832_v18  ;;  %v4273_v37 = vpop.eup %4272  ;;  %v6033_v18 = vld [vmem:[#allocation5 + $0x24] ss:$16 sps:$4 sm:$0xff]  }
 0xb40   :  { %v6059_v25 = vld [vmem:[#allocation5 + $0x64] ss:$16 sps:$4 sm:$0xff]  }
 0xb41   :  { %v6024_v16 = vadd.f32 %v2677_v4, %v2676_v6  ;;  %v6062_v4 = vld [vmem:[#allocation5 + $0x6c] ss:$16 sps:$4 sm:$0xff]   ;;  %v6068_v6 = vld [vmem:[#allocation5 + $0x68] ss:$16 sps:$4 sm:$0xff]  }
 0xb43   :  { %4274 = vtanh.f32 %v6024_v16 }
 0xb4d   :  { %v4275_v58 = vpop.eup %4274 }
 0xb4e   :  { %v2680_v35 = vmul.f32 %v4275_v58, %v4273_v37  ;;  %v6071_v37 = vld [vmem:[#allocation5 + $0x84] ss:$16 sps:$4 sm:$0xff]   ;;  %v6074_v58 = vld [vmem:[#allocation5 + $0x8c] ss:$16 sps:$4 sm:$0xff]  }
 0xb50   :  { %v2681_v5 = vpack.c.bf16 %v2680_v35, %v2680_v35 }
 0xb52   :  { %2715 = vmatmul.mubr.bf16.vlgmr.msra.gmra.mrb[56].mxu0 %v2681_v5  ;;  %2756 = vmatmul.mubr.bf16.vlgmr.msra.gmra.mrb[56].mxu1 %v2681_v5 }
 0xb53   :  { %2769 = vmatpush1.bf16.msra.mxu0 %v6027_v48  ;;  %2810 = vmatpush1.bf16.msra.mxu1 %v6030_v3 }
 0xb54   :  { %2770 = vmatprep.subr.bf16.mxu0 %v6033_v18  ;;  %2811 = vmatprep.subr.bf16.mxu1 %v6036_v60 }
 0xb55   :  { %2800 = vmatprep.mubr.bf16.mxu0 %v6899_v32  ;;  %2841 = vmatprep.mubr.bf16.mxu1 %v6899_v32 }
 0xb57   :  { %2771 = vmatpush1.bf16.msra.mxu0 %v6041_v10  ;;  %2812 = vmatpush1.bf16.msra.mxu1 %v6044_v27 }
 0xb58   :  { %2772 = vmatprep.subr.bf16.mxu0 %v6047_v14  ;;  %2813 = vmatprep.subr.bf16.mxu1 %v6050_v13 }
 0xb5b   :  { %2773 = vmatpush1.bf16.msra.mxu0 %v6053_v29  ;;  %2814 = vmatpush1.bf16.msra.mxu1 %v6056_v39 }
 0xb5c   :  { %2774 = vmatprep.subr.bf16.mxu0 %v6059_v25  ;;  %2815 = vmatprep.subr.bf16.mxu1 %v6062_v4 }
 0xb5f   :  { %2775 = vmatpush1.bf16.msra.mxu0 %v6065_v44  ;;  %2816 = vmatpush1.bf16.msra.mxu1 %v6068_v6 }
 0xb60   :  { %2776 = vmatprep.subr.bf16.mxu0 %v6071_v37  ;;  %2817 = vmatprep.subr.bf16.mxu1 %v6074_v58 }
 0xb63   :  { %2777 = vmatpush1.bf16.msra.mxu0 %v7166_v38  ;;  %2818 = vmatpush1.bf16.msra.mxu1 %v7167_v12  ;;  %v7247_v38 = vld [vmem:[#allocation78_spill] sm:$0xff]  ;;  %v7248_v12 = vld [vmem:[#allocation15_spill] sm:$0xff] }
 0xb64   :  { %2778 = vmatprep.subr.bf16.mxu0 %v7168_v22  ;;  %2819 = vmatprep.subr.bf16.mxu1 %v7169_v17  ;;  %v7249_v22 = vld [vmem:[#allocation16_spill] sm:$0xff]  ;;  %v7250_v17 = vld [vmem:[#allocation17_spill] sm:$0xff] }
 0xb67   :  { %2779 = vmatpush1.bf16.msra.mxu0 %v7170_v7  ;;  %2820 = vmatpush1.bf16.msra.mxu1 %v7171_v30  ;;  %v7251_v7 = vld [vmem:[#allocation18_spill] sm:$0xff]  ;;  %v7252_v30 = vld [vmem:[#allocation19_spill] sm:$0xff] }
 0xb68   :  { %2780 = vmatprep.subr.bf16.mxu0 %v7172_v24  ;;  %2821 = vmatprep.subr.bf16.mxu1 %v7173_v31  ;;  %v7253_v24 = vld [vmem:[#allocation20_spill] sm:$0xff]  ;;  %v7254_v31 = vld [vmem:[#allocation21_spill] sm:$0xff] }
 0xb6b   :  { %2781 = vmatpush1.bf16.msra.mxu0 %v7174_v8  ;;  %2822 = vmatpush1.bf16.msra.mxu1 %v7175_v53  ;;  %v7255_v8 = vld [vmem:[#allocation22_spill] sm:$0xff]  ;;  %v7256_v53 = vld [vmem:[#allocation23_spill] sm:$0xff] }
 0xb6c   :  { %2782 = vmatprep.subr.bf16.mxu0 %v7176_v62  ;;  %2823 = vmatprep.subr.bf16.mxu1 %v7177_v9  ;;  %v7257_v62 = vld [vmem:[#allocation24_spill] sm:$0xff]  ;;  %v7258_v9 = vld [vmem:[#allocation25_spill] sm:$0xff] }
 0xb6f   :  { %2783 = vmatpush1.bf16.msra.mxu0 %v7178_v26  ;;  %2824 = vmatpush1.bf16.msra.mxu1 %v7179_v21 }
 0xb70   :  { %2883 = vmatprep.subr.bf16.mxu0 %v7180_v23  ;;  %2924 = vmatprep.subr.bf16.mxu1 %v7181_v11  ;;  %v7259_v23 = vld [vmem:[#allocation87_spill] sm:$0xff] }
 0xb72   :  { %2801 = vmatmul.mubr.bf16.vlgmr.msra.gmra.mrb[60].mxu0 %v5917_v33  ;;  %2842 = vmatmul.mubr.bf16.vlgmr.msra.gmra.mrb[60].mxu1 %v5917_v33 }
 0xb73   :  { %2884 = vmatpush1.bf16.msra.mxu0 %v7182_v34  ;;  %2925 = vmatpush1.bf16.msra.mxu1 %v7183_v20  ;;  %v7260_v34 = vld [vmem:[#allocation88_spill] sm:$0xff] }
 0xb74   :  { %2885 = vmatprep.subr.bf16.mxu0 %v7184_v0  ;;  %2926 = vmatprep.subr.bf16.mxu1 %v7185_v19 }
 0xb75   :  { %2915 = vmatprep.mubr.bf16.mxu0 %v6899_v32  ;;  %2956 = vmatprep.mubr.bf16.mxu1 %v6899_v32 }
 0xb77   :  { %2886 = vmatpush1.bf16.msra.mxu0 %v7186_v15  ;;  %2927 = vmatpush1.bf16.msra.mxu1 %v7187_v36  ;;  %v7261_v15 = vld [vmem:[#allocation89_spill] sm:$0xff] }
 0xb78   :  { %2887 = vmatprep.subr.bf16.mxu0 %v7188_v41  ;;  %2928 = vmatprep.subr.bf16.mxu1 %v7189_v42  ;;  %v7262_v41 = vld [vmem:[#allocation90_spill] sm:$0xff] }
 0xb7b   :  { %2888 = vmatpush1.bf16.msra.mxu0 %v7190_v61  ;;  %2929 = vmatpush1.bf16.msra.mxu1 %v7191_v43 }
 0xb7c   :  { %2889 = vmatprep.subr.bf16.mxu0 %v7192_v45  ;;  %2930 = vmatprep.subr.bf16.mxu1 %v7193_v46 }
 0xb7f   :  { %2890 = vmatpush1.bf16.msra.mxu0 %v7194_v47  ;;  %2931 = vmatpush1.bf16.msra.mxu1 %v7195_v49 }
 0xb80   :  { %2891 = vmatprep.subr.bf16.mxu0 %v7196_v50  ;;  %2932 = vmatprep.subr.bf16.mxu1 %v7197_v51 }
 0xb83   :  { %2892 = vmatpush1.bf16.msra.mxu0 %v7198_v52  ;;  %2933 = vmatpush1.bf16.msra.mxu1 %v7199_v54 }
 0xb84   :  { %2893 = vmatprep.subr.bf16.mxu0 %v7200_v28  ;;  %2934 = vmatprep.subr.bf16.mxu1 %v7201_v55 }
 0xb87   :  { %2894 = vmatpush1.bf16.msra.mxu0 %v7247_v38  ;;  %2935 = vmatpush1.bf16.msra.mxu1 %v7248_v12 }
 0xb88   :  { %2895 = vmatprep.subr.bf16.mxu0 %v7249_v22  ;;  %2936 = vmatprep.subr.bf16.mxu1 %v7250_v17 }
 0xb8b   :  { %2896 = vmatpush1.bf16.msra.mxu0 %v7251_v7  ;;  %2937 = vmatpush1.bf16.msra.mxu1 %v7252_v30 }
 0xb8c   :  { %2897 = vmatprep.subr.bf16.mxu0 %v7253_v24  ;;  %2938 = vmatprep.subr.bf16.mxu1 %v7254_v31 }
 0xb8f   :  { %2898 = vmatpush1.bf16.msra.mxu0 %v7255_v8  ;;  %2939 = vmatpush1.bf16.msra.mxu1 %v7256_v53  ;;  %v7264_v8 = vld [vmem:[#allocation27_spill] sm:$0xff]  ;;  %v7265_v53 = vld [vmem:[#allocation28_spill] sm:$0xff] }
 0xb90   :  { %2994 = vmatprep.subr.bf16.mxu0 %v7257_v62  ;;  %3035 = vmatprep.subr.bf16.mxu1 %v7258_v9 }
 0xc45   :  { %v2802_v26 = vpop.f32.mrb[60].mxu0  ;;  %v2843_v21 = vpop.f32.mrb[60].mxu1 }
 0xc46   :  { %v2850_v11 = vadd.f32 %v2802_v26, %v7259_v23  ;;  %v2852_v20 = vadd.f32 %v2843_v21, %v7260_v34  ;;  %v2804_v0 = vpop.f32.mrb[61].mxu0  ;;  %v2845_v19 = vpop.f32.mrb[61].mxu1  ;;  %v7266_v26 = vld [vmem:[#allocation29_spill] sm:$0xff]  ;;  %v7267_v21 = vld [vmem:[#allocation30_spill] sm:$0xff]  ;;  %v7268_v23 = vld [vmem:[#allocation31_spill] sm:$0xff] }
 0xc47   :  { %v2851_v36 = vadd.f32 %v2804_v0, %v7261_v15  ;;  %v2853_v42 = vadd.f32 %v2845_v19, %v7262_v41  ;;  %v2806_v61 = vpop.f32.mrb[62].mxu0  ;;  %v2847_v43 = vpop.f32.mrb[62].mxu1  ;;  %v7270_v34 = vld [vmem:[#allocation79_spill] sm:$0xff]  ;;  %v7272_v0 = vld [vmem:[#allocation81_spill] sm:$0xff]  ;;  %v7273_v19 = vld [vmem:[#allocation82_spill] sm:$0xff] }
 0xc48   :  { %v3796_v45 = vmul.f32 -1.442695, %v2850_v11  ;;  %v2807_v46 = vpop.f32.mrb[63].mxu0  ;;  %v2848_v47 = vpop.f32.mrb[63].mxu1  ;;  %v7269_v11 = vld [vmem:[#allocation32_spill] sm:$0xff]  ;;  %v7274_v15 = vld [vmem:[#allocation33_spill] sm:$0xff] }
 0xc49   :  { %v3797_v49 = vmul.f32 -1.442695, %v2851_v36  ;;  %v3798_v50 = vmul.f32 -1.442695, %v2853_v42  ;;  %v7275_v36 = vld [vmem:[#allocation34_spill] sm:$0xff]  ;;  %v7276_v41 = vld [vmem:[#allocation35_spill] sm:$0xff] }
 0xc4a   :  { %4276 = vpow2.f32 %v3796_v45  ;;  %v7277_v42 = vld [vmem:[#allocation36_spill] sm:$0xff]  ;;  %v7278_v61 = vld [vmem:[#allocation37_spill] sm:$0xff]  ;;  %v7279_v43 = vld [vmem:[#allocation38_spill] sm:$0xff] }
 0xc4b   :  { %4278 = vpow2.f32 %v3797_v49  ;;  %v7280_v45 = vld [vmem:[#allocation39_spill] sm:$0xff]  ;;  %v7281_v46 = vld [vmem:[#allocation40_spill] sm:$0xff]  ;;  %v7282_v47 = vld [vmem:[#allocation41_spill] sm:$0xff] }
 0xc4c   :  { %4280 = vpow2.f32 %v3798_v50  ;;  %v7283_v49 = vld [vmem:[#allocation42_spill] sm:$0xff]  ;;  %v7284_v50 = vld [vmem:[#allocation43_spill] sm:$0xff] }
 0xc4d   :  { %4282 = vtanh.f32 %v2852_v20  ;;  %v7271_v20 = vld [vmem:[#allocation80_spill] sm:$0xff] }
 0xc54   :  { %v4277_v51 = vpop.eup %4276 }
 0xc55   :  { %v4279_v52 = vpop.eup %4278  ;;  %v2857_v54 = vadd.f32 1.0, %v4277_v51  ;;  %v7285_v51 = vld [vmem:[#allocation44_spill] sm:$0xff] }
 0xc56   :  { %v2863_v28 = vadd.f32 1.0, %v4279_v52  ;;  %v4281_v55 = vpop.eup %4280  ;;  %v7286_v52 = vld [vmem:[#allocation45_spill] sm:$0xff] }
 0xc57   :  { %4284 = vrcp.f32 %v2857_v54  ;;  %v4283_v33 = vpop.eup %4282  ;;  %v2870_v12 = vadd.f32 1.0, %v4281_v55  ;;  %v7287_v54 = vld [vmem:[#allocation46_spill] sm:$0xff]  ;;  %v7289_v55 = vld [vmem:[#allocation48_spill] sm:$0xff] }
 0xc58   :  { %4286 = vrcp.f32 %v2863_v28  ;;  %v7288_v28 = vld [vmem:[#allocation47_spill] sm:$0xff] }
 0xc59   :  { %4288 = vrcp.f32 %v2870_v12  ;;  %v7292_v12 = vld [vmem:[#allocation99_spill] sm:$0xff] }
 0xc61   :  { %v4285_v35 = vpop.eup %4284 }
 0xc62   :  { %v4287_v5 = vpop.eup %4286  ;;  %v2874_v38 = vmul.f32 %v4285_v35, %v4283_v33  ;;  %v7290_v33 = vld [vmem:[#allocation49_spill] sm:$0xff]  ;;  %v7291_v35 = vld [vmem:[#allocation50_spill] sm:$0xff] }
 0xc63   :  { %v2873_v22 = vmul.f32 %v4287_v5, %v5914_v63  ;;  %v4289_v7 = vpop.eup %4288  ;;  %v7263_v63 = vld [vmem:[#allocation26_spill] sm:$0xff] }
 0xc65   :  { %v6134_v17 = vadd.f32 %v2874_v38, %v2873_v22 }
 0xc67   :  { %4290 = vtanh.f32 %v6134_v17 }
 0xc71   :  { %v4291_v30 = vpop.eup %4290 }
 0xc72   :  { %v2877_v24 = vmul.f32 %v4291_v30, %v4289_v7 }
 0xc74   :  { %v6137_v31 = vpack.c.bf16 %v2877_v24, %v2877_v24 }
 0xc76   :  { %2916 = vmatmul.mubr.bf16.vlgmr.msra.gmra.mrb[56].mxu0 %v6137_v31  ;;  %2957 = vmatmul.mubr.bf16.vlgmr.msra.gmra.mrb[56].mxu1 %v6137_v31 }
 0xc77   :  { %2995 = vmatpush1.bf16.msra.mxu0 %v5921_v57  ;;  %3036 = vmatpush1.bf16.msra.mxu1 %v5924_v2 }
 0xc78   :  { %2996 = vmatprep.subr.bf16.mxu0 %v5927_v1  ;;  %3037 = vmatprep.subr.bf16.mxu1 %v7263_v63 }
 0xc79   :  { %3026 = vmatprep.mubr.bf16.mxu0 %v6899_v32  ;;  %3067 = vmatprep.mubr.bf16.mxu1 %v6899_v32 }
 0xc7b   :  { %2997 = vmatpush1.bf16.msra.mxu0 %v7264_v8  ;;  %3038 = vmatpush1.bf16.msra.mxu1 %v7265_v53 }
 0xc7c   :  { %2998 = vmatprep.subr.bf16.mxu0 %v7266_v26  ;;  %3039 = vmatprep.subr.bf16.mxu1 %v7267_v21 }
 0xc7f   :  { %2999 = vmatpush1.bf16.msra.mxu0 %v7268_v23  ;;  %3040 = vmatpush1.bf16.msra.mxu1 %v7269_v11 }
 0xc80   :  { %3000 = vmatprep.subr.bf16.mxu0 %v7270_v34  ;;  %3041 = vmatprep.subr.bf16.mxu1 %v7271_v20 }
 0xc83   :  { %3001 = vmatpush1.bf16.msra.mxu0 %v7272_v0  ;;  %3042 = vmatpush1.bf16.msra.mxu1 %v7273_v19 }
 0xc84   :  { %3002 = vmatprep.subr.bf16.mxu0 %v7274_v15  ;;  %3043 = vmatprep.subr.bf16.mxu1 %v7275_v36 }
 0xc87   :  { %3003 = vmatpush1.bf16.msra.mxu0 %v7276_v41  ;;  %3044 = vmatpush1.bf16.msra.mxu1 %v7277_v42 }
 0xc88   :  { %3004 = vmatprep.subr.bf16.mxu0 %v7278_v61  ;;  %3045 = vmatprep.subr.bf16.mxu1 %v7279_v43 }
 0xc8b   :  { %3005 = vmatpush1.bf16.msra.mxu0 %v7280_v45  ;;  %3046 = vmatpush1.bf16.msra.mxu1 %v7281_v46 }
 0xc8c   :  { %3006 = vmatprep.subr.bf16.mxu0 %v7282_v47  ;;  %3047 = vmatprep.subr.bf16.mxu1 %v7283_v49 }
 0xc8f   :  { %3007 = vmatpush1.bf16.msra.mxu0 %v7284_v50  ;;  %3048 = vmatpush1.bf16.msra.mxu1 %v7285_v51 }
 0xc90   :  { %3008 = vmatprep.subr.bf16.mxu0 %v7286_v52  ;;  %3049 = vmatprep.subr.bf16.mxu1 %v7287_v54 }
 0xc93   :  { %3009 = vmatpush1.bf16.msra.mxu0 %v7288_v28  ;;  %3050 = vmatpush1.bf16.msra.mxu1 %v7289_v55 }
 0xc94   :  { %3080 = vmatprep.subr.bf16.mxu0 %v7290_v33  ;;  %3121 = vmatprep.subr.bf16.mxu1 %v7291_v35 }
 0xd49   :  { %v2917_v5 = vpop.f32.mrb[56].mxu0  ;;  %v2958_v38 = vpop.f32.mrb[56].mxu1 }
 0xd4a   :  { %v3836_v22 = vadd.f32 %v2917_v5, %v7292_v12  ;;  %v2919_v7 = vpop.f32.mrb[57].mxu0  ;;  %v2960_v30 = vpop.f32.mrb[57].mxu1  ;;  %v3838_v35 = vadd.f32 %v2958_v38, %v5265_v59  ;;  %v6207_v38 = vld [vmem:[#allocation5 + $0xa4] ss:$16 sps:$4 sm:$0xff]  }
 0xd4b   :  { %v3837_v24 = vadd.f32 %v2919_v7, %v5254_v40  ;;  %v2921_v51 = vpop.f32.mrb[58].mxu0  ;;  %v2962_v52 = vpop.f32.mrb[58].mxu1  ;;  %v3839_v33 = vadd.f32 %v2960_v30, %v5260_v56  ;;  %7295 = vst [vmem:[#allocation53_spill] sm:$0xff] %v6207_v38  ;;  %v6213_v30 = vld [vmem:[#allocation5 + $0xa0] ss:$16 sps:$4 sm:$0xff]  }
 0xd4c   :  { %v3799_v50 = vmul.f32 -1.442695, %v3836_v22  ;;  %v2922_v54 = vpop.f32.mrb[59].mxu0  ;;  %v2963_v49 = vpop.f32.mrb[59].mxu1  ;;  %7297 = vst [vmem:[#allocation55_spill] sm:$0xff] %v6213_v30 }
 0xd4d   :  { %v3800_v28 = vmul.f32 -1.442695, %v3837_v24  ;;  %v3801_v55 = vmul.f32 -1.442695, %v3839_v33  ;;  %v6216_v24 = vld [vmem:[#allocation5 + $0xa8] ss:$16 sps:$4 sm:$0xff]  }
 0xd4e   :  { %4292 = vpow2.f32 %v3799_v50  ;;  %7298 = vst [vmem:[#allocation56_spill] sm:$0xff] %v6216_v24 }
 0xd4f   :  { %4294 = vpow2.f32 %v3800_v28 }
 0xd50   :  { %4296 = vpow2.f32 %v3801_v55 }
 0xd51   :  { %4298 = vtanh.f32 %v3838_v35 }
 0xd58   :  { %v4293_v47 = vpop.eup %4292 }
 0xd59   :  { %v4295_v46 = vpop.eup %4294  ;;  %v2972_v5 = vadd.f32 1.0, %v4293_v47 }
 0xd5a   :  { %v2978_v12 = vadd.f32 1.0, %v4295_v46  ;;  %v4297_v51 = vpop.eup %4296  ;;  %v6204_v46 = vld [vmem:[#allocation5 + $0x88] ss:$16 sps:$4 sm:$0xff]  }
 0xd5b   :  { %4300 = vrcp.f32 %v2972_v5  ;;  %v4299_v52 = vpop.eup %4298  ;;  %v2985_v50 = vadd.f32 1.0, %v4297_v51  ;;  %7294 = vst [vmem:[#allocation52_spill] sm:$0xff] %v6204_v46  ;;  %v6219_v5 = vld [vmem:[#allocation5 + $0xc4] ss:$16 sps:$4 sm:$0xff]   ;;  %v6222_v51 = vld [vmem:[#allocation5 + $0xcc] ss:$16 sps:$4 sm:$0xff]  }
 0xd5c   :  { %4302 = vrcp.f32 %v2978_v12  ;;  %v6210_v12 = vld [vmem:[#allocation5 + $0xac] ss:$16 sps:$4 sm:$0xff]   ;;  %7299 = vst [vmem:[#allocation57_spill] sm:$0xff] %v6219_v5  ;;  %7300 = vst [vmem:[#allocation58_spill] sm:$0xff] %v6222_v51 }
 0xd5d   :  { %4304 = vrcp.f32 %v2985_v50  ;;  %7296 = vst [vmem:[#allocation54_spill] sm:$0xff] %v6210_v12  ;;  %v6237_v50 = vld [vmem:[#allocation5 + $0xe0] ss:$16 sps:$4 sm:$0xff]  }
 0xd5e   :  { %7305 = vst [vmem:[#allocation73_spill] sm:$0xff] %v6237_v50 }
 0xd65   :  { %v4301_v54 = vpop.eup %4300 }
 0xd66   :  { %v4303_v49 = vpop.eup %4302  ;;  %v2989_v22 = vmul.f32 %v4301_v54, %v4299_v52  ;;  %v6225_v52 = vld [vmem:[#allocation5 + $0xc0] ss:$16 sps:$4 sm:$0xff]   ;;  %v6228_v54 = vld [vmem:[#allocation5 + $0xc8] ss:$16 sps:$4 sm:$0xff]  }
 0xd67   :  { %v2988_v28 = vmul.f32 %v4303_v49, %v6024_v16  ;;  %v4305_v33 = vpop.eup %4304  ;;  %v6201_v16 = vld [vmem:[#allocation5 + $0x80] ss:$16 sps:$4 sm:$0xff]   ;;  %7301 = vst [vmem:[#allocation59_spill] sm:$0xff] %v6225_v52  ;;  %7302 = vst [vmem:[#allocation60_spill] sm:$0xff] %v6228_v54  ;;  %v6231_v49 = vld [vmem:[#allocation5 + $0xe4] ss:$16 sps:$4 sm:$0xff]  }
 0xd68   :  { %7293 = vst [vmem:[#allocation51_spill] sm:$0xff] %v6201_v16  ;;  %7303 = vst [vmem:[#allocation71_spill] sm:$0xff] %v6231_v49 }
 0xd69   :  { %v6180_v7 = vadd.f32 %v2989_v22, %v2988_v28  ;;  %v6234_v22 = vld [vmem:[#allocation5 + $0xec] ss:$16 sps:$4 sm:$0xff]   ;;  %v6240_v28 = vld [vmem:[#allocation5 + $0xe8] ss:$16 sps:$4 sm:$0xff]  }
 0xd6a   :  { %7304 = vst [vmem:[#allocation72_spill] sm:$0xff] %v6234_v22  ;;  %7306 = vst [vmem:[#allocation74_spill] sm:$0xff] %v6240_v28 }
 0xd6b   :  { %4306 = vtanh.f32 %v6180_v7 }
 0xd75   :  { %v4307_v47 = vpop.eup %4306 }
 0xd76   :  { %v2992_v55 = vmul.f32 %v4307_v47, %v4305_v33  ;;  %v6243_v33 = vld [vmem:[#allocation7 + $0x4] ss:$16 sps:$4 sm:$0xff]   ;;  %v6246_v47 = vld [vmem:[#allocation7 + $0xc] ss:$16 sps:$4 sm:$0xff]  }
 0xd77   :  { %7307 = vst [vmem:[#allocation61_spill] sm:$0xff] %v6243_v33  ;;  %7308 = vst [vmem:[#allocation62_spill] sm:$0xff] %v6246_v47 }
 0xd78   :  { %v2993_v35 = vpack.c.bf16 %v2992_v55, %v2992_v55  ;;  %v6251_v55 = vld [vmem:[#allocation7] ss:$16 sps:$4 sm:$0xff]  }
 0xd79   :  { %7309 = vst [vmem:[#allocation63_spill] sm:$0xff] %v6251_v55 }
 0xd7a   :  { %3027 = vmatmul.mubr.bf16.vlgmr.msra.gmra.mrb[64].mxu0 %v2993_v35  ;;  %3068 = vmatmul.mubr.bf16.vlgmr.msra.gmra.mrb[64].mxu1 %v2993_v35  ;;  %v6254_v35 = vld [vmem:[#allocation7 + $0x8] ss:$16 sps:$4 sm:$0xff]  }
 0xd7b   :  { %3081 = vmatpush1.bf16.msra.mxu0 %v6027_v48  ;;  %3122 = vmatpush1.bf16.msra.mxu1 %v6030_v3  ;;  %7310 = vst [vmem:[#allocation64_spill] sm:$0xff] %v6254_v35 }
 0xd7c   :  { %3082 = vmatprep.subr.bf16.mxu0 %v6033_v18  ;;  %3123 = vmatprep.subr.bf16.mxu1 %v6036_v60 }
 0xd7d   :  { %3112 = vmatprep.mubr.bf16.mxu0 %v6899_v32  ;;  %3153 = vmatprep.mubr.bf16.mxu1 %v6899_v32 }
 0xd7f   :  { %3083 = vmatpush1.bf16.msra.mxu0 %v6041_v10  ;;  %3124 = vmatpush1.bf16.msra.mxu1 %v6044_v27 }
 0xd80   :  { %3084 = vmatprep.subr.bf16.mxu0 %v6047_v14  ;;  %3125 = vmatprep.subr.bf16.mxu1 %v6050_v13 }
 0xd83   :  { %3085 = vmatpush1.bf16.msra.mxu0 %v6053_v29  ;;  %3126 = vmatpush1.bf16.msra.mxu1 %v6056_v39 }
 0xd84   :  { %3086 = vmatprep.subr.bf16.mxu0 %v6059_v25  ;;  %3127 = vmatprep.subr.bf16.mxu1 %v6062_v4 }
 0xd87   :  { %3087 = vmatpush1.bf16.msra.mxu0 %v6065_v44  ;;  %3128 = vmatpush1.bf16.msra.mxu1 %v6068_v6 }
 0xd88   :  { %3088 = vmatprep.subr.bf16.mxu0 %v6071_v37  ;;  %3129 = vmatprep.subr.bf16.mxu1 %v6074_v58 }
 0xd8b   :  { %3089 = vmatpush1.bf16.msra.mxu0 %v6201_v16  ;;  %3130 = vmatpush1.bf16.msra.mxu1 %v6204_v46 }
 0xd8c   :  { %3090 = vmatprep.subr.bf16.mxu0 %v6207_v38  ;;  %3131 = vmatprep.subr.bf16.mxu1 %v6210_v12 }
 0xd8f   :  { %3091 = vmatpush1.bf16.msra.mxu0 %v6213_v30  ;;  %3132 = vmatpush1.bf16.msra.mxu1 %v6216_v24 }
 0xd90   :  { %3092 = vmatprep.subr.bf16.mxu0 %v6219_v5  ;;  %3133 = vmatprep.subr.bf16.mxu1 %v6222_v51  ;;  %v7342_v5 = vld [vmem:[#allocation94_spill] sm:$0xff] }
 0xd93   :  { %3093 = vmatpush1.bf16.msra.mxu0 %v6225_v52  ;;  %3134 = vmatpush1.bf16.msra.mxu1 %v6228_v54  ;;  %v7341_v52 = vld [vmem:[#allocation93_spill] sm:$0xff] }
 0xd94   :  { %3094 = vmatprep.subr.bf16.mxu0 %v6231_v49  ;;  %3135 = vmatprep.subr.bf16.mxu1 %v6234_v22  ;;  %v7340_v22 = vld [vmem:[#allocation92_spill] sm:$0xff] }
 0xd97   :  { %3095 = vmatpush1.bf16.msra.mxu0 %v6237_v50  ;;  %3136 = vmatpush1.bf16.msra.mxu1 %v6240_v28  ;;  %v6257_v28 = vld [vmem:[#allocation7 + $0x24] ss:$16 sps:$4 sm:$0xff]  }
 0xd98   :  { %3195 = vmatprep.subr.bf16.mxu0 %v6243_v33  ;;  %3236 = vmatprep.subr.bf16.mxu1 %v6246_v47  ;;  %7311 = vst [vmem:[#allocation65_spill] sm:$0xff] %v6257_v28  ;;  %v6260_v33 = vld [vmem:[#allocation7 + $0x2c] ss:$16 sps:$4 sm:$0xff]   ;;  %v6280_v47 = vld [vmem:[#allocation7 + $0x48] ss:$16 sps:$4 sm:$0xff]   ;;  %v7339_v50 = vld [vmem:[#allocation91_spill] sm:$0xff] }
 0xd99   :  { %7312 = vst [vmem:[#allocation66_spill] sm:$0xff] %v6260_v33  ;;  %7318 = vst [vmem:[#allocation14_spill] sm:$0xff] %v6280_v47 }
 0xd9a   :  { %3113 = vmatmul.mubr.bf16.vlgmr.msra.gmra.mrb[68].mxu0 %v6137_v31  ;;  %3154 = vmatmul.mubr.bf16.vlgmr.msra.gmra.mrb[68].mxu1 %v6137_v31  ;;  %v6265_v31 = vld [vmem:[#allocation7 + $0x20] ss:$16 sps:$4 sm:$0xff]  }
 0xd9b   :  { %3196 = vmatpush1.bf16.msra.mxu0 %v6251_v55  ;;  %3237 = vmatpush1.bf16.msra.mxu1 %v6254_v35  ;;  %7313 = vst [vmem:[#allocation67_spill] sm:$0xff] %v6265_v31  ;;  %v6268_v55 = vld [vmem:[#allocation7 + $0x28] ss:$16 sps:$4 sm:$0xff]   ;;  %v6271_v35 = vld [vmem:[#allocation7 + $0x44] ss:$16 sps:$4 sm:$0xff]  }
 0xd9c   :  { %3197 = vmatprep.subr.bf16.mxu0 %v6257_v28  ;;  %3238 = vmatprep.subr.bf16.mxu1 %v6260_v33  ;;  %7314 = vst [vmem:[#allocation68_spill] sm:$0xff] %v6268_v55  ;;  %7315 = vst [vmem:[#allocation69_spill] sm:$0xff] %v6271_v35  ;;  %v6274_v28 = vld [vmem:[#allocation7 + $0x4c] ss:$16 sps:$4 sm:$0xff]   ;;  %v6277_v33 = vld [vmem:[#allocation7 + $0x40] ss:$16 sps:$4 sm:$0xff]  }
 0xd9d   :  { %3227 = vmatprep.mubr.bf16.mxu0 %v6899_v32  ;;  %3268 = vmatprep.mubr.bf16.mxu1 %v6899_v32  ;;  %7316 = vst [vmem:[#allocation70_spill] sm:$0xff] %v6274_v28  ;;  %7317 = vst [vmem:[#allocation13_spill] sm:$0xff] %v6277_v33 }
 0xd9f   :  { %3198 = vmatpush1.bf16.msra.mxu0 %v6265_v31  ;;  %3239 = vmatpush1.bf16.msra.mxu1 %v6268_v55  ;;  %v6283_v31 = vld [vmem:[#allocation7 + $0x64] ss:$16 sps:$4 sm:$0xff]   ;;  %v6286_v55 = vld [vmem:[#allocation7 + $0x6c] ss:$16 sps:$4 sm:$0xff]  }
 0xda0   :  { %3199 = vmatprep.subr.bf16.mxu0 %v6271_v35  ;;  %3240 = vmatprep.subr.bf16.mxu1 %v6274_v28  ;;  %7319 = vst [vmem:[#allocation75_spill] sm:$0xff] %v6283_v31  ;;  %7320 = vst [vmem:[#allocation76_spill] sm:$0xff] %v6286_v55  ;;  %v6289_v35 = vld [vmem:[#allocation7 + $0x60] ss:$16 sps:$4 sm:$0xff]   ;;  %v6292_v28 = vld [vmem:[#allocation7 + $0x68] ss:$16 sps:$4 sm:$0xff]  }
 0xda1   :  { %7321 = vst [vmem:[#allocation77_spill] sm:$0xff] %v6289_v35  ;;  %7322 = vst [vmem:[#allocation83_spill] sm:$0xff] %v6292_v28 }
 0xda3   :  { %3200 = vmatpush1.bf16.msra.mxu0 %v6277_v33  ;;  %3241 = vmatpush1.bf16.msra.mxu1 %v6280_v47  ;;  %v6295_v33 = vld [vmem:[#allocation7 + $0x84] ss:$16 sps:$4 sm:$0xff]   ;;  %v6298_v47 = vld [vmem:[#allocation7 + $0x8c] ss:$16 sps:$4 sm:$0xff]  }
 0xda4   :  { %3201 = vmatprep.subr.bf16.mxu0 %v6283_v31  ;;  %3242 = vmatprep.subr.bf16.mxu1 %v6286_v55  ;;  %7323 = vst [vmem:[#allocation84_spill] sm:$0xff] %v6295_v33  ;;  %7324 = vst [vmem:[#allocation85_spill] sm:$0xff] %v6298_v47  ;;  %v6301_v31 = vld [vmem:[#allocation7 + $0x80] ss:$16 sps:$4 sm:$0xff]   ;;  %v6304_v55 = vld [vmem:[#allocation7 + $0x88] ss:$16 sps:$4 sm:$0xff]  }
 0xda5   :  { %7325 = vst [vmem:[#allocation86_spill] sm:$0xff] %v6301_v31  ;;  %7326 = vst [vmem:[#allocation78_spill] sm:$0xff] %v6304_v55 }
 0xda7   :  { %3202 = vmatpush1.bf16.msra.mxu0 %v6289_v35  ;;  %3243 = vmatpush1.bf16.msra.mxu1 %v6292_v28  ;;  %v6307_v35 = vld [vmem:[#allocation7 + $0xa4] ss:$16 sps:$4 sm:$0xff]   ;;  %v6310_v28 = vld [vmem:[#allocation7 + $0xac] ss:$16 sps:$4 sm:$0xff]  }
 0xda8   :  { %3203 = vmatprep.subr.bf16.mxu0 %v6295_v33  ;;  %3244 = vmatprep.subr.bf16.mxu1 %v6298_v47  ;;  %7327 = vst [vmem:[#allocation15_spill] sm:$0xff] %v6307_v35  ;;  %7328 = vst [vmem:[#allocation16_spill] sm:$0xff] %v6310_v28  ;;  %v6313_v33 = vld [vmem:[#allocation7 + $0xa0] ss:$16 sps:$4 sm:$0xff]   ;;  %v6316_v47 = vld [vmem:[#allocation7 + $0xa8] ss:$16 sps:$4 sm:$0xff]  }
 0xda9   :  { %7329 = vst [vmem:[#allocation17_spill] sm:$0xff] %v6313_v33  ;;  %7330 = vst [vmem:[#allocation18_spill] sm:$0xff] %v6316_v47 }
 0xdab   :  { %3204 = vmatpush1.bf16.msra.mxu0 %v6301_v31  ;;  %3245 = vmatpush1.bf16.msra.mxu1 %v6304_v55  ;;  %v6319_v31 = vld [vmem:[#allocation7 + $0xc4] ss:$16 sps:$4 sm:$0xff]   ;;  %v6322_v55 = vld [vmem:[#allocation7 + $0xcc] ss:$16 sps:$4 sm:$0xff]  }
 0xdac   :  { %3205 = vmatprep.subr.bf16.mxu0 %v6307_v35  ;;  %3246 = vmatprep.subr.bf16.mxu1 %v6310_v28  ;;  %7331 = vst [vmem:[#allocation19_spill] sm:$0xff] %v6319_v31  ;;  %7332 = vst [vmem:[#allocation20_spill] sm:$0xff] %v6322_v55  ;;  %v6325_v35 = vld [vmem:[#allocation7 + $0xc0] ss:$16 sps:$4 sm:$0xff]   ;;  %v6328_v28 = vld [vmem:[#allocation7 + $0xc8] ss:$16 sps:$4 sm:$0xff]  }
 0xdad   :  { %7333 = vst [vmem:[#allocation21_spill] sm:$0xff] %v6325_v35  ;;  %7334 = vst [vmem:[#allocation22_spill] sm:$0xff] %v6328_v28 }
 0xdaf   :  { %3206 = vmatpush1.bf16.msra.mxu0 %v6313_v33  ;;  %3247 = vmatpush1.bf16.msra.mxu1 %v6316_v47  ;;  %v6331_v33 = vld [vmem:[#allocation7 + $0xe4] ss:$16 sps:$4 sm:$0xff]   ;;  %v6334_v47 = vld [vmem:[#allocation7 + $0xec] ss:$16 sps:$4 sm:$0xff]  }
 0xdb0   :  { %3207 = vmatprep.subr.bf16.mxu0 %v6319_v31  ;;  %3248 = vmatprep.subr.bf16.mxu1 %v6322_v55  ;;  %7335 = vst [vmem:[#allocation23_spill] sm:$0xff] %v6331_v33  ;;  %7336 = vst [vmem:[#allocation24_spill] sm:$0xff] %v6334_v47  ;;  %v6337_v31 = vld [vmem:[#allocation7 + $0xe0] ss:$16 sps:$4 sm:$0xff]   ;;  %v6340_v55 = vld [vmem:[#allocation7 + $0xe8] ss:$16 sps:$4 sm:$0xff]  }
 0xdb1   :  { %7337 = vst [vmem:[#allocation25_spill] sm:$0xff] %v6337_v31  ;;  %7338 = vst [vmem:[#allocation87_spill] sm:$0xff] %v6340_v55 }
 0xdb3   :  { %3208 = vmatpush1.bf16.msra.mxu0 %v6325_v35  ;;  %3249 = vmatpush1.bf16.msra.mxu1 %v6328_v28 }
 0xdb4   :  { %3209 = vmatprep.subr.bf16.mxu0 %v6331_v33  ;;  %3250 = vmatprep.subr.bf16.mxu1 %v6334_v47 }
 0xdb7   :  { %3210 = vmatpush1.bf16.msra.mxu0 %v6337_v31  ;;  %3251 = vmatpush1.bf16.msra.mxu1 %v6340_v55 }
 0xdb8   :  { %3306 = vmatprep.subr.bf16.mxu0 %v7257_v62  ;;  %3347 = vmatprep.subr.bf16.mxu1 %v7258_v9 }
 0xe6d   :  { %v3114_v28 = vpop.f32.mrb[68].mxu0  ;;  %v3155_v35 = vpop.f32.mrb[68].mxu1 }
 0xe6e   :  { %v3162_v33 = vadd.f32 %v3114_v28, %v7339_v50  ;;  %v3164_v49 = vadd.f32 %v3155_v35, %v7340_v22  ;;  %v3116_v54 = vpop.f32.mrb[69].mxu0  ;;  %v3157_v47 = vpop.f32.mrb[69].mxu1 }
 0xe6f   :  { %v3163_v51 = vadd.f32 %v3116_v54, %v7341_v52  ;;  %v3165_v31 = vadd.f32 %v3157_v47, %v7342_v5  ;;  %v3118_v24 = vpop.f32.mrb[70].mxu0  ;;  %v3159_v30 = vpop.f32.mrb[70].mxu1 }
 0xe70   :  { %v3802_v12 = vmul.f32 -1.442695, %v3162_v33  ;;  %v3119_v55 = vpop.f32.mrb[71].mxu0  ;;  %v3160_v38 = vpop.f32.mrb[71].mxu1 }
 0xe71   :  { %v3803_v62 = vmul.f32 -1.442695, %v3163_v51  ;;  %v3804_v9 = vmul.f32 -1.442695, %v3165_v31 }
 0xe72   :  { %4308 = vpow2.f32 %v3802_v12 }
 0xe73   :  { %4310 = vpow2.f32 %v3803_v62 }
 0xe74   :  { %4312 = vpow2.f32 %v3804_v9 }
 0xe75   :  { %4314 = vtanh.f32 %v3164_v49 }
 0xe7c   :  { %v4309_v46 = vpop.eup %4308 }
 0xe7d   :  { %v4311_v16 = vpop.eup %4310  ;;  %v3169_v50 = vadd.f32 1.0, %v4309_v46 }
 0xe7e   :  { %v3175_v22 = vadd.f32 1.0, %v4311_v16  ;;  %v4313_v52 = vpop.eup %4312 }
 0xe7f   :  { %4316 = vrcp.f32 %v3169_v50  ;;  %v4315_v54 = vpop.eup %4314  ;;  %v3182_v28 = vadd.f32 1.0, %v4313_v52 }
 0xe80   :  { %4318 = vrcp.f32 %v3175_v22 }
 0xe81   :  { %4320 = vrcp.f32 %v3182_v28 }
 0xe89   :  { %v4317_v5 = vpop.eup %4316 }
 0xe8a   :  { %v4319_v24 = vpop.eup %4318  ;;  %v3186_v30 = vmul.f32 %v4317_v5, %v4315_v54 }
 0xe8b   :  { %v3185_v38 = vmul.f32 %v4319_v24, %v6134_v17  ;;  %v4321_v12 = vpop.eup %4320  ;;  %v7346_v17 = vld [vmem:[#allocation43_spill] sm:$0xff] }
 0xe8d   :  { %v6350_v51 = vadd.f32 %v3186_v30, %v3185_v38 }
 0xe8f   :  { %4322 = vtanh.f32 %v6350_v51 }
 0xe99   :  { %v4323_v46 = vpop.eup %4322 }
 0xe9a   :  { %v3189_v33 = vmul.f32 %v4323_v46, %v4321_v12 }
 0xe9c   :  { %v6353_v49 = vpack.c.bf16 %v3189_v33, %v3189_v33 }
 0xe9e   :  { %3228 = vmatmul.mubr.bf16.vlgmr.msra.gmra.mrb[64].mxu0 %v6353_v49  ;;  %3269 = vmatmul.mubr.bf16.vlgmr.msra.gmra.mrb[64].mxu1 %v6353_v49 }
 0xe9f   :  { %3307 = vmatpush1.bf16.msra.mxu0 %v5921_v57  ;;  %3348 = vmatpush1.bf16.msra.mxu1 %v5924_v2  ;;  %v7343_v57 = vld [vmem:[#allocation40_spill] sm:$0xff]  ;;  %v7344_v2 = vld [vmem:[#allocation41_spill] sm:$0xff] }
 0xea0   :  { %3308 = vmatprep.subr.bf16.mxu0 %v5927_v1  ;;  %3349 = vmatprep.subr.bf16.mxu1 %v7263_v63  ;;  %v7345_v1 = vld [vmem:[#allocation42_spill] sm:$0xff]  ;;  %v7347_v63 = vld [vmem:[#allocation44_spill] sm:$0xff] }
 0xea1   :  { %3338 = vmatprep.mubr.bf16.mxu0 %v6899_v32  ;;  %3379 = vmatprep.mubr.bf16.mxu1 %v6899_v32 }
 0xea3   :  { %3309 = vmatpush1.bf16.msra.mxu0 %v7264_v8  ;;  %3350 = vmatpush1.bf16.msra.mxu1 %v7265_v53  ;;  %v7348_v8 = vld [vmem:[#allocation45_spill] sm:$0xff]  ;;  %v7349_v53 = vld [vmem:[#allocation46_spill] sm:$0xff] }
 0xea4   :  { %3310 = vmatprep.subr.bf16.mxu0 %v7266_v26  ;;  %3351 = vmatprep.subr.bf16.mxu1 %v7267_v21  ;;  %v7350_v26 = vld [vmem:[#allocation47_spill] sm:$0xff]  ;;  %v7351_v21 = vld [vmem:[#allocation48_spill] sm:$0xff] }
 0xea7   :  { %3311 = vmatpush1.bf16.msra.mxu0 %v7268_v23  ;;  %3352 = vmatpush1.bf16.msra.mxu1 %v7269_v11  ;;  %v7352_v23 = vld [vmem:[#allocation49_spill] sm:$0xff]  ;;  %v7353_v11 = vld [vmem:[#allocation50_spill] sm:$0xff] }
 0xea8   :  { %3312 = vmatprep.subr.bf16.mxu0 %v7270_v34  ;;  %3353 = vmatprep.subr.bf16.mxu1 %v7271_v20 }
 0xeab   :  { %3313 = vmatpush1.bf16.msra.mxu0 %v7272_v0  ;;  %3354 = vmatpush1.bf16.msra.mxu1 %v7273_v19  ;;  %v7354_v0 = vld [vmem:[#allocation99_spill] sm:$0xff] }
 0xeac   :  { %3314 = vmatprep.subr.bf16.mxu0 %v7274_v15  ;;  %3355 = vmatprep.subr.bf16.mxu1 %v7275_v36 }
 0xeaf   :  { %3315 = vmatpush1.bf16.msra.mxu0 %v7276_v41  ;;  %3356 = vmatpush1.bf16.msra.mxu1 %v7277_v42 }
 0xeb0   :  { %3316 = vmatprep.subr.bf16.mxu0 %v7278_v61  ;;  %3357 = vmatprep.subr.bf16.mxu1 %v7279_v43 }
 0xeb3   :  { %3317 = vmatpush1.bf16.msra.mxu0 %v7280_v45  ;;  %3358 = vmatpush1.bf16.msra.mxu1 %v7343_v57 }
 0xeb4   :  { %3318 = vmatprep.subr.bf16.mxu0 %v7344_v2  ;;  %3359 = vmatprep.subr.bf16.mxu1 %v7345_v1  ;;  %v7372_v1 = vld [vmem:[#allocation64_spill] sm:$0xff] }
 0xeb7   :  { %3319 = vmatpush1.bf16.msra.mxu0 %v7346_v17  ;;  %3360 = vmatpush1.bf16.msra.mxu1 %v7347_v63  ;;  %v7373_v17 = vld [vmem:[#allocation65_spill] sm:$0xff]  ;;  %v7374_v63 = vld [vmem:[#allocation66_spill] sm:$0xff] }
 0xeb8   :  { %3320 = vmatprep.subr.bf16.mxu0 %v7348_v8  ;;  %3361 = vmatprep.subr.bf16.mxu1 %v7349_v53  ;;  %v7375_v8 = vld [vmem:[#allocation67_spill] sm:$0xff]  ;;  %v7376_v53 = vld [vmem:[#allocation68_spill] sm:$0xff] }
 0xebb   :  { %3321 = vmatpush1.bf16.msra.mxu0 %v7350_v26  ;;  %3362 = vmatpush1.bf16.msra.mxu1 %v7351_v21  ;;  %v7377_v26 = vld [vmem:[#allocation69_spill] sm:$0xff]  ;;  %v7378_v21 = vld [vmem:[#allocation70_spill] sm:$0xff] }
 0xebc   :  { %3392 = vmatprep.subr.bf16.mxu0 %v7352_v23  ;;  %3433 = vmatprep.subr.bf16.mxu1 %v7353_v11  ;;  %v7380_v23 = vld [vmem:[#allocation14_spill] sm:$0xff]  ;;  %v7381_v11 = vld [vmem:[#allocation75_spill] sm:$0xff] }
 0xf71   :  { %v3229_v34 = vpop.f32.mrb[64].mxu0  ;;  %v3270_v20 = vpop.f32.mrb[64].mxu1 }
 0xf72   :  { %v3840_v19 = vadd.f32 %v3229_v34, %v7354_v0  ;;  %v3231_v15 = vpop.f32.mrb[65].mxu0  ;;  %v3272_v36 = vpop.f32.mrb[65].mxu1  ;;  %v3842_v31 = vadd.f32 %v3270_v20, %v5265_v59  ;;  %v7382_v34 = vld [vmem:[#allocation76_spill] sm:$0xff]  ;;  %v7383_v20 = vld [vmem:[#allocation77_spill] sm:$0xff] }
 0xf73   :  { %v3841_v41 = vadd.f32 %v3231_v15, %v5254_v40  ;;  %v3233_v42 = vpop.f32.mrb[66].mxu0  ;;  %v3274_v61 = vpop.f32.mrb[66].mxu1  ;;  %v3843_v55 = vadd.f32 %v3272_v36, %v5260_v56  ;;  %v7386_v15 = vld [vmem:[#allocation85_spill] sm:$0xff]  ;;  %v7387_v36 = vld [vmem:[#allocation86_spill] sm:$0xff] }
 0xf74   :  { %v3805_v43 = vmul.f32 -1.442695, %v3840_v19  ;;  %v3234_v45 = vpop.f32.mrb[67].mxu0  ;;  %v3275_v16 = vpop.f32.mrb[67].mxu1  ;;  %v7384_v19 = vld [vmem:[#allocation83_spill] sm:$0xff]  ;;  %v7390_v61 = vld [vmem:[#allocation16_spill] sm:$0xff] }
 0xf75   :  { %v3806_v47 = vmul.f32 -1.442695, %v3841_v41  ;;  %v3807_v35 = vmul.f32 -1.442695, %v3843_v55  ;;  %v7388_v41 = vld [vmem:[#allocation78_spill] sm:$0xff]  ;;  %v7389_v42 = vld [vmem:[#allocation15_spill] sm:$0xff] }
 0xf76   :  { %4324 = vpow2.f32 %v3805_v43  ;;  %v7391_v43 = vld [vmem:[#allocation17_spill] sm:$0xff]  ;;  %v7392_v45 = vld [vmem:[#allocation18_spill] sm:$0xff]  ;;  %v7393_v16 = vld [vmem:[#allocation19_spill] sm:$0xff] }
 0xf77   :  { %4326 = vpow2.f32 %v3806_v47  ;;  %v7394_v47 = vld [vmem:[#allocation20_spill] sm:$0xff]  ;;  %v7395_v55 = vld [vmem:[#allocation21_spill] sm:$0xff] }
 0xf78   :  { %4328 = vpow2.f32 %v3807_v35  ;;  %v7396_v35 = vld [vmem:[#allocation22_spill] sm:$0xff] }
 0xf79   :  { %4330 = vtanh.f32 %v3842_v31  ;;  %v7397_v31 = vld [vmem:[#allocation23_spill] sm:$0xff] }
 0xf80   :  { %v4325_v62 = vpop.eup %4324 }
 0xf81   :  { %v4327_v9 = vpop.eup %4326  ;;  %v3284_v50 = vadd.f32 1.0, %v4325_v62  ;;  %v7398_v62 = vld [vmem:[#allocation24_spill] sm:$0xff] }
 0xf82   :  { %v3290_v22 = vadd.f32 1.0, %v4327_v9  ;;  %v4329_v52 = vpop.eup %4328  ;;  %v7399_v9 = vld [vmem:[#allocation25_spill] sm:$0xff] }
 0xf83   :  { %4332 = vrcp.f32 %v3284_v50  ;;  %v4331_v54 = vpop.eup %4330  ;;  %v3297_v28 = vadd.f32 1.0, %v4329_v52  ;;  %v7400_v50 = vld [vmem:[#allocation87_spill] sm:$0xff] }
 0xf84   :  { %4334 = vrcp.f32 %v3290_v22 }
 0xf85   :  { %4336 = vrcp.f32 %v3297_v28 }
 0xf8d   :  { %v4333_v5 = vpop.eup %4332 }
 0xf8e   :  { %v4335_v24 = vpop.eup %4334  ;;  %v3301_v30 = vmul.f32 %v4333_v5, %v4331_v54  ;;  %v7401_v54 = vld [vmem:[#allocation95_spill] sm:$0xff] }
 0xf8f   :  { %v3300_v38 = vmul.f32 %v4335_v24, %v6180_v7  ;;  %v4337_v46 = vpop.eup %4336  ;;  %v7371_v7 = vld [vmem:[#allocation63_spill] sm:$0xff]  ;;  %v7402_v24 = vld [vmem:[#allocation96_spill] sm:$0xff] }
 0xf91   :  { %v6396_v12 = vadd.f32 %v3301_v30, %v3300_v38 }
 0xf93   :  { %4338 = vtanh.f32 %v6396_v12 }
 0xf9d   :  { %v4339_v33 = vpop.eup %4338 }
 0xf9e   :  { %v3304_v57 = vmul.f32 %v4339_v33, %v4337_v46  ;;  %v7403_v46 = vld [vmem:[#allocation97_spill] sm:$0xff] }
 0xfa0   :  { %v3305_v2 = vpack.c.bf16 %v3304_v57, %v3304_v57  ;;  %v7404_v57 = vld [vmem:[#allocation98_spill] sm:$0xff] }
 0xfa2   :  { %3339 = vmatmul.mubr.bf16.vlgmr.msra.gmra.mrb[72].mxu0 %v3305_v2  ;;  %3380 = vmatmul.mubr.bf16.vlgmr.msra.gmra.mrb[72].mxu1 %v3305_v2 }
 0xfa3   :  { %3393 = vmatpush1.bf16.msra.mxu0 %v6027_v48  ;;  %3434 = vmatpush1.bf16.msra.mxu1 %v6030_v3  ;;  %v7355_v48 = vld [vmem:[#allocation51_spill] sm:$0xff]  ;;  %v7356_v3 = vld [vmem:[#allocation52_spill] sm:$0xff] }
 0xfa4   :  { %3394 = vmatprep.subr.bf16.mxu0 %v6033_v18  ;;  %3435 = vmatprep.subr.bf16.mxu1 %v6036_v60  ;;  %v7357_v18 = vld [vmem:[#allocation53_spill] sm:$0xff]  ;;  %v7358_v60 = vld [vmem:[#allocation54_spill] sm:$0xff] }
 0xfa5   :  { %3424 = vmatprep.mubr.bf16.mxu0 %v6899_v32  ;;  %3465 = vmatprep.mubr.bf16.mxu1 %v6899_v32 }
 0xfa7   :  { %3395 = vmatpush1.bf16.msra.mxu0 %v6041_v10  ;;  %3436 = vmatpush1.bf16.msra.mxu1 %v6044_v27  ;;  %v7359_v10 = vld [vmem:[#allocation55_spill] sm:$0xff]  ;;  %v7360_v27 = vld [vmem:[#allocation56_spill] sm:$0xff] }
 0xfa8   :  { %3396 = vmatprep.subr.bf16.mxu0 %v6047_v14  ;;  %3437 = vmatprep.subr.bf16.mxu1 %v6050_v13  ;;  %v7361_v14 = vld [vmem:[#allocation57_spill] sm:$0xff]  ;;  %v7362_v13 = vld [vmem:[#allocation58_spill] sm:$0xff] }
 0xfab   :  { %3397 = vmatpush1.bf16.msra.mxu0 %v6053_v29  ;;  %3438 = vmatpush1.bf16.msra.mxu1 %v6056_v39  ;;  %v7363_v29 = vld [vmem:[#allocation59_spill] sm:$0xff]  ;;  %v7364_v39 = vld [vmem:[#allocation60_spill] sm:$0xff] }
 0xfac   :  { %3398 = vmatprep.subr.bf16.mxu0 %v6059_v25  ;;  %3439 = vmatprep.subr.bf16.mxu1 %v6062_v4  ;;  %v7365_v25 = vld [vmem:[#allocation71_spill] sm:$0xff]  ;;  %v7366_v4 = vld [vmem:[#allocation72_spill] sm:$0xff] }
 0xfaf   :  { %3399 = vmatpush1.bf16.msra.mxu0 %v6065_v44  ;;  %3440 = vmatpush1.bf16.msra.mxu1 %v6068_v6  ;;  %v7367_v44 = vld [vmem:[#allocation73_spill] sm:$0xff]  ;;  %v7368_v6 = vld [vmem:[#allocation74_spill] sm:$0xff] }
 0xfb0   :  { %3400 = vmatprep.subr.bf16.mxu0 %v6071_v37  ;;  %3441 = vmatprep.subr.bf16.mxu1 %v6074_v58  ;;  %v7369_v37 = vld [vmem:[#allocation61_spill] sm:$0xff]  ;;  %v7370_v58 = vld [vmem:[#allocation62_spill] sm:$0xff] }
 0xfb3   :  { %3401 = vmatpush1.bf16.msra.mxu0 %v7355_v48  ;;  %3442 = vmatpush1.bf16.msra.mxu1 %v7356_v3 }
 0xfb4   :  { %3402 = vmatprep.subr.bf16.mxu0 %v7357_v18  ;;  %3443 = vmatprep.subr.bf16.mxu1 %v7358_v60 }
 0xfb7   :  { %3403 = vmatpush1.bf16.msra.mxu0 %v7359_v10  ;;  %3444 = vmatpush1.bf16.msra.mxu1 %v7360_v27 }
 0xfb8   :  { %3404 = vmatprep.subr.bf16.mxu0 %v7361_v14  ;;  %3445 = vmatprep.subr.bf16.mxu1 %v7362_v13 }
 0xfbb   :  { %3405 = vmatpush1.bf16.msra.mxu0 %v7363_v29  ;;  %3446 = vmatpush1.bf16.msra.mxu1 %v7364_v39 }
 0xfbc   :  { %3406 = vmatprep.subr.bf16.mxu0 %v7365_v25  ;;  %3447 = vmatprep.subr.bf16.mxu1 %v7366_v4 }
 0xfbf   :  { %3407 = vmatpush1.bf16.msra.mxu0 %v7367_v44  ;;  %3448 = vmatpush1.bf16.msra.mxu1 %v7368_v6 }
 0xfc0   :  { %3507 = vmatprep.subr.bf16.mxu0 %v7369_v37  ;;  %3548 = vmatprep.subr.bf16.mxu1 %v7370_v58 }
 0xfc2   :  { %3425 = vmatmul.mubr.bf16.vlgmr.msra.gmra.mrb[76].mxu0 %v6353_v49  ;;  %3466 = vmatmul.mubr.bf16.vlgmr.msra.gmra.mrb[76].mxu1 %v6353_v49  ;;  %v7379_v49 = vld [vmem:[#allocation13_spill] sm:$0xff] }
 0xfc3   :  { %3508 = vmatpush1.bf16.msra.mxu0 %v7371_v7  ;;  %3549 = vmatpush1.bf16.msra.mxu1 %v7372_v1 }
 0xfc4   :  { %3509 = vmatprep.subr.bf16.mxu0 %v7373_v17  ;;  %3550 = vmatprep.subr.bf16.mxu1 %v7374_v63 }
 0xfc5   :  { %3539 = vmatprep.mubr.bf16.mxu0 %v6899_v32  ;;  %3580 = vmatprep.mubr.bf16.mxu1 %v6899_v32  ;;  %v7385_v32 = vld [vmem:[#allocation84_spill] sm:$0xff] }
 0xfc7   :  { %3510 = vmatpush1.bf16.msra.mxu0 %v7375_v8  ;;  %3551 = vmatpush1.bf16.msra.mxu1 %v7376_v53 }
 0xfc8   :  { %3511 = vmatprep.subr.bf16.mxu0 %v7377_v26  ;;  %3552 = vmatprep.subr.bf16.mxu1 %v7378_v21 }
 0xfcb   :  { %3512 = vmatpush1.bf16.msra.mxu0 %v7379_v49  ;;  %3553 = vmatpush1.bf16.msra.mxu1 %v7380_v23 }
 0xfcc   :  { %3513 = vmatprep.subr.bf16.mxu0 %v7381_v11  ;;  %3554 = vmatprep.subr.bf16.mxu1 %v7382_v34 }
 0xfcf   :  { %3514 = vmatpush1.bf16.msra.mxu0 %v7383_v20  ;;  %3555 = vmatpush1.bf16.msra.mxu1 %v7384_v19 }
 0xfd0   :  { %3515 = vmatprep.subr.bf16.mxu0 %v7385_v32  ;;  %3556 = vmatprep.subr.bf16.mxu1 %v7386_v15 }
 0xfd3   :  { %3516 = vmatpush1.bf16.msra.mxu0 %v7387_v36  ;;  %3557 = vmatpush1.bf16.msra.mxu1 %v7388_v41 }
 0xfd4   :  { %3517 = vmatprep.subr.bf16.mxu0 %v7389_v42  ;;  %3558 = vmatprep.subr.bf16.mxu1 %v7390_v61 }
 0xfd7   :  { %3518 = vmatpush1.bf16.msra.mxu0 %v7391_v43  ;;  %3559 = vmatpush1.bf16.msra.mxu1 %v7392_v45 }
 0xfd8   :  { %3519 = vmatprep.subr.bf16.mxu0 %v7393_v16  ;;  %3560 = vmatprep.subr.bf16.mxu1 %v7394_v47 }
 0xfdb   :  { %3520 = vmatpush1.bf16.msra.mxu0 %v7395_v55  ;;  %3561 = vmatpush1.bf16.msra.mxu1 %v7396_v35 }
 0xfdc   :  { %3521 = vmatprep.subr.bf16.mxu0 %v7397_v31  ;;  %3562 = vmatprep.subr.bf16.mxu1 %v7398_v62 }
 0xfdf   :  { %3522 = vmatpush1.bf16.msra.mxu0 %v7399_v9  ;;  %3563 = vmatpush1.bf16.msra.mxu1 %v7400_v50 }
0x1095   :  { %v3426_v22 = vpop.f32.mrb[76].mxu0  ;;  %v3467_v52 = vpop.f32.mrb[76].mxu1 }
0x1096   :  { %v3474_v5 = vadd.f32 %v3426_v22, %v7401_v54  ;;  %v3476_v30 = vadd.f32 %v3467_v52, %v7402_v24  ;;  %v3428_v28 = vpop.f32.mrb[77].mxu0  ;;  %v3469_v38 = vpop.f32.mrb[77].mxu1 }
0x1097   :  { %v3475_v33 = vadd.f32 %v3428_v28, %v7403_v46  ;;  %v3477_v2 = vadd.f32 %v3469_v38, %v7404_v57  ;;  %v3430_v48 = vpop.f32.mrb[78].mxu0  ;;  %v3471_v3 = vpop.f32.mrb[78].mxu1 }
0x1098   :  { %v3808_v18 = vmul.f32 -1.442695, %v3474_v5  ;;  %v3431_v60 = vpop.f32.mrb[79].mxu0  ;;  %v3472_v10 = vpop.f32.mrb[79].mxu1 }
0x1099   :  { %v3809_v27 = vmul.f32 -1.442695, %v3475_v33  ;;  %v3810_v14 = vmul.f32 -1.442695, %v3477_v2 }
0x109a   :  { %4340 = vpow2.f32 %v3808_v18 }
0x109b   :  { %4342 = vpow2.f32 %v3809_v27 }
0x109c   :  { %4344 = vpow2.f32 %v3810_v14 }
0x109d   :  { %4346 = vtanh.f32 %v3476_v30 }
0x10a4   :  { %v4341_v13 = vpop.eup %4340 }
0x10a5   :  { %v4343_v29 = vpop.eup %4342  ;;  %v3481_v39 = vadd.f32 1.0, %v4341_v13 }
0x10a6   :  { %v3487_v25 = vadd.f32 1.0, %v4343_v29  ;;  %v4345_v4 = vpop.eup %4344 }
0x10a7   :  { %4348 = vrcp.f32 %v3481_v39  ;;  %v4347_v44 = vpop.eup %4346  ;;  %v3494_v7 = vadd.f32 1.0, %v4345_v4 }
0x10a8   :  { %4350 = vrcp.f32 %v3487_v25 }
0x10a9   :  { %4352 = vrcp.f32 %v3494_v7 }
0x10b1   :  { %v4349_v6 = vpop.eup %4348 }
0x10b2   :  { %v4351_v37 = vpop.eup %4350  ;;  %v3498_v58 = vmul.f32 %v4349_v6, %v4347_v44 }
0x10b3   :  { %v3497_v1 = vmul.f32 %v4351_v37, %v6350_v51  ;;  %v4353_v63 = vpop.eup %4352 }
0x10b5   :  { %v3499_v17 = vadd.f32 %v3498_v58, %v3497_v1 }
0x10b7   :  { %4354 = vtanh.f32 %v3499_v17  ;;  %3618 = vst [vmem:[%s6497_s8] sm:$0xff] %v3499_v17 }
0x10c1   :  { %v4355_v8 = vpop.eup %4354 }
0x10c2   :  { %v3501_v53 = vmul.f32 %v4355_v8, %v4353_v63 }
0x10c4   :  { %v3506_v26 = vpack.c.bf16 %v3501_v53, %v3501_v53  ;;  %3617 = vst [vmem:[%s6496_s7] sm:$0xff] %v3501_v53 }
0x10c6   :  { %3540 = vmatmul.mubr.bf16.vlgmr.msra.gmra.mrb[72].mxu0 %v3506_v26  ;;  %3581 = vmatmul.mubr.bf16.vlgmr.msra.gmra.mrb[72].mxu1 %v3506_v26 }
0x1199   :  { %v3541_v21 = vpop.f32.mrb[72].mxu0  ;;  %v3582_v49 = vpop.f32.mrb[72].mxu1 }
0x119a   :  { %v3844_v51 = vadd.f32 %v3541_v21, %v7354_v0  ;;  %v3543_v23 = vpop.f32.mrb[73].mxu0  ;;  %v3584_v11 = vpop.f32.mrb[73].mxu1  ;;  %v3846_v43 = vadd.f32 %v3582_v49, %v5265_v59 }
0x119b   :  { %v3845_v34 = vadd.f32 %v3543_v23, %v5254_v40  ;;  %v3545_v20 = vpop.f32.mrb[74].mxu0  ;;  %v3586_v19 = vpop.f32.mrb[74].mxu1  ;;  %v3847_v42 = vadd.f32 %v3584_v11, %v5260_v56 }
0x119c   :  { %v3811_v32 = vmul.f32 -1.442695, %v3844_v51  ;;  %v3546_v15 = vpop.f32.mrb[75].mxu0  ;;  %v3587_v36 = vpop.f32.mrb[75].mxu1 }
0x119d   :  { %v3812_v41 = vmul.f32 -1.442695, %v3845_v34  ;;  %v3813_v61 = vmul.f32 -1.442695, %v3847_v42 }
0x119e   :  { %4356 = vpow2.f32 %v3811_v32 }
0x119f   :  { %4358 = vpow2.f32 %v3812_v41 }
0x11a0   :  { %4360 = vpow2.f32 %v3813_v61 }
0x11a1   :  { %4362 = vtanh.f32 %v3846_v43 }
0x11a8   :  { %v4357_v45 = vpop.eup %4356 }
0x11a9   :  { %v4359_v16 = vpop.eup %4358  ;;  %v3596_v0 = vadd.f32 1.0, %v4357_v45 }
0x11aa   :  { %v3602_v47 = vadd.f32 1.0, %v4359_v16  ;;  %v4361_v40 = vpop.eup %4360 }
0x11ab   :  { %4364 = vrcp.f32 %v3596_v0  ;;  %v4363_v55 = vpop.eup %4362  ;;  %v3609_v9 = vadd.f32 1.0, %v4361_v40 }
0x11ac   :  { %4366 = vrcp.f32 %v3602_v47 }
0x11ad   :  { %4368 = vrcp.f32 %v3609_v9 }
0x11b5   :  { %v4365_v35 = vpop.eup %4364 }
0x11b6   :  { %v4367_v31 = vpop.eup %4366  ;;  %v3613_v62 = vmul.f32 %v4365_v35, %v4363_v55 }
0x11b7   :  { %v3612_v50 = vmul.f32 %v4367_v31, %v6396_v12  ;;  %v4369_v59 = vpop.eup %4368 }
0x11b9   :  { %v3614_v56 = vadd.f32 %v3613_v62, %v3612_v50 }
0x11bb   :  { %4370 = vtanh.f32 %v3614_v56  ;;  %3815 = vst [vmem:[%s6497_s8 + $0x8] sm:$0xff] %v3614_v56 }
0x11c5   :  { %v4371_v22 = vpop.eup %4370 }
0x11c6   :  { %v3616_v52 = vmul.f32 %v4371_v22, %v4369_v59 }
0x11c8   :  { %3814 = vst [vmem:[%s6496_s7 + $0x8] sm:$0xff] %v3616_v52 }
0x11c9   :  { %3629 = vsyncpa [#allocation4], 1 }
0x11ca   :  { %3630 = vsyncpa [#allocation6], 1 }
0x11cb   :  { %3631 = vsyncpa [#allocation9], 1 }

</bundles_post_ra>
